<compile_context>
chip_gen: v7x
topology: tpu7x:2x2x1
jax: 0.10.0
libtpu: 0.0.40
codegen_flags: <defaults>
</compile_context>

<pallas_src>
import functools
import math

import jax
import jax.numpy as jnp
from jax import lax
from jax.experimental import pallas as pl
from jax.experimental.pallas import tpu as pltpu


LANE = 128
SUBLANE = 8


def _round_up(x, m):
    return ((x + m - 1) // m) * m


def _vmem_capacity_bytes():
    """Physical per-core VMEM; conservative 64 MiB (v7x) fallback."""
    try:
        info = pltpu.get_tpu_info()
        for name in ("vmem_capacity_bytes", "vmem_size_bytes", "vmem_bytes"):
            v = getattr(info, name, None)
            if v:
                return int(v)
    except Exception:
        pass
    return 64 * 1024 * 1024


def _select_time_chunk(T, fixed_bytes, per_step_bytes, budget, cap=128):
    """Largest time chunk that fits the VMEM budget; prefer divisors of T
    (so the tail-masking path disappears entirely)."""
    avail = max(budget - fixed_bytes, per_step_bytes)
    c_fit = int(max(1, min(min(T, cap), avail // max(per_step_bytes, 1))))
    best_div = 1
    for d in range(1, c_fit + 1):
        if T % d == 0:
            best_div = d
    if 2 * best_div >= c_fit:
        return best_div, False          # divisor close to the max -> no masking
    return c_fit, True                  # masked tail chunk


# ----------------------------- weight packing helpers -----------------------------

def _pack_gate_weight(w, in_pad, hp, dtype=jnp.bfloat16):
    """PyTorch gate-major (4H, In) weight -> transposed, lane-padded (in_pad, 4*Hp) bf16.

    Gate g occupies lanes [g*Hp, g*Hp + H); padded rows/cols are zero so padded
    hidden lanes stay exactly zero through the recurrence.
    """
    four_h, d_in = w.shape
    h = four_h // 4
    w4 = jnp.transpose(w.reshape(4, h, d_in), (2, 0, 1))          # (In, 4, H)
    out = jnp.zeros((in_pad, 4, hp), jnp.float32).at[:d_in, :, :h].set(w4)
    return out.reshape(in_pad, 4 * hp).astype(dtype)


def _pack_gate_bias(b, hp):
    """(4H,) summed bias -> lane-padded (1, 4*Hp) f32."""
    h = b.shape[0] // 4
    out = jnp.zeros((4, hp), jnp.float32).at[:, :h].set(b.reshape(4, h))
    return out.reshape(1, 4 * hp)


# ----------------------- recurrent (per-layer) Pallas kernel -----------------------

def _sigmoid(x):
    # exp (EUP) + approximate reciprocal (EUP): keeps the three gate activations
    # per step off the VALU slots that also carry the c/h elementwise updates.
    return pl.reciprocal(1.0 + jnp.exp(-x), approx=True)


def _lstm_rec_kernel(*refs, seq_len, chunk, hp, mask_tail, with_seq, with_fc, unroll):
    it = iter(refs)
    x_ref = next(it)                                 # (Tc, Bb, Din)  bf16
    wih_ref = next(it)                               # (Din, 4Hp)     bf16  invariant
    bias_ref = next(it)                              # (1, 4Hp)       f32   invariant
    whh_ref = next(it)                               # (Hp, 4Hp)      bf16  invariant
    h0_ref = next(it)                                # (Bb, Hp)       f32
    c0_ref = next(it)                                # (Bb, Hp)       f32
    fcw_ref = next(it) if with_fc else None          # (Hp, Op)       f32   invariant
    fcb_ref = next(it) if with_fc else None          # (1, Op)        f32   invariant
    out_ref = next(it) if with_seq else None         # (Tc, Bb, Hp)   bf16
    hf_ref = next(it)                                # (Bb, Hp)       f32
    cf_ref = next(it)                                # (Bb, Hp)       f32
    fco_ref = next(it) if with_fc else None          # (Bb, Op)       f32
    gx_sc = next(it)                                 # (Tc*Bb, 4Hp)   f32 scratch
    h_sc = next(it)                                  # (Bb, Hp)       f32 scratch
    c_sc = next(it)                                  # (Bb, Hp)       f32 scratch

    ci = pl.program_id(1)                            # time-chunk index (arbitrary)
    bb = h_sc.shape[0]

    @pl.when(ci == 0)
    def _():
        h_sc[...] = h0_ref[...].astype(jnp.float32)
        c_sc[...] = c0_ref[...].astype(jnp.float32)

    # Fused input projection for the whole chunk: one batched MXU matmul with
    # M = Tc*Bb (vs. Bb for the per-step recurrent matmul), f32 accumulation.
    xc = x_ref[...]
    x2 = xc.reshape(chunk * bb, xc.shape[-1])
    gx_sc[...] = (jnp.dot(x2, wih_ref[...], preferred_element_type=jnp.float32)
                  + bias_ref[...])

    whh = whh_ref[...]                               # loop-invariant bf16 W_hh^T

    def make_step(masked):
        def step(tt, carry):
            h, c = carry                             # f32 state
            row = pl.multiple_of(tt * bb, SUBLANE)
            gates = (gx_sc[pl.ds(row, bb), :]
                     + jnp.dot(h.astype(whh.dtype), whh,
                               preferred_element_type=jnp.float32))
            # Lane-aligned gate slices (Hp multiple of 128). PyTorch order i,f,g,o.
            i_g = _sigmoid(gates[:, 0 * hp:1 * hp])
            f_g = _sigmoid(gates[:, 1 * hp:2 * hp])
            g_g = jnp.tanh(gates[:, 2 * hp:3 * hp])
            o_g = _sigmoid(gates[:, 3 * hp:4 * hp])
            c_new = f_g * c + i_g * g_g
            h_new = o_g * jnp.tanh(c_new)
            if masked:                               # only a partial tail chunk pays this
                valid = (ci * chunk + tt) < seq_len
                h_new = jnp.where(valid, h_new, h)
                c_new = jnp.where(valid, c_new, c)
            if out_ref is not None:                  # lane-dense (Bb, Hp) bf16 store
                out_ref[tt] = h_new.astype(out_ref.dtype)
            return h_new, c_new
        return step

    def run_chunk(masked):
        h, c = lax.fori_loop(0, chunk, make_step(masked),
                             (h_sc[...], c_sc[...]), unroll=unroll)
        h_sc[...] = h
        c_sc[...] = c

    if mask_tail:
        is_full = (ci + 1) * chunk <= seq_len

        @pl.when(is_full)
        def _():
            run_chunk(False)

        @pl.when(jnp.logical_not(is_full))
        def _():
            run_chunk(True)
    else:
        run_chunk(False)

    @pl.when(ci == pl.num_programs(1) - 1)
    def _():
        h_fin = h_sc[...]
        hf_ref[...] = h_fin
        cf_ref[...] = c_sc[...]
        if with_fc:
            # Fused head: relu(h_T) @ fc_w^T + fc_b (no extra pallas_call / HBM trip).
            y = (jnp.dot(jnp.maximum(h_fin, 0.0), fcw_ref[...],
                         preferred_element_type=jnp.float32) + fcb_ref[...])
            fco_ref[...] = y.astype(fco_ref.dtype)


def lstm_layer_rec(x_tm, wih_t, bias, whh_t, h0, c0, *, seq_len, chunk, mask_tail,
                   batch_block, with_seq, fc=None, vmem_limit_bytes=48 << 20,
                   unroll=8):
    """One LSTM layer: fused input projection + sequential recurrence (+ fused FC).

    x_tm  : (Tp, Bp, Din) bf16 time-major input (raw input or previous layer's h)
    wih_t : (Din, 4*Hp) bf16;  bias: (1, 4*Hp) f32;  whh_t: (Hp, 4*Hp) bf16
    h0,c0 : (Bp, Hp) f32 initial state
    fc    : optional (fc_w_t (Hp, Op) f32, fc_b (1, Op) f32) fused into last step
    Returns ([out_seq (Tp, Bp, Hp) bf16,] h_T, c_T[, fc_out]).
    """
    Tp, Bp, Din = x_tm.shape
    Hp = whh_t.shape[0]
    G4 = 4 * Hp
    Bb = batch_block
    assert Tp % chunk == 0 and Bp % Bb == 0
    n_chunks = Tp // chunk
    n_bblocks = Bp // Bb

    args = [x_tm, wih_t, bias, whh_t, h0, c0]
    if fc is not None:
        fcw_t, fcb = fc
        Op = fcw_t.shape[1]
        args += [fcw_t, fcb]

    kernel = functools.partial(
        _lstm_rec_kernel, seq_len=seq_len, chunk=chunk, hp=Hp,
        mask_tail=mask_tail, with_seq=with_seq, with_fc=fc is not None,
        unroll=min(unroll, chunk))

    def build(single_buffer):
        # Single-buffer the loop-invariant operands (halves their VMEM residency).
        inv = {"pipeline_mode": pl.Buffered(1)} if single_buffer else {}
        in_specs = [
            pl.BlockSpec((chunk, Bb, Din), lambda bi, ci: (ci, bi, 0)),   # x chunk
            pl.BlockSpec((Din, G4), lambda bi, ci: (0, 0), **inv),        # W_ih^T
            pl.BlockSpec((1, G4), lambda bi, ci: (0, 0), **inv),          # bias
            pl.BlockSpec((Hp, G4), lambda bi, ci: (0, 0), **inv),         # W_hh^T
            pl.BlockSpec((Bb, Hp), lambda bi, ci: (bi, 0)),               # h0
            pl.BlockSpec((Bb, Hp), lambda bi, ci: (bi, 0)),               # c0
        ]
        out_specs, out_shape = [], []
        if with_seq:
            out_specs.append(pl.BlockSpec((chunk, Bb, Hp), lambda bi, ci: (ci, bi, 0)))
            out_shape.append(jax.ShapeDtypeStruct((Tp, Bp, Hp), jnp.bfloat16))
        out_specs += [pl.BlockSpec((Bb, Hp), lambda bi, ci: (bi, 0)),
                      pl.BlockSpec((Bb, Hp), lambda bi, ci: (bi, 0))]
        out_shape += [jax.ShapeDtypeStruct((Bp, Hp), jnp.float32),
                      jax.ShapeDtypeStruct((Bp, Hp), jnp.float32)]
        if fc is not None:
            in_specs += [pl.BlockSpec((Hp, Op), lambda bi, ci: (0, 0), **inv),
                         pl.BlockSpec((1, Op), lambda bi, ci: (0, 0), **inv)]
            out_specs.append(pl.BlockSpec((Bb, Op), lambda bi, ci: (bi, 0)))
            out_shape.append(jax.ShapeDtypeStruct((Bp, Op), jnp.float32))

        grid_spec = pltpu.PrefetchScalarGridSpec(
            num_scalar_prefetch=0,
            grid=(n_bblocks, n_chunks),        # batch blocks parallel, time serial
            in_specs=in_specs,
            out_specs=tuple(out_specs),
            scratch_shapes=[pltpu.VMEM((chunk * Bb, G4), jnp.float32),   # gate slab
                            pltpu.VMEM((Bb, Hp), jnp.float32),           # h carry
                            pltpu.VMEM((Bb, Hp), jnp.float32)])          # c carry
        return pl.pallas_call(
            kernel,
            out_shape=tuple(out_shape),
            grid_spec=grid_spec,
            compiler_params=pltpu.CompilerParams(
                dimension_semantics=("parallel", "arbitrary"),
                vmem_limit_bytes=int(vmem_limit_bytes)))

    try:
        return build(True)(*args)
    except Exception:
        # Fallback if single-buffered (Buffered(1)) specs aren't supported.
        return build(False)(*args)


# --------------------------------- Module glue ---------------------------------

class LSTMPallas:
    """Mirrors the PyTorch `LSTM` module's forward (eval mode)."""

    def __init__(self, input_dim, hidden_dim, output_dim, n_layers, dropout=0.2,
                 key=jax.random.PRNGKey(0)):
        self.input_dim = input_dim
        self.hidden_dim = hidden_dim
        self.output_dim = output_dim
        self.n_layers = n_layers
        self.dropout = dropout                    # eval-mode: unused
        self.Hp = _round_up(hidden_dim, LANE)
        self.Op = _round_up(output_dim, LANE)

        k = 1.0 / math.sqrt(hidden_dim)
        params = {}
        for l in range(n_layers):
            d_in = input_dim if l == 0 else hidden_dim
            key, k1, k2, k3, k4 = jax.random.split(key, 5)
            params[f"w_ih_l{l}"] = jax.random.uniform(k1, (4 * hidden_dim, d_in),
                                                      jnp.float32, -k, k)
            params[f"w_hh_l{l}"] = jax.random.uniform(k2, (4 * hidden_dim, hidden_dim),
                                                      jnp.float32, -k, k)
            params[f"b_ih_l{l}"] = jax.random.uniform(k3, (4 * hidden_dim,),
                                                      jnp.float32, -k, k)
            params[f"b_hh_l{l}"] = jax.random.uniform(k4, (4 * hidden_dim,),
                                                      jnp.float32, -k, k)
        key, k1, k2 = jax.random.split(key, 3)
        params["fc_w"] = jax.random.uniform(k1, (output_dim, hidden_dim),
                                            jnp.float32, -k, k)
        params["fc_b"] = jax.random.uniform(k2, (output_dim,), jnp.float32, -k, k)
        self.params = params
        self.packed = self._pack(params)          # pre-transposed / padded / bf16, once

    def _pack(self, p):
        H, Hp, Op = self.hidden_dim, self.Hp, self.Op
        packed = {}
        for l in range(self.n_layers):
            in_pad = self.input_dim if l == 0 else Hp
            packed[f"wih_t_l{l}"] = _pack_gate_weight(p[f"w_ih_l{l}"], in_pad, Hp)
            packed[f"whh_t_l{l}"] = _pack_gate_weight(p[f"w_hh_l{l}"], Hp, Hp)
            packed[f"bias_l{l}"] = _pack_gate_bias(p[f"b_ih_l{l}"] + p[f"b_hh_l{l}"], Hp)
        packed["fc_w_t"] = (jnp.zeros((Hp, Op), jnp.float32)
                            .at[:H, :self.output_dim].set(p["fc_w"].T))
        packed["fc_b"] = (jnp.zeros((1, Op), jnp.float32)
                          .at[0, :self.output_dim].set(p["fc_b"]))
        return packed

    def init_hidden(self, batch_size):
        z = jnp.zeros((self.n_layers, batch_size, self.hidden_dim), jnp.float32)
        return (z, z)

    def forward(self, x, h):
        """x: (B, T, input_dim) batch_first; h = (h0, c0) each (n_layers, B, H)."""
        h0, c0 = h
        B, T, D = x.shape
        H, Hp, Op, L = self.hidden_dim, self.Hp, self.Op, self.n_layers

        # Batch blocking: at most two blocks -> feeds v7x's two TensorCores via the
        # "parallel" leading grid axis; single block for small batch / single-TC chips.
        n_bblocks = 1 if B <= SUBLANE else 2
        Bb = _round_up(-(-B // n_bblocks), SUBLANE)
        Bp = n_bblocks * Bb

        # Time chunk + VMEM limit derived from the device's VMEM capacity.
        din_max = max(D, Hp) if L > 1 else D
        per_step = (2 * Bb * din_max * 2                  # x chunk (double-buffered bf16)
                    + (2 * Bb * Hp * 2 if L > 1 else 0)   # out_seq chunk (bf16)
                    + Bb * 4 * Hp * 4)                    # gate scratch (f32)
        fixed = (din_max * 4 * Hp * 2                     # W_ih^T (bf16, single-buffered)
                 + Hp * 4 * Hp * 2                        # W_hh^T (bf16, single-buffered)
                 + 4 * Hp * 4                             # bias (f32)
                 + 2 * 2 * Bb * Hp * 4                    # h0/c0 (f32, double-buffered)
                 + Hp * Op * 4 + Op * 4                   # fc weights (f32)
                 + 2 * Bb * Hp * 4                        # h/c carry scratch (f32)
                 + 8 * Bb * max(Hp, Op) * 4)              # final-state/fc outputs + margin
        cap = _vmem_capacity_bytes()
        Tc, mask_tail = _select_time_chunk(T, fixed, per_step, int(cap * 0.7))
        Tp = _round_up(T, Tc)
        vmem_limit = int(min(0.9 * cap,
                             max(fixed + Tc * per_step + (8 << 20), 32 << 20)))

        # Time-major, padded, bf16 inputs / f32 initial state.
        x_tm = jnp.transpose(x, (1, 0, 2)).astype(jnp.bfloat16)
        x_tm = jnp.pad(x_tm, ((0, Tp - T), (0, Bp - B), (0, 0)))
        h0_p = jnp.zeros((L, Bp, Hp), jnp.float32).at[:, :B, :H].set(h0)
        c0_p = jnp.zeros((L, Bp, Hp), jnp.float32).at[:, :B, :H].set(c0)

        # TODO(synk): on v7x with B <= 8 and n_layers >= 2, a core_map wavefront
        # (layer l on core 1 while layer l-1 runs step t+1 on core 0) would also use
        # the second TensorCore; not implemented here.
        seq = x_tm
        h_fin, c_fin, fc_out = [], [], None
        for l in range(L):
            with_fc = (l == L - 1)
            with_seq = (l < L - 1)                 # top layer's sequence is never read
            fc = (self.packed["fc_w_t"], self.packed["fc_b"]) if with_fc else None
            res = list(lstm_layer_rec(
                seq, self.packed[f"wih_t_l{l}"], self.packed[f"bias_l{l}"],
                self.packed[f"whh_t_l{l}"], h0_p[l], c0_p[l],
                seq_len=T, chunk=Tc, mask_tail=mask_tail, batch_block=Bb,
                with_seq=with_seq, fc=fc, vmem_limit_bytes=vmem_limit))
            if with_seq:
                seq = res.pop(0)                   # bf16 (Tp, Bp, Hp) for next layer
            h_l = res.pop(0)
            c_l = res.pop(0)
            if with_fc:
                fc_out = res.pop(0)
            h_fin.append(h_l[:B, :H])
            c_fin.append(c_l[:B, :H])

        out = fc_out[:B, :self.output_dim]
        return out, (jnp.stack(h_fin, 0), jnp.stack(c_fin, 0))


# ------------------------------- Pure-JAX reference -------------------------------

def _reference_forward(model, x, h):
    h0, c0 = h
    p = model.params
    H = model.hidden_dim
    inp = x
    hs, cs = [], []
    for l in range(model.n_layers):
        w_ih, w_hh = p[f"w_ih_l{l}"], p[f"w_hh_l{l}"]
        b = p[f"b_ih_l{l}"] + p[f"b_hh_l{l}"]
        hh, cc = h0[l], c0[l]
        outs = []
        for t in range(inp.shape[1]):
            g = inp[:, t] @ w_ih.T + hh @ w_hh.T + b
            i = jax.nn.sigmoid(g[:, :H])
            f = jax.nn.sigmoid(g[:, H:2 * H])
            gg = jnp.tanh(g[:, 2 * H:3 * H])
            o = jax.nn.sigmoid(g[:, 3 * H:])
            cc = f * cc + i * gg
            hh = o * jnp.tanh(cc)
            outs.append(hh)
        inp = jnp.stack(outs, axis=1)
        hs.append(hh)
        cs.append(cc)
    out = jnp.maximum(inp[:, -1], 0.0) @ p["fc_w"].T + p["fc_b"]
    return out, (jnp.stack(hs, 0), jnp.stack(cs, 0))


if __name__ == "__main__":
    B, T, D, H, O, L = 2, 8, 8, 32, 4, 2

    model = LSTMPallas(input_dim=D, hidden_dim=H, output_dim=O, n_layers=L,
                       key=jax.random.PRNGKey(42))

    key = jax.random.PRNGKey(0)
    x = jax.random.normal(key, (B, T, D), jnp.float32)
    h = model.init_hidden(B)

    out, (h_n, c_n) = model.forward(x, h)
    jax.block_until_ready((out, h_n, c_n))

    ref_out, (ref_h, ref_c) = _reference_forward(model, x, h)
    assert out.shape == (B, O) and h_n.shape == (L, B, H) and c_n.shape == (L, B, H)
    # bf16 MXU operands + approx-reciprocal sigmoid -> loosened tolerance.
    assert jnp.allclose(out, ref_out, atol=2e-2, rtol=2e-2)
    assert jnp.allclose(h_n, ref_h, atol=2e-2, rtol=2e-2)
    assert jnp.allclose(c_n, ref_c, atol=2e-2, rtol=2e-2)

    print("KERNEL_OK")
</pallas_src>

<mosaic_0001>
module attributes {stable_mosaic.version = 11 : i64} {
  func.func @_lstm_rec_kernel(%arg0: i32, %arg1: i32, %arg2: memref<8x8x8xbf16, #tpu.memory_space<vmem>>, %arg3: memref<8x512xbf16, #tpu.memory_space<vmem>>, %arg4: memref<1x512xf32, #tpu.memory_space<vmem>>, %arg5: memref<128x512xbf16, #tpu.memory_space<vmem>>, %arg6: memref<8x128xf32, #tpu.memory_space<vmem>>, %arg7: memref<8x128xf32, #tpu.memory_space<vmem>>, %arg8: memref<8x8x128xbf16, #tpu.memory_space<vmem>>, %arg9: memref<8x128xf32, #tpu.memory_space<vmem>>, %arg10: memref<8x128xf32, #tpu.memory_space<vmem>>, %arg11: memref<64x512xf32, #tpu.memory_space<vmem>>, %arg12: memref<8x128xf32, #tpu.memory_space<vmem>>, %arg13: memref<8x128xf32, #tpu.memory_space<vmem>>) attributes {dimension_semantics = [#tpu.dimension_semantics<parallel>, #tpu.dimension_semantics<arbitrary>], iteration_bounds = array<i64: 1, 1>, scalar_prefetch = 0 : i64, scratch_operands = 3 : i64, tpu.core_type = #tpu.core_type<tc>, window_params = [{transform_indices = @transform_0, window_bounds = array<i64: 8, 8, 8>}, {pipeline_mode = #tpu.pipeline_mode<synchronous>, transform_indices = @transform_1, window_bounds = array<i64: 8, 512>}, {pipeline_mode = #tpu.pipeline_mode<synchronous>, transform_indices = @transform_2, window_bounds = array<i64: 1, 512>}, {pipeline_mode = #tpu.pipeline_mode<synchronous>, transform_indices = @transform_3, window_bounds = array<i64: 128, 512>}, {transform_indices = @transform_4, window_bounds = array<i64: 8, 128>}, {transform_indices = @transform_5, window_bounds = array<i64: 8, 128>}, {transform_indices = @transform_6, window_bounds = array<i64: 8, 8, 128>}, {transform_indices = @transform_7, window_bounds = array<i64: 8, 128>}, {transform_indices = @transform_8, window_bounds = array<i64: 8, 128>}]} {
    %c0_i32 = arith.constant 0 : i32
    %0 = arith.cmpi eq, %arg1, %c0_i32 : i32
    %1 = arith.extui %0 : i1 to i32
    %c0_i32_0 = arith.constant 0 : i32
    %2 = arith.cmpi ne, %1, %c0_i32_0 : i32
    scf.if %2 {
      %c0_110 = arith.constant 0 : index
      %c0_111 = arith.constant 0 : index
      %339 = vector.load %arg6[%c0_110, %c0_111] : memref<8x128xf32, #tpu.memory_space<vmem>>, vector<8x128xf32>
      %c0_112 = arith.constant 0 : index
      %c0_113 = arith.constant 0 : index
      %340 = vector.load %arg12[%c0_112, %c0_113] : memref<8x128xf32, #tpu.memory_space<vmem>>, vector<8x128xf32>
      tpu.vector_store %arg12[%c0_112, %c0_113], %339 {strides = array<i32>} : memref<8x128xf32, #tpu.memory_space<vmem>>, vector<8x128xf32>,
      %c0_114 = arith.constant 0 : index
      %c0_115 = arith.constant 0 : index
      %341 = vector.load %arg7[%c0_114, %c0_115] : memref<8x128xf32, #tpu.memory_space<vmem>>, vector<8x128xf32>
      %c0_116 = arith.constant 0 : index
      %c0_117 = arith.constant 0 : index
      %342 = vector.load %arg13[%c0_116, %c0_117] : memref<8x128xf32, #tpu.memory_space<vmem>>, vector<8x128xf32>
      tpu.vector_store %arg13[%c0_116, %c0_117], %341 {strides = array<i32>} : memref<8x128xf32, #tpu.memory_space<vmem>>, vector<8x128xf32>,
    } else {
    }
    %c0 = arith.constant 0 : index
    %c0_1 = arith.constant 0 : index
    %c0_2 = arith.constant 0 : index
    %3 = vector.load %arg2[%c0, %c0_1, %c0_2] : memref<8x8x8xbf16, #tpu.memory_space<vmem>>, vector<8x8x8xbf16>
    %4 = vector.shape_cast %3 : vector<8x8x8xbf16> to vector<64x8xbf16>
    %c0_3 = arith.constant 0 : index
    %c0_4 = arith.constant 0 : index
    %5 = vector.load %arg3[%c0_3, %c0_4] : memref<8x512xbf16, #tpu.memory_space<vmem>>, vector<8x512xbf16>
    %cst = arith.constant dense<0.000000e+00> : vector<64x512xf32>
    %6 = tpu.matmul %4, %5, %cst {dimension_numbers = #tpu.dot_dimension_numbers<[1], [0], [0], [1], [0, 0, 1, 1], [], []>} : vector<64x8xbf16>, vector<8x512xbf16>, vector<64x512xf32> -> vector<64x512xf32>
    %c0_5 = arith.constant 0 : index
    %c0_6 = arith.constant 0 : index
    %7 = vector.load %arg4[%c0_5, %c0_6] : memref<1x512xf32, #tpu.memory_space<vmem>>, vector<1x512xf32>
    %8 = vector.broadcast %7 : vector<1x512xf32> to vector<64x512xf32>
    %9 = arith.addf %6, %8 : vector<64x512xf32>
    %c0_7 = arith.constant 0 : index
    %c0_8 = arith.constant 0 : index
    %10 = vector.load %arg11[%c0_7, %c0_8] : memref<64x512xf32, #tpu.memory_space<vmem>>, vector<64x512xf32>
    tpu.vector_store %arg11[%c0_7, %c0_8], %9 {strides = array<i32>} : memref<64x512xf32, #tpu.memory_space<vmem>>, vector<64x512xf32>,
    %c0_9 = arith.constant 0 : index
    %c0_10 = arith.constant 0 : index
    %11 = vector.load %arg5[%c0_9, %c0_10] : memref<128x512xbf16, #tpu.memory_space<vmem>>, vector<128x512xbf16>
    %c0_11 = arith.constant 0 : index
    %c0_12 = arith.constant 0 : index
    %12 = vector.load %arg12[%c0_11, %c0_12] : memref<8x128xf32, #tpu.memory_space<vmem>>, vector<8x128xf32>
    %c0_13 = arith.constant 0 : index
    %c0_14 = arith.constant 0 : index
    %13 = vector.load %arg13[%c0_13, %c0_14] : memref<8x128xf32, #tpu.memory_space<vmem>>, vector<8x128xf32>
    %c0_i32_15 = arith.constant 0 : i32
    %c8_i32 = arith.constant 8 : i32
    %14 = arith.muli %c0_i32_15, %c8_i32 : i32
    %15 = tpu.assume_multiple %14, 8 : i32
    %16 = arith.index_cast %15 : i32 to index
    %c0_16 = arith.constant 0 : index
    %17 = vector.load %arg11[%16, %c0_16] : memref<64x512xf32, #tpu.memory_space<vmem>>, vector<8x512xf32>
    %18 = arith.truncf %12 : vector<8x128xf32> to vector<8x128xbf16>
    %cst_17 = arith.constant dense<0.000000e+00> : vector<8x512xf32>
    %19 = tpu.matmul %18, %11, %cst_17 {dimension_numbers = #tpu.dot_dimension_numbers<[1], [0], [0], [1], [0, 0, 1, 1], [], []>} : vector<8x128xbf16>, vector<128x512xbf16>, vector<8x512xf32> -> vector<8x512xf32>
    %20 = arith.addf %17, %19 : vector<8x512xf32>
    %21 = vector.extract_strided_slice %20 {offsets = [0, 0], sizes = [8, 128], strides = [1, 1]} : vector<8x512xf32> to vector<8x128xf32>
    %cst_18 = arith.constant 0.000000e+00 : f32
    %22 = vector.broadcast %cst_18 : f32 to vector<8x128xf32>
    %23 = arith.subf %22, %21 : vector<8x128xf32>
    %24 = math.exp %23 : vector<8x128xf32>
    %cst_19 = arith.constant 1.000000e+00 : f32
    %25 = vector.broadcast %cst_19 : f32 to vector<8x128xf32>
    %26 = arith.addf %25, %24 : vector<8x128xf32>
    %27 = tpu.reciprocal %26 {approx = true} : vector<8x128xf32> -> vector<8x128xf32>
    %28 = vector.extract_strided_slice %20 {offsets = [0, 128], sizes = [8, 128], strides = [1, 1]} : vector<8x512xf32> to vector<8x128xf32>
    %cst_20 = arith.constant 0.000000e+00 : f32
    %29 = vector.broadcast %cst_20 : f32 to vector<8x128xf32>
    %30 = arith.subf %29, %28 : vector<8x128xf32>
    %31 = math.exp %30 : vector<8x128xf32>
    %cst_21 = arith.constant 1.000000e+00 : f32
    %32 = vector.broadcast %cst_21 : f32 to vector<8x128xf32>
    %33 = arith.addf %32, %31 : vector<8x128xf32>
    %34 = tpu.reciprocal %33 {approx = true} : vector<8x128xf32> -> vector<8x128xf32>
    %35 = vector.extract_strided_slice %20 {offsets = [0, 256], sizes = [8, 128], strides = [1, 1]} : vector<8x512xf32> to vector<8x128xf32>
    %36 = math.tanh %35 : vector<8x128xf32>
    %37 = vector.extract_strided_slice %20 {offsets = [0, 384], sizes = [8, 128], strides = [1, 1]} : vector<8x512xf32> to vector<8x128xf32>
    %cst_22 = arith.constant 0.000000e+00 : f32
    %38 = vector.broadcast %cst_22 : f32 to vector<8x128xf32>
    %39 = arith.subf %38, %37 : vector<8x128xf32>
    %40 = math.exp %39 : vector<8x128xf32>
    %cst_23 = arith.constant 1.000000e+00 : f32
    %41 = vector.broadcast %cst_23 : f32 to vector<8x128xf32>
    %42 = arith.addf %41, %40 : vector<8x128xf32>
    %43 = tpu.reciprocal %42 {approx = true} : vector<8x128xf32> -> vector<8x128xf32>
    %44 = arith.mulf %34, %13 : vector<8x128xf32>
    %45 = arith.mulf %27, %36 : vector<8x128xf32>
    %46 = arith.addf %44, %45 : vector<8x128xf32>
    %47 = math.tanh %46 : vector<8x128xf32>
    %48 = arith.mulf %43, %47 : vector<8x128xf32>
    %49 = arith.truncf %48 : vector<8x128xf32> to vector<8x128xbf16>
    %50 = arith.index_cast %c0_i32_15 : i32 to index
    %c0_24 = arith.constant 0 : index
    %c0_25 = arith.constant 0 : index
    %51 = vector.load %arg8[%50, %c0_24, %c0_25] : memref<8x8x128xbf16, #tpu.memory_space<vmem>>, vector<1x8x128xbf16>
    %52 = vector.shape_cast %51 : vector<1x8x128xbf16> to vector<8x128xbf16>
    %53 = vector.shape_cast %49 : vector<8x128xbf16> to vector<1x8x128xbf16>
    tpu.vector_store %arg8[%50, %c0_24, %c0_25], %53 {strides = array<i32>} : memref<8x8x128xbf16, #tpu.memory_space<vmem>>, vector<1x8x128xbf16>,
    %c1_i32 = arith.constant 1 : i32
    %c8_i32_26 = arith.constant 8 : i32
    %54 = arith.muli %c1_i32, %c8_i32_26 : i32
    %55 = tpu.assume_multiple %54, 8 : i32
    %56 = arith.index_cast %55 : i32 to index
    %c0_27 = arith.constant 0 : index
    %57 = vector.load %arg11[%56, %c0_27] : memref<64x512xf32, #tpu.memory_space<vmem>>, vector<8x512xf32>
    %58 = arith.truncf %48 : vector<8x128xf32> to vector<8x128xbf16>
    %cst_28 = arith.constant dense<0.000000e+00> : vector<8x512xf32>
    %59 = tpu.matmul %58, %11, %cst_28 {dimension_numbers = #tpu.dot_dimension_numbers<[1], [0], [0], [1], [0, 0, 1, 1], [], []>} : vector<8x128xbf16>, vector<128x512xbf16>, vector<8x512xf32> -> vector<8x512xf32>
    %60 = arith.addf %57, %59 : vector<8x512xf32>
    %61 = vector.extract_strided_slice %60 {offsets = [0, 0], sizes = [8, 128], strides = [1, 1]} : vector<8x512xf32> to vector<8x128xf32>
    %cst_29 = arith.constant 0.000000e+00 : f32
    %62 = vector.broadcast %cst_29 : f32 to vector<8x128xf32>
    %63 = arith.subf %62, %61 : vector<8x128xf32>
    %64 = math.exp %63 : vector<8x128xf32>
    %cst_30 = arith.constant 1.000000e+00 : f32
    %65 = vector.broadcast %cst_30 : f32 to vector<8x128xf32>
    %66 = arith.addf %65, %64 : vector<8x128xf32>
    %67 = tpu.reciprocal %66 {approx = true} : vector<8x128xf32> -> vector<8x128xf32>
    %68 = vector.extract_strided_slice %60 {offsets = [0, 128], sizes = [8, 128], strides = [1, 1]} : vector<8x512xf32> to vector<8x128xf32>
    %cst_31 = arith.constant 0.000000e+00 : f32
    %69 = vector.broadcast %cst_31 : f32 to vector<8x128xf32>
    %70 = arith.subf %69, %68 : vector<8x128xf32>
    %71 = math.exp %70 : vector<8x128xf32>
    %cst_32 = arith.constant 1.000000e+00 : f32
    %72 = vector.broadcast %cst_32 : f32 to vector<8x128xf32>
    %73 = arith.addf %72, %71 : vector<8x128xf32>
    %74 = tpu.reciprocal %73 {approx = true} : vector<8x128xf32> -> vector<8x128xf32>
    %75 = vector.extract_strided_slice %60 {offsets = [0, 256], sizes = [8, 128], strides = [1, 1]} : vector<8x512xf32> to vector<8x128xf32>
    %76 = math.tanh %75 : vector<8x128xf32>
    %77 = vector.extract_strided_slice %60 {offsets = [0, 384], sizes = [8, 128], strides = [1, 1]} : vector<8x512xf32> to vector<8x128xf32>
    %cst_33 = arith.constant 0.000000e+00 : f32
    %78 = vector.broadcast %cst_33 : f32 to vector<8x128xf32>
    %79 = arith.subf %78, %77 : vector<8x128xf32>
    %80 = math.exp %79 : vector<8x128xf32>
    %cst_34 = arith.constant 1.000000e+00 : f32
    %81 = vector.broadcast %cst_34 : f32 to vector<8x128xf32>
    %82 = arith.addf %81, %80 : vector<8x128xf32>
    %83 = tpu.reciprocal %82 {approx = true} : vector<8x128xf32> -> vector<8x128xf32>
    %84 = arith.mulf %74, %46 : vector<8x128xf32>
    %85 = arith.mulf %67, %76 : vector<8x128xf32>
    %86 = arith.addf %84, %85 : vector<8x128xf32>
    %87 = math.tanh %86 : vector<8x128xf32>
    %88 = arith.mulf %83, %87 : vector<8x128xf32>
    %89 = arith.truncf %88 : vector<8x128xf32> to vector<8x128xbf16>
    %90 = arith.index_cast %c1_i32 : i32 to index
    %c0_35 = arith.constant 0 : index
    %c0_36 = arith.constant 0 : index
    %91 = vector.load %arg8[%90, %c0_35, %c0_36] : memref<8x8x128xbf16, #tpu.memory_space<vmem>>, vector<1x8x128xbf16>
    %92 = vector.shape_cast %91 : vector<1x8x128xbf16> to vector<8x128xbf16>
    %93 = vector.shape_cast %89 : vector<8x128xbf16> to vector<1x8x128xbf16>
    tpu.vector_store %arg8[%90, %c0_35, %c0_36], %93 {strides = array<i32>} : memref<8x8x128xbf16, #tpu.memory_space<vmem>>, vector<1x8x128xbf16>,
    %c2_i32 = arith.constant 2 : i32
    %c8_i32_37 = arith.constant 8 : i32
    %94 = arith.muli %c2_i32, %c8_i32_37 : i32
    %95 = tpu.assume_multiple %94, 8 : i32
    %96 = arith.index_cast %95 : i32 to index
    %c0_38 = arith.constant 0 : index
    %97 = vector.load %arg11[%96, %c0_38] : memref<64x512xf32, #tpu.memory_space<vmem>>, vector<8x512xf32>
    %98 = arith.truncf %88 : vector<8x128xf32> to vector<8x128xbf16>
    %cst_39 = arith.constant dense<0.000000e+00> : vector<8x512xf32>
    %99 = tpu.matmul %98, %11, %cst_39 {dimension_numbers = #tpu.dot_dimension_numbers<[1], [0], [0], [1], [0, 0, 1, 1], [], []>} : vector<8x128xbf16>, vector<128x512xbf16>, vector<8x512xf32> -> vector<8x512xf32>
    %100 = arith.addf %97, %99 : vector<8x512xf32>
    %101 = vector.extract_strided_slice %100 {offsets = [0, 0], sizes = [8, 128], strides = [1, 1]} : vector<8x512xf32> to vector<8x128xf32>
    %cst_40 = arith.constant 0.000000e+00 : f32
    %102 = vector.broadcast %cst_40 : f32 to vector<8x128xf32>
    %103 = arith.subf %102, %101 : vector<8x128xf32>
    %104 = math.exp %103 : vector<8x128xf32>
    %cst_41 = arith.constant 1.000000e+00 : f32
    %105 = vector.broadcast %cst_41 : f32 to vector<8x128xf32>
    %106 = arith.addf %105, %104 : vector<8x128xf32>
    %107 = tpu.reciprocal %106 {approx = true} : vector<8x128xf32> -> vector<8x128xf32>
    %108 = vector.extract_strided_slice %100 {offsets = [0, 128], sizes = [8, 128], strides = [1, 1]} : vector<8x512xf32> to vector<8x128xf32>
    %cst_42 = arith.constant 0.000000e+00 : f32
    %109 = vector.broadcast %cst_42 : f32 to vector<8x128xf32>
    %110 = arith.subf %109, %108 : vector<8x128xf32>
    %111 = math.exp %110 : vector<8x128xf32>
    %cst_43 = arith.constant 1.000000e+00 : f32
    %112 = vector.broadcast %cst_43 : f32 to vector<8x128xf32>
    %113 = arith.addf %112, %111 : vector<8x128xf32>
    %114 = tpu.reciprocal %113 {approx = true} : vector<8x128xf32> -> vector<8x128xf32>
    %115 = vector.extract_strided_slice %100 {offsets = [0, 256], sizes = [8, 128], strides = [1, 1]} : vector<8x512xf32> to vector<8x128xf32>
    %116 = math.tanh %115 : vector<8x128xf32>
    %117 = vector.extract_strided_slice %100 {offsets = [0, 384], sizes = [8, 128], strides = [1, 1]} : vector<8x512xf32> to vector<8x128xf32>
    %cst_44 = arith.constant 0.000000e+00 : f32
    %118 = vector.broadcast %cst_44 : f32 to vector<8x128xf32>
    %119 = arith.subf %118, %117 : vector<8x128xf32>
    %120 = math.exp %119 : vector<8x128xf32>
    %cst_45 = arith.constant 1.000000e+00 : f32
    %121 = vector.broadcast %cst_45 : f32 to vector<8x128xf32>
    %122 = arith.addf %121, %120 : vector<8x128xf32>
    %123 = tpu.reciprocal %122 {approx = true} : vector<8x128xf32> -> vector<8x128xf32>
    %124 = arith.mulf %114, %86 : vector<8x128xf32>
    %125 = arith.mulf %107, %116 : vector<8x128xf32>
    %126 = arith.addf %124, %125 : vector<8x128xf32>
    %127 = math.tanh %126 : vector<8x128xf32>
    %128 = arith.mulf %123, %127 : vector<8x128xf32>
    %129 = arith.truncf %128 : vector<8x128xf32> to vector<8x128xbf16>
    %130 = arith.index_cast %c2_i32 : i32 to index
    %c0_46 = arith.constant 0 : index
    %c0_47 = arith.constant 0 : index
    %131 = vector.load %arg8[%130, %c0_46, %c0_47] : memref<8x8x128xbf16, #tpu.memory_space<vmem>>, vector<1x8x128xbf16>
    %132 = vector.shape_cast %131 : vector<1x8x128xbf16> to vector<8x128xbf16>
    %133 = vector.shape_cast %129 : vector<8x128xbf16> to vector<1x8x128xbf16>
    tpu.vector_store %arg8[%130, %c0_46, %c0_47], %133 {strides = array<i32>} : memref<8x8x128xbf16, #tpu.memory_space<vmem>>, vector<1x8x128xbf16>,
    %c3_i32 = arith.constant 3 : i32
    %c8_i32_48 = arith.constant 8 : i32
    %134 = arith.muli %c3_i32, %c8_i32_48 : i32
    %135 = tpu.assume_multiple %134, 8 : i32
    %136 = arith.index_cast %135 : i32 to index
    %c0_49 = arith.constant 0 : index
    %137 = vector.load %arg11[%136, %c0_49] : memref<64x512xf32, #tpu.memory_space<vmem>>, vector<8x512xf32>
    %138 = arith.truncf %128 : vector<8x128xf32> to vector<8x128xbf16>
    %cst_50 = arith.constant dense<0.000000e+00> : vector<8x512xf32>
    %139 = tpu.matmul %138, %11, %cst_50 {dimension_numbers = #tpu.dot_dimension_numbers<[1], [0], [0], [1], [0, 0, 1, 1], [], []>} : vector<8x128xbf16>, vector<128x512xbf16>, vector<8x512xf32> -> vector<8x512xf32>
    %140 = arith.addf %137, %139 : vector<8x512xf32>
    %141 = vector.extract_strided_slice %140 {offsets = [0, 0], sizes = [8, 128], strides = [1, 1]} : vector<8x512xf32> to vector<8x128xf32>
    %cst_51 = arith.constant 0.000000e+00 : f32
    %142 = vector.broadcast %cst_51 : f32 to vector<8x128xf32>
    %143 = arith.subf %142, %141 : vector<8x128xf32>
    %144 = math.exp %143 : vector<8x128xf32>
    %cst_52 = arith.constant 1.000000e+00 : f32
    %145 = vector.broadcast %cst_52 : f32 to vector<8x128xf32>
    %146 = arith.addf %145, %144 : vector<8x128xf32>
    %147 = tpu.reciprocal %146 {approx = true} : vector<8x128xf32> -> vector<8x128xf32>
    %148 = vector.extract_strided_slice %140 {offsets = [0, 128], sizes = [8, 128], strides = [1, 1]} : vector<8x512xf32> to vector<8x128xf32>
    %cst_53 = arith.constant 0.000000e+00 : f32
    %149 = vector.broadcast %cst_53 : f32 to vector<8x128xf32>
    %150 = arith.subf %149, %148 : vector<8x128xf32>
    %151 = math.exp %150 : vector<8x128xf32>
    %cst_54 = arith.constant 1.000000e+00 : f32
    %152 = vector.broadcast %cst_54 : f32 to vector<8x128xf32>
    %153 = arith.addf %152, %151 : vector<8x128xf32>
    %154 = tpu.reciprocal %153 {approx = true} : vector<8x128xf32> -> vector<8x128xf32>
    %155 = vector.extract_strided_slice %140 {offsets = [0, 256], sizes = [8, 128], strides = [1, 1]} : vector<8x512xf32> to vector<8x128xf32>
    %156 = math.tanh %155 : vector<8x128xf32>
    %157 = vector.extract_strided_slice %140 {offsets = [0, 384], sizes = [8, 128], strides = [1, 1]} : vector<8x512xf32> to vector<8x128xf32>
    %cst_55 = arith.constant 0.000000e+00 : f32
    %158 = vector.broadcast %cst_55 : f32 to vector<8x128xf32>
    %159 = arith.subf %158, %157 : vector<8x128xf32>
    %160 = math.exp %159 : vector<8x128xf32>
    %cst_56 = arith.constant 1.000000e+00 : f32
    %161 = vector.broadcast %cst_56 : f32 to vector<8x128xf32>
    %162 = arith.addf %161, %160 : vector<8x128xf32>
    %163 = tpu.reciprocal %162 {approx = true} : vector<8x128xf32> -> vector<8x128xf32>
    %164 = arith.mulf %154, %126 : vector<8x128xf32>
    %165 = arith.mulf %147, %156 : vector<8x128xf32>
    %166 = arith.addf %164, %165 : vector<8x128xf32>
    %167 = math.tanh %166 : vector<8x128xf32>
    %168 = arith.mulf %163, %167 : vector<8x128xf32>
    %169 = arith.truncf %168 : vector<8x128xf32> to vector<8x128xbf16>
    %170 = arith.index_cast %c3_i32 : i32 to index
    %c0_57 = arith.constant 0 : index
    %c0_58 = arith.constant 0 : index
    %171 = vector.load %arg8[%170, %c0_57, %c0_58] : memref<8x8x128xbf16, #tpu.memory_space<vmem>>, vector<1x8x128xbf16>
    %172 = vector.shape_cast %171 : vector<1x8x128xbf16> to vector<8x128xbf16>
    %173 = vector.shape_cast %169 : vector<8x128xbf16> to vector<1x8x128xbf16>
    tpu.vector_store %arg8[%170, %c0_57, %c0_58], %173 {strides = array<i32>} : memref<8x8x128xbf16, #tpu.memory_space<vmem>>, vector<1x8x128xbf16>,
    %c4_i32 = arith.constant 4 : i32
    %c8_i32_59 = arith.constant 8 : i32
    %174 = arith.muli %c4_i32, %c8_i32_59 : i32
    %175 = tpu.assume_multiple %174, 8 : i32
    %176 = arith.index_cast %175 : i32 to index
    %c0_60 = arith.constant 0 : index
    %177 = vector.load %arg11[%176, %c0_60] : memref<64x512xf32, #tpu.memory_space<vmem>>, vector<8x512xf32>
    %178 = arith.truncf %168 : vector<8x128xf32> to vector<8x128xbf16>
    %cst_61 = arith.constant dense<0.000000e+00> : vector<8x512xf32>
    %179 = tpu.matmul %178, %11, %cst_61 {dimension_numbers = #tpu.dot_dimension_numbers<[1], [0], [0], [1], [0, 0, 1, 1], [], []>} : vector<8x128xbf16>, vector<128x512xbf16>, vector<8x512xf32> -> vector<8x512xf32>
    %180 = arith.addf %177, %179 : vector<8x512xf32>
    %181 = vector.extract_strided_slice %180 {offsets = [0, 0], sizes = [8, 128], strides = [1, 1]} : vector<8x512xf32> to vector<8x128xf32>
    %cst_62 = arith.constant 0.000000e+00 : f32
    %182 = vector.broadcast %cst_62 : f32 to vector<8x128xf32>
    %183 = arith.subf %182, %181 : vector<8x128xf32>
    %184 = math.exp %183 : vector<8x128xf32>
    %cst_63 = arith.constant 1.000000e+00 : f32
    %185 = vector.broadcast %cst_63 : f32 to vector<8x128xf32>
    %186 = arith.addf %185, %184 : vector<8x128xf32>
    %187 = tpu.reciprocal %186 {approx = true} : vector<8x128xf32> -> vector<8x128xf32>
    %188 = vector.extract_strided_slice %180 {offsets = [0, 128], sizes = [8, 128], strides = [1, 1]} : vector<8x512xf32> to vector<8x128xf32>
    %cst_64 = arith.constant 0.000000e+00 : f32
    %189 = vector.broadcast %cst_64 : f32 to vector<8x128xf32>
    %190 = arith.subf %189, %188 : vector<8x128xf32>
    %191 = math.exp %190 : vector<8x128xf32>
    %cst_65 = arith.constant 1.000000e+00 : f32
    %192 = vector.broadcast %cst_65 : f32 to vector<8x128xf32>
    %193 = arith.addf %192, %191 : vector<8x128xf32>
    %194 = tpu.reciprocal %193 {approx = true} : vector<8x128xf32> -> vector<8x128xf32>
    %195 = vector.extract_strided_slice %180 {offsets = [0, 256], sizes = [8, 128], strides = [1, 1]} : vector<8x512xf32> to vector<8x128xf32>
    %196 = math.tanh %195 : vector<8x128xf32>
    %197 = vector.extract_strided_slice %180 {offsets = [0, 384], sizes = [8, 128], strides = [1, 1]} : vector<8x512xf32> to vector<8x128xf32>
    %cst_66 = arith.constant 0.000000e+00 : f32
    %198 = vector.broadcast %cst_66 : f32 to vector<8x128xf32>
    %199 = arith.subf %198, %197 : vector<8x128xf32>
    %200 = math.exp %199 : vector<8x128xf32>
    %cst_67 = arith.constant 1.000000e+00 : f32
    %201 = vector.broadcast %cst_67 : f32 to vector<8x128xf32>
    %202 = arith.addf %201, %200 : vector<8x128xf32>
    %203 = tpu.reciprocal %202 {approx = true} : vector<8x128xf32> -> vector<8x128xf32>
    %204 = arith.mulf %194, %166 : vector<8x128xf32>
    %205 = arith.mulf %187, %196 : vector<8x128xf32>
    %206 = arith.addf %204, %205 : vector<8x128xf32>
    %207 = math.tanh %206 : vector<8x128xf32>
    %208 = arith.mulf %203, %207 : vector<8x128xf32>
    %209 = arith.truncf %208 : vector<8x128xf32> to vector<8x128xbf16>
    %210 = arith.index_cast %c4_i32 : i32 to index
    %c0_68 = arith.constant 0 : index
    %c0_69 = arith.constant 0 : index
    %211 = vector.load %arg8[%210, %c0_68, %c0_69] : memref<8x8x128xbf16, #tpu.memory_space<vmem>>, vector<1x8x128xbf16>
    %212 = vector.shape_cast %211 : vector<1x8x128xbf16> to vector<8x128xbf16>
    %213 = vector.shape_cast %209 : vector<8x128xbf16> to vector<1x8x128xbf16>
    tpu.vector_store %arg8[%210, %c0_68, %c0_69], %213 {strides = array<i32>} : memref<8x8x128xbf16, #tpu.memory_space<vmem>>, vector<1x8x128xbf16>,
    %c5_i32 = arith.constant 5 : i32
    %c8_i32_70 = arith.constant 8 : i32
    %214 = arith.muli %c5_i32, %c8_i32_70 : i32
    %215 = tpu.assume_multiple %214, 8 : i32
    %216 = arith.index_cast %215 : i32 to index
    %c0_71 = arith.constant 0 : index
    %217 = vector.load %arg11[%216, %c0_71] : memref<64x512xf32, #tpu.memory_space<vmem>>, vector<8x512xf32>
    %218 = arith.truncf %208 : vector<8x128xf32> to vector<8x128xbf16>
    %cst_72 = arith.constant dense<0.000000e+00> : vector<8x512xf32>
    %219 = tpu.matmul %218, %11, %cst_72 {dimension_numbers = #tpu.dot_dimension_numbers<[1], [0], [0], [1], [0, 0, 1, 1], [], []>} : vector<8x128xbf16>, vector<128x512xbf16>, vector<8x512xf32> -> vector<8x512xf32>
    %220 = arith.addf %217, %219 : vector<8x512xf32>
    %221 = vector.extract_strided_slice %220 {offsets = [0, 0], sizes = [8, 128], strides = [1, 1]} : vector<8x512xf32> to vector<8x128xf32>
    %cst_73 = arith.constant 0.000000e+00 : f32
    %222 = vector.broadcast %cst_73 : f32 to vector<8x128xf32>
    %223 = arith.subf %222, %221 : vector<8x128xf32>
    %224 = math.exp %223 : vector<8x128xf32>
    %cst_74 = arith.constant 1.000000e+00 : f32
    %225 = vector.broadcast %cst_74 : f32 to vector<8x128xf32>
    %226 = arith.addf %225, %224 : vector<8x128xf32>
    %227 = tpu.reciprocal %226 {approx = true} : vector<8x128xf32> -> vector<8x128xf32>
    %228 = vector.extract_strided_slice %220 {offsets = [0, 128], sizes = [8, 128], strides = [1, 1]} : vector<8x512xf32> to vector<8x128xf32>
    %cst_75 = arith.constant 0.000000e+00 : f32
    %229 = vector.broadcast %cst_75 : f32 to vector<8x128xf32>
    %230 = arith.subf %229, %228 : vector<8x128xf32>
    %231 = math.exp %230 : vector<8x128xf32>
    %cst_76 = arith.constant 1.000000e+00 : f32
    %232 = vector.broadcast %cst_76 : f32 to vector<8x128xf32>
    %233 = arith.addf %232, %231 : vector<8x128xf32>
    %234 = tpu.reciprocal %233 {approx = true} : vector<8x128xf32> -> vector<8x128xf32>
    %235 = vector.extract_strided_slice %220 {offsets = [0, 256], sizes = [8, 128], strides = [1, 1]} : vector<8x512xf32> to vector<8x128xf32>
    %236 = math.tanh %235 : vector<8x128xf32>
    %237 = vector.extract_strided_slice %220 {offsets = [0, 384], sizes = [8, 128], strides = [1, 1]} : vector<8x512xf32> to vector<8x128xf32>
    %cst_77 = arith.constant 0.000000e+00 : f32
    %238 = vector.broadcast %cst_77 : f32 to vector<8x128xf32>
    %239 = arith.subf %238, %237 : vector<8x128xf32>
    %240 = math.exp %239 : vector<8x128xf32>
    %cst_78 = arith.constant 1.000000e+00 : f32
    %241 = vector.broadcast %cst_78 : f32 to vector<8x128xf32>
    %242 = arith.addf %241, %240 : vector<8x128xf32>
    %243 = tpu.reciprocal %242 {approx = true} : vector<8x128xf32> -> vector<8x128xf32>
    %244 = arith.mulf %234, %206 : vector<8x128xf32>
    %245 = arith.mulf %227, %236 : vector<8x128xf32>
    %246 = arith.addf %244, %245 : vector<8x128xf32>
    %247 = math.tanh %246 : vector<8x128xf32>
    %248 = arith.mulf %243, %247 : vector<8x128xf32>
    %249 = arith.truncf %248 : vector<8x128xf32> to vector<8x128xbf16>
    %250 = arith.index_cast %c5_i32 : i32 to index
    %c0_79 = arith.constant 0 : index
    %c0_80 = arith.constant 0 : index
    %251 = vector.load %arg8[%250, %c0_79, %c0_80] : memref<8x8x128xbf16, #tpu.memory_space<vmem>>, vector<1x8x128xbf16>
    %252 = vector.shape_cast %251 : vector<1x8x128xbf16> to vector<8x128xbf16>
    %253 = vector.shape_cast %249 : vector<8x128xbf16> to vector<1x8x128xbf16>
    tpu.vector_store %arg8[%250, %c0_79, %c0_80], %253 {strides = array<i32>} : memref<8x8x128xbf16, #tpu.memory_space<vmem>>, vector<1x8x128xbf16>,
    %c6_i32 = arith.constant 6 : i32
    %c8_i32_81 = arith.constant 8 : i32
    %254 = arith.muli %c6_i32, %c8_i32_81 : i32
    %255 = tpu.assume_multiple %254, 8 : i32
    %256 = arith.index_cast %255 : i32 to index
    %c0_82 = arith.constant 0 : index
    %257 = vector.load %arg11[%256, %c0_82] : memref<64x512xf32, #tpu.memory_space<vmem>>, vector<8x512xf32>
    %258 = arith.truncf %248 : vector<8x128xf32> to vector<8x128xbf16>
    %cst_83 = arith.constant dense<0.000000e+00> : vector<8x512xf32>
    %259 = tpu.matmul %258, %11, %cst_83 {dimension_numbers = #tpu.dot_dimension_numbers<[1], [0], [0], [1], [0, 0, 1, 1], [], []>} : vector<8x128xbf16>, vector<128x512xbf16>, vector<8x512xf32> -> vector<8x512xf32>
    %260 = arith.addf %257, %259 : vector<8x512xf32>
    %261 = vector.extract_strided_slice %260 {offsets = [0, 0], sizes = [8, 128], strides = [1, 1]} : vector<8x512xf32> to vector<8x128xf32>
    %cst_84 = arith.constant 0.000000e+00 : f32
    %262 = vector.broadcast %cst_84 : f32 to vector<8x128xf32>
    %263 = arith.subf %262, %261 : vector<8x128xf32>
    %264 = math.exp %263 : vector<8x128xf32>
    %cst_85 = arith.constant 1.000000e+00 : f32
    %265 = vector.broadcast %cst_85 : f32 to vector<8x128xf32>
    %266 = arith.addf %265, %264 : vector<8x128xf32>
    %267 = tpu.reciprocal %266 {approx = true} : vector<8x128xf32> -> vector<8x128xf32>
    %268 = vector.extract_strided_slice %260 {offsets = [0, 128], sizes = [8, 128], strides = [1, 1]} : vector<8x512xf32> to vector<8x128xf32>
    %cst_86 = arith.constant 0.000000e+00 : f32
    %269 = vector.broadcast %cst_86 : f32 to vector<8x128xf32>
    %270 = arith.subf %269, %268 : vector<8x128xf32>
    %271 = math.exp %270 : vector<8x128xf32>
    %cst_87 = arith.constant 1.000000e+00 : f32
    %272 = vector.broadcast %cst_87 : f32 to vector<8x128xf32>
    %273 = arith.addf %272, %271 : vector<8x128xf32>
    %274 = tpu.reciprocal %273 {approx = true} : vector<8x128xf32> -> vector<8x128xf32>
    %275 = vector.extract_strided_slice %260 {offsets = [0, 256], sizes = [8, 128], strides = [1, 1]} : vector<8x512xf32> to vector<8x128xf32>
    %276 = math.tanh %275 : vector<8x128xf32>
    %277 = vector.extract_strided_slice %260 {offsets = [0, 384], sizes = [8, 128], strides = [1, 1]} : vector<8x512xf32> to vector<8x128xf32>
    %cst_88 = arith.constant 0.000000e+00 : f32
    %278 = vector.broadcast %cst_88 : f32 to vector<8x128xf32>
    %279 = arith.subf %278, %277 : vector<8x128xf32>
    %280 = math.exp %279 : vector<8x128xf32>
    %cst_89 = arith.constant 1.000000e+00 : f32
    %281 = vector.broadcast %cst_89 : f32 to vector<8x128xf32>
    %282 = arith.addf %281, %280 : vector<8x128xf32>
    %283 = tpu.reciprocal %282 {approx = true} : vector<8x128xf32> -> vector<8x128xf32>
    %284 = arith.mulf %274, %246 : vector<8x128xf32>
    %285 = arith.mulf %267, %276 : vector<8x128xf32>
    %286 = arith.addf %284, %285 : vector<8x128xf32>
    %287 = math.tanh %286 : vector<8x128xf32>
    %288 = arith.mulf %283, %287 : vector<8x128xf32>
    %289 = arith.truncf %288 : vector<8x128xf32> to vector<8x128xbf16>
    %290 = arith.index_cast %c6_i32 : i32 to index
    %c0_90 = arith.constant 0 : index
    %c0_91 = arith.constant 0 : index
    %291 = vector.load %arg8[%290, %c0_90, %c0_91] : memref<8x8x128xbf16, #tpu.memory_space<vmem>>, vector<1x8x128xbf16>
    %292 = vector.shape_cast %291 : vector<1x8x128xbf16> to vector<8x128xbf16>
    %293 = vector.shape_cast %289 : vector<8x128xbf16> to vector<1x8x128xbf16>
    tpu.vector_store %arg8[%290, %c0_90, %c0_91], %293 {strides = array<i32>} : memref<8x8x128xbf16, #tpu.memory_space<vmem>>, vector<1x8x128xbf16>,
    %c7_i32 = arith.constant 7 : i32
    %c8_i32_92 = arith.constant 8 : i32
    %294 = arith.muli %c7_i32, %c8_i32_92 : i32
    %295 = tpu.assume_multiple %294, 8 : i32
    %296 = arith.index_cast %295 : i32 to index
    %c0_93 = arith.constant 0 : index
    %297 = vector.load %arg11[%296, %c0_93] : memref<64x512xf32, #tpu.memory_space<vmem>>, vector<8x512xf32>
    %298 = arith.truncf %288 : vector<8x128xf32> to vector<8x128xbf16>
    %cst_94 = arith.constant dense<0.000000e+00> : vector<8x512xf32>
    %299 = tpu.matmul %298, %11, %cst_94 {dimension_numbers = #tpu.dot_dimension_numbers<[1], [0], [0], [1], [0, 0, 1, 1], [], []>} : vector<8x128xbf16>, vector<128x512xbf16>, vector<8x512xf32> -> vector<8x512xf32>
    %300 = arith.addf %297, %299 : vector<8x512xf32>
    %301 = vector.extract_strided_slice %300 {offsets = [0, 0], sizes = [8, 128], strides = [1, 1]} : vector<8x512xf32> to vector<8x128xf32>
    %cst_95 = arith.constant 0.000000e+00 : f32
    %302 = vector.broadcast %cst_95 : f32 to vector<8x128xf32>
    %303 = arith.subf %302, %301 : vector<8x128xf32>
    %304 = math.exp %303 : vector<8x128xf32>
    %cst_96 = arith.constant 1.000000e+00 : f32
    %305 = vector.broadcast %cst_96 : f32 to vector<8x128xf32>
    %306 = arith.addf %305, %304 : vector<8x128xf32>
    %307 = tpu.reciprocal %306 {approx = true} : vector<8x128xf32> -> vector<8x128xf32>
    %308 = vector.extract_strided_slice %300 {offsets = [0, 128], sizes = [8, 128], strides = [1, 1]} : vector<8x512xf32> to vector<8x128xf32>
    %cst_97 = arith.constant 0.000000e+00 : f32
    %309 = vector.broadcast %cst_97 : f32 to vector<8x128xf32>
    %310 = arith.subf %309, %308 : vector<8x128xf32>
    %311 = math.exp %310 : vector<8x128xf32>
    %cst_98 = arith.constant 1.000000e+00 : f32
    %312 = vector.broadcast %cst_98 : f32 to vector<8x128xf32>
    %313 = arith.addf %312, %311 : vector<8x128xf32>
    %314 = tpu.reciprocal %313 {approx = true} : vector<8x128xf32> -> vector<8x128xf32>
    %315 = vector.extract_strided_slice %300 {offsets = [0, 256], sizes = [8, 128], strides = [1, 1]} : vector<8x512xf32> to vector<8x128xf32>
    %316 = math.tanh %315 : vector<8x128xf32>
    %317 = vector.extract_strided_slice %300 {offsets = [0, 384], sizes = [8, 128], strides = [1, 1]} : vector<8x512xf32> to vector<8x128xf32>
    %cst_99 = arith.constant 0.000000e+00 : f32
    %318 = vector.broadcast %cst_99 : f32 to vector<8x128xf32>
    %319 = arith.subf %318, %317 : vector<8x128xf32>
    %320 = math.exp %319 : vector<8x128xf32>
    %cst_100 = arith.constant 1.000000e+00 : f32
    %321 = vector.broadcast %cst_100 : f32 to vector<8x128xf32>
    %322 = arith.addf %321, %320 : vector<8x128xf32>
    %323 = tpu.reciprocal %322 {approx = true} : vector<8x128xf32> -> vector<8x128xf32>
    %324 = arith.mulf %314, %286 : vector<8x128xf32>
    %325 = arith.mulf %307, %316 : vector<8x128xf32>
    %326 = arith.addf %324, %325 : vector<8x128xf32>
    %327 = math.tanh %326 : vector<8x128xf32>
    %328 = arith.mulf %323, %327 : vector<8x128xf32>
    %329 = arith.truncf %328 : vector<8x128xf32> to vector<8x128xbf16>
    %330 = arith.index_cast %c7_i32 : i32 to index
    %c0_101 = arith.constant 0 : index
    %c0_102 = arith.constant 0 : index
    %331 = vector.load %arg8[%330, %c0_101, %c0_102] : memref<8x8x128xbf16, #tpu.memory_space<vmem>>, vector<1x8x128xbf16>
    %332 = vector.shape_cast %331 : vector<1x8x128xbf16> to vector<8x128xbf16>
    %333 = vector.shape_cast %329 : vector<8x128xbf16> to vector<1x8x128xbf16>
    tpu.vector_store %arg8[%330, %c0_101, %c0_102], %333 {strides = array<i32>} : memref<8x8x128xbf16, #tpu.memory_space<vmem>>, vector<1x8x128xbf16>,
    %c8_i32_103 = arith.constant 8 : i32
    %c0_104 = arith.constant 0 : index
    %c0_105 = arith.constant 0 : index
    %334 = vector.load %arg12[%c0_104, %c0_105] : memref<8x128xf32, #tpu.memory_space<vmem>>, vector<8x128xf32>
    tpu.vector_store %arg12[%c0_104, %c0_105], %328 {strides = array<i32>} : memref<8x128xf32, #tpu.memory_space<vmem>>, vector<8x128xf32>,
    %c0_106 = arith.constant 0 : index
    %c0_107 = arith.constant 0 : index
    %335 = vector.load %arg13[%c0_106, %c0_107] : memref<8x128xf32, #tpu.memory_space<vmem>>, vector<8x128xf32>
    tpu.vector_store %arg13[%c0_106, %c0_107], %326 {strides = array<i32>} : memref<8x128xf32, #tpu.memory_space<vmem>>, vector<8x128xf32>,
    %c0_i32_108 = arith.constant 0 : i32
    %336 = arith.cmpi eq, %arg1, %c0_i32_108 : i32
    %337 = arith.extui %336 : i1 to i32
    %c0_i32_109 = arith.constant 0 : i32
    %338 = arith.cmpi ne, %337, %c0_i32_109 : i32
    scf.if %338 {
      %c0_110 = arith.constant 0 : index
      %c0_111 = arith.constant 0 : index
      %339 = vector.load %arg12[%c0_110, %c0_111] : memref<8x128xf32, #tpu.memory_space<vmem>>, vector<8x128xf32>
      %c0_112 = arith.constant 0 : index
      %c0_113 = arith.constant 0 : index
      %340 = vector.load %arg9[%c0_112, %c0_113] : memref<8x128xf32, #tpu.memory_space<vmem>>, vector<8x128xf32>
      tpu.vector_store %arg9[%c0_112, %c0_113], %339 {strides = array<i32>} : memref<8x128xf32, #tpu.memory_space<vmem>>, vector<8x128xf32>,
      %c0_114 = arith.constant 0 : index
      %c0_115 = arith.constant 0 : index
      %341 = vector.load %arg13[%c0_114, %c0_115] : memref<8x128xf32, #tpu.memory_space<vmem>>, vector<8x128xf32>
      %c0_116 = arith.constant 0 : index
      %c0_117 = arith.constant 0 : index
      %342 = vector.load %arg10[%c0_116, %c0_117] : memref<8x128xf32, #tpu.memory_space<vmem>>, vector<8x128xf32>
      tpu.vector_store %arg10[%c0_116, %c0_117], %341 {strides = array<i32>} : memref<8x128xf32, #tpu.memory_space<vmem>>, vector<8x128xf32>,
    } else {
    }
    return
  }
  func.func @transform_0(%arg0: i32, %arg1: i32) -> (i32, i32, i32) {
    %c0_i32 = arith.constant 0 : i32
    %c0_i32_0 = arith.constant 0 : i32
    return %arg1, %arg0, %c0_i32 : i32, i32, i32
  }
  func.func @transform_1(%arg0: i32, %arg1: i32) -> (i32, i32) {
    %c0_i32 = arith.constant 0 : i32
    %c0_i32_0 = arith.constant 0 : i32
    %c0_i32_1 = arith.constant 0 : i32
    return %c0_i32, %c0_i32_0 : i32, i32
  }
  func.func @transform_2(%arg0: i32, %arg1: i32) -> (i32, i32) {
    %c0_i32 = arith.constant 0 : i32
    %c0_i32_0 = arith.constant 0 : i32
    %c0_i32_1 = arith.constant 0 : i32
    return %c0_i32, %c0_i32_0 : i32, i32
  }
  func.func @transform_3(%arg0: i32, %arg1: i32) -> (i32, i32) {
    %c0_i32 = arith.constant 0 : i32
    %c0_i32_0 = arith.constant 0 : i32
    %c0_i32_1 = arith.constant 0 : i32
    return %c0_i32, %c0_i32_0 : i32, i32
  }
  func.func @transform_4(%arg0: i32, %arg1: i32) -> (i32, i32) {
    %c0_i32 = arith.constant 0 : i32
    %c0_i32_0 = arith.constant 0 : i32
    return %arg0, %c0_i32 : i32, i32
  }
  func.func @transform_5(%arg0: i32, %arg1: i32) -> (i32, i32) {
    %c0_i32 = arith.constant 0 : i32
    %c0_i32_0 = arith.constant 0 : i32
    return %arg0, %c0_i32 : i32, i32
  }
  func.func @transform_6(%arg0: i32, %arg1: i32) -> (i32, i32, i32) {
    %c0_i32 = arith.constant 0 : i32
    %c0_i32_0 = arith.constant 0 : i32
    return %arg1, %arg0, %c0_i32 : i32, i32, i32
  }
  func.func @transform_7(%arg0: i32, %arg1: i32) -> (i32, i32) {
    %c0_i32 = arith.constant 0 : i32
    %c0_i32_0 = arith.constant 0 : i32
    return %arg0, %c0_i32 : i32, i32
  }
  func.func @transform_8(%arg0: i32, %arg1: i32) -> (i32, i32) {
    %c0_i32 = arith.constant 0 : i32
    %c0_i32_0 = arith.constant 0 : i32
    return %arg0, %c0_i32 : i32, i32
  }
}

module attributes {stable_mosaic.version = 11 : i64} {
  func.func @_lstm_rec_kernel(%arg0: i32, %arg1: i32, %arg2: memref<8x8x8xbf16, #tpu.memory_space<vmem>>, %arg3: memref<8x512xbf16, #tpu.memory_space<vmem>>, %arg4: memref<1x512xf32, #tpu.memory_space<vmem>>, %arg5: memref<128x512xbf16, #tpu.memory_space<vmem>>, %arg6: memref<8x128xf32, #tpu.memory_space<vmem>>, %arg7: memref<8x128xf32, #tpu.memory_space<vmem>>, %arg8: memref<8x8x128xbf16, #tpu.memory_space<vmem>>, %arg9: memref<8x128xf32, #tpu.memory_space<vmem>>, %arg10: memref<8x128xf32, #tpu.memory_space<vmem>>, %arg11: memref<64x512xf32, #tpu.memory_space<vmem>>, %arg12: memref<8x128xf32, #tpu.memory_space<vmem>>, %arg13: memref<8x128xf32, #tpu.memory_space<vmem>>) attributes {dimension_semantics = [#tpu.dimension_semantics<parallel>, #tpu.dimension_semantics<arbitrary>], iteration_bounds = array<i64: 1, 1>, scalar_prefetch = 0 : i64, scratch_operands = 3 : i64, tpu.core_type = #tpu.core_type<tc>, window_params = [{transform_indices = @transform_0, window_bounds = array<i64: 8, 8, 8>}, {pipeline_mode = #tpu.pipeline_mode<synchronous>, transform_indices = @transform_1, window_bounds = array<i64: 8, 512>}, {pipeline_mode = #tpu.pipeline_mode<synchronous>, transform_indices = @transform_2, window_bounds = array<i64: 1, 512>}, {pipeline_mode = #tpu.pipeline_mode<synchronous>, transform_indices = @transform_3, window_bounds = array<i64: 128, 512>}, {transform_indices = @transform_4, window_bounds = array<i64: 8, 128>}, {transform_indices = @transform_5, window_bounds = array<i64: 8, 128>}, {transform_indices = @transform_6, window_bounds = array<i64: 8, 8, 128>}, {transform_indices = @transform_7, window_bounds = array<i64: 8, 128>}, {transform_indices = @transform_8, window_bounds = array<i64: 8, 128>}]} {
    %c0_i32 = arith.constant 0 : i32
    %0 = arith.cmpi eq, %arg1, %c0_i32 : i32
    %1 = arith.extui %0 : i1 to i32
    %c0_i32_0 = arith.constant 0 : i32
    %2 = arith.cmpi ne, %1, %c0_i32_0 : i32
    scf.if %2 {
      %c0_110 = arith.constant 0 : index
      %c0_111 = arith.constant 0 : index
      %339 = vector.load %arg6[%c0_110, %c0_111] : memref<8x128xf32, #tpu.memory_space<vmem>>, vector<8x128xf32>
      %c0_112 = arith.constant 0 : index
      %c0_113 = arith.constant 0 : index
      %340 = vector.load %arg12[%c0_112, %c0_113] : memref<8x128xf32, #tpu.memory_space<vmem>>, vector<8x128xf32>
      tpu.vector_store %arg12[%c0_112, %c0_113], %339 {strides = array<i32>} : memref<8x128xf32, #tpu.memory_space<vmem>>, vector<8x128xf32>,
      %c0_114 = arith.constant 0 : index
      %c0_115 = arith.constant 0 : index
      %341 = vector.load %arg7[%c0_114, %c0_115] : memref<8x128xf32, #tpu.memory_space<vmem>>, vector<8x128xf32>
      %c0_116 = arith.constant 0 : index
      %c0_117 = arith.constant 0 : index
      %342 = vector.load %arg13[%c0_116, %c0_117] : memref<8x128xf32, #tpu.memory_space<vmem>>, vector<8x128xf32>
      tpu.vector_store %arg13[%c0_116, %c0_117], %341 {strides = array<i32>} : memref<8x128xf32, #tpu.memory_space<vmem>>, vector<8x128xf32>,
    } else {
    }
    %c0 = arith.constant 0 : index
    %c0_1 = arith.constant 0 : index
    %c0_2 = arith.constant 0 : index
    %3 = vector.load %arg2[%c0, %c0_1, %c0_2] : memref<8x8x8xbf16, #tpu.memory_space<vmem>>, vector<8x8x8xbf16>
    %4 = vector.shape_cast %3 : vector<8x8x8xbf16> to vector<64x8xbf16>
    %c0_3 = arith.constant 0 : index
    %c0_4 = arith.constant 0 : index
    %5 = vector.load %arg3[%c0_3, %c0_4] : memref<8x512xbf16, #tpu.memory_space<vmem>>, vector<8x512xbf16>
    %cst = arith.constant dense<0.000000e+00> : vector<64x512xf32>
    %6 = tpu.matmul %4, %5, %cst {dimension_numbers = #tpu.dot_dimension_numbers<[1], [0], [0], [1], [0, 0, 1, 1], [], []>} : vector<64x8xbf16>, vector<8x512xbf16>, vector<64x512xf32> -> vector<64x512xf32>
    %c0_5 = arith.constant 0 : index
    %c0_6 = arith.constant 0 : index
    %7 = vector.load %arg4[%c0_5, %c0_6] : memref<1x512xf32, #tpu.memory_space<vmem>>, vector<1x512xf32>
    %8 = vector.broadcast %7 : vector<1x512xf32> to vector<64x512xf32>
    %9 = arith.addf %6, %8 : vector<64x512xf32>
    %c0_7 = arith.constant 0 : index
    %c0_8 = arith.constant 0 : index
    %10 = vector.load %arg11[%c0_7, %c0_8] : memref<64x512xf32, #tpu.memory_space<vmem>>, vector<64x512xf32>
    tpu.vector_store %arg11[%c0_7, %c0_8], %9 {strides = array<i32>} : memref<64x512xf32, #tpu.memory_space<vmem>>, vector<64x512xf32>,
    %c0_9 = arith.constant 0 : index
    %c0_10 = arith.constant 0 : index
    %11 = vector.load %arg5[%c0_9, %c0_10] : memref<128x512xbf16, #tpu.memory_space<vmem>>, vector<128x512xbf16>
    %c0_11 = arith.constant 0 : index
    %c0_12 = arith.constant 0 : index
    %12 = vector.load %arg12[%c0_11, %c0_12] : memref<8x128xf32, #tpu.memory_space<vmem>>, vector<8x128xf32>
    %c0_13 = arith.constant 0 : index
    %c0_14 = arith.constant 0 : index
    %13 = vector.load %arg13[%c0_13, %c0_14] : memref<8x128xf32, #tpu.memory_space<vmem>>, vector<8x128xf32>
    %c0_i32_15 = arith.constant 0 : i32
    %c8_i32 = arith.constant 8 : i32
    %14 = arith.muli %c0_i32_15, %c8_i32 : i32
    %15 = tpu.assume_multiple %14, 8 : i32
    %16 = arith.index_cast %15 : i32 to index
    %c0_16 = arith.constant 0 : index
    %17 = vector.load %arg11[%16, %c0_16] : memref<64x512xf32, #tpu.memory_space<vmem>>, vector<8x512xf32>
    %18 = arith.truncf %12 : vector<8x128xf32> to vector<8x128xbf16>
    %cst_17 = arith.constant dense<0.000000e+00> : vector<8x512xf32>
    %19 = tpu.matmul %18, %11, %cst_17 {dimension_numbers = #tpu.dot_dimension_numbers<[1], [0], [0], [1], [0, 0, 1, 1], [], []>} : vector<8x128xbf16>, vector<128x512xbf16>, vector<8x512xf32> -> vector<8x512xf32>
    %20 = arith.addf %17, %19 : vector<8x512xf32>
    %21 = vector.extract_strided_slice %20 {offsets = [0, 0], sizes = [8, 128], strides = [1, 1]} : vector<8x512xf32> to vector<8x128xf32>
    %cst_18 = arith.constant 0.000000e+00 : f32
    %22 = vector.broadcast %cst_18 : f32 to vector<8x128xf32>
    %23 = arith.subf %22, %21 : vector<8x128xf32>
    %24 = math.exp %23 : vector<8x128xf32>
    %cst_19 = arith.constant 1.000000e+00 : f32
    %25 = vector.broadcast %cst_19 : f32 to vector<8x128xf32>
    %26 = arith.addf %25, %24 : vector<8x128xf32>
    %27 = tpu.reciprocal %26 {approx = true} : vector<8x128xf32> -> vector<8x128xf32>
    %28 = vector.extract_strided_slice %20 {offsets = [0, 128], sizes = [8, 128], strides = [1, 1]} : vector<8x512xf32> to vector<8x128xf32>
    %cst_20 = arith.constant 0.000000e+00 : f32
    %29 = vector.broadcast %cst_20 : f32 to vector<8x128xf32>
    %30 = arith.subf %29, %28 : vector<8x128xf32>
    %31 = math.exp %30 : vector<8x128xf32>
    %cst_21 = arith.constant 1.000000e+00 : f32
    %32 = vector.broadcast %cst_21 : f32 to vector<8x128xf32>
    %33 = arith.addf %32, %31 : vector<8x128xf32>
    %34 = tpu.reciprocal %33 {approx = true} : vector<8x128xf32> -> vector<8x128xf32>
    %35 = vector.extract_strided_slice %20 {offsets = [0, 256], sizes = [8, 128], strides = [1, 1]} : vector<8x512xf32> to vector<8x128xf32>
    %36 = math.tanh %35 : vector<8x128xf32>
    %37 = vector.extract_strided_slice %20 {offsets = [0, 384], sizes = [8, 128], strides = [1, 1]} : vector<8x512xf32> to vector<8x128xf32>
    %cst_22 = arith.constant 0.000000e+00 : f32
    %38 = vector.broadcast %cst_22 : f32 to vector<8x128xf32>
    %39 = arith.subf %38, %37 : vector<8x128xf32>
    %40 = math.exp %39 : vector<8x128xf32>
    %cst_23 = arith.constant 1.000000e+00 : f32
    %41 = vector.broadcast %cst_23 : f32 to vector<8x128xf32>
    %42 = arith.addf %41, %40 : vector<8x128xf32>
    %43 = tpu.reciprocal %42 {approx = true} : vector<8x128xf32> -> vector<8x128xf32>
    %44 = arith.mulf %34, %13 : vector<8x128xf32>
    %45 = arith.mulf %27, %36 : vector<8x128xf32>
    %46 = arith.addf %44, %45 : vector<8x128xf32>
    %47 = math.tanh %46 : vector<8x128xf32>
    %48 = arith.mulf %43, %47 : vector<8x128xf32>
    %49 = arith.truncf %48 : vector<8x128xf32> to vector<8x128xbf16>
    %50 = arith.index_cast %c0_i32_15 : i32 to index
    %c0_24 = arith.constant 0 : index
    %c0_25 = arith.constant 0 : index
    %51 = vector.load %arg8[%50, %c0_24, %c0_25] : memref<8x8x128xbf16, #tpu.memory_space<vmem>>, vector<1x8x128xbf16>
    %52 = vector.shape_cast %51 : vector<1x8x128xbf16> to vector<8x128xbf16>
    %53 = vector.shape_cast %49 : vector<8x128xbf16> to vector<1x8x128xbf16>
    tpu.vector_store %arg8[%50, %c0_24, %c0_25], %53 {strides = array<i32>} : memref<8x8x128xbf16, #tpu.memory_space<vmem>>, vector<1x8x128xbf16>,
    %c1_i32 = arith.constant 1 : i32
    %c8_i32_26 = arith.constant 8 : i32
    %54 = arith.muli %c1_i32, %c8_i32_26 : i32
    %55 = tpu.assume_multiple %54, 8 : i32
    %56 = arith.index_cast %55 : i32 to index
    %c0_27 = arith.constant 0 : index
    %57 = vector.load %arg11[%56, %c0_27] : memref<64x512xf32, #tpu.memory_space<vmem>>, vector<8x512xf32>
    %58 = arith.truncf %48 : vector<8x128xf32> to vector<8x128xbf16>
    %cst_28 = arith.constant dense<0.000000e+00> : vector<8x512xf32>
    %59 = tpu.matmul %58, %11, %cst_28 {dimension_numbers = #tpu.dot_dimension_numbers<[1], [0], [0], [1], [0, 0, 1, 1], [], []>} : vector<8x128xbf16>, vector<128x512xbf16>, vector<8x512xf32> -> vector<8x512xf32>
    %60 = arith.addf %57, %59 : vector<8x512xf32>
    %61 = vector.extract_strided_slice %60 {offsets = [0, 0], sizes = [8, 128], strides = [1, 1]} : vector<8x512xf32> to vector<8x128xf32>
    %cst_29 = arith.constant 0.000000e+00 : f32
    %62 = vector.broadcast %cst_29 : f32 to vector<8x128xf32>
    %63 = arith.subf %62, %61 : vector<8x128xf32>
    %64 = math.exp %63 : vector<8x128xf32>
    %cst_30 = arith.constant 1.000000e+00 : f32
    %65 = vector.broadcast %cst_30 : f32 to vector<8x128xf32>
    %66 = arith.addf %65, %64 : vector<8x128xf32>
    %67 = tpu.reciprocal %66 {approx = true} : vector<8x128xf32> -> vector<8x128xf32>
    %68 = vector.extract_strided_slice %60 {offsets = [0, 128], sizes = [8, 128], strides = [1, 1]} : vector<8x512xf32> to vector<8x128xf32>
    %cst_31 = arith.constant 0.000000e+00 : f32
    %69 = vector.broadcast %cst_31 : f32 to vector<8x128xf32>
    %70 = arith.subf %69, %68 : vector<8x128xf32>
    %71 = math.exp %70 : vector<8x128xf32>
    %cst_32 = arith.constant 1.000000e+00 : f32
    %72 = vector.broadcast %cst_32 : f32 to vector<8x128xf32>
    %73 = arith.addf %72, %71 : vector<8x128xf32>
    %74 = tpu.reciprocal %73 {approx = true} : vector<8x128xf32> -> vector<8x128xf32>
    %75 = vector.extract_strided_slice %60 {offsets = [0, 256], sizes = [8, 128], strides = [1, 1]} : vector<8x512xf32> to vector<8x128xf32>
    %76 = math.tanh %75 : vector<8x128xf32>
    %77 = vector.extract_strided_slice %60 {offsets = [0, 384], sizes = [8, 128], strides = [1, 1]} : vector<8x512xf32> to vector<8x128xf32>
    %cst_33 = arith.constant 0.000000e+00 : f32
    %78 = vector.broadcast %cst_33 : f32 to vector<8x128xf32>
    %79 = arith.subf %78, %77 : vector<8x128xf32>
    %80 = math.exp %79 : vector<8x128xf32>
    %cst_34 = arith.constant 1.000000e+00 : f32
    %81 = vector.broadcast %cst_34 : f32 to vector<8x128xf32>
    %82 = arith.addf %81, %80 : vector<8x128xf32>
    %83 = tpu.reciprocal %82 {approx = true} : vector<8x128xf32> -> vector<8x128xf32>
    %84 = arith.mulf %74, %46 : vector<8x128xf32>
    %85 = arith.mulf %67, %76 : vector<8x128xf32>
    %86 = arith.addf %84, %85 : vector<8x128xf32>
    %87 = math.tanh %86 : vector<8x128xf32>
    %88 = arith.mulf %83, %87 : vector<8x128xf32>
    %89 = arith.truncf %88 : vector<8x128xf32> to vector<8x128xbf16>
    %90 = arith.index_cast %c1_i32 : i32 to index
    %c0_35 = arith.constant 0 : index
    %c0_36 = arith.constant 0 : index
    %91 = vector.load %arg8[%90, %c0_35, %c0_36] : memref<8x8x128xbf16, #tpu.memory_space<vmem>>, vector<1x8x128xbf16>
    %92 = vector.shape_cast %91 : vector<1x8x128xbf16> to vector<8x128xbf16>
    %93 = vector.shape_cast %89 : vector<8x128xbf16> to vector<1x8x128xbf16>
    tpu.vector_store %arg8[%90, %c0_35, %c0_36], %93 {strides = array<i32>} : memref<8x8x128xbf16, #tpu.memory_space<vmem>>, vector<1x8x128xbf16>,
    %c2_i32 = arith.constant 2 : i32
    %c8_i32_37 = arith.constant 8 : i32
    %94 = arith.muli %c2_i32, %c8_i32_37 : i32
    %95 = tpu.assume_multiple %94, 8 : i32
    %96 = arith.index_cast %95 : i32 to index
    %c0_38 = arith.constant 0 : index
    %97 = vector.load %arg11[%96, %c0_38] : memref<64x512xf32, #tpu.memory_space<vmem>>, vector<8x512xf32>
    %98 = arith.truncf %88 : vector<8x128xf32> to vector<8x128xbf16>
    %cst_39 = arith.constant dense<0.000000e+00> : vector<8x512xf32>
    %99 = tpu.matmul %98, %11, %cst_39 {dimension_numbers = #tpu.dot_dimension_numbers<[1], [0], [0], [1], [0, 0, 1, 1], [], []>} : vector<8x128xbf16>, vector<128x512xbf16>, vector<8x512xf32> -> vector<8x512xf32>
    %100 = arith.addf %97, %99 : vector<8x512xf32>
    %101 = vector.extract_strided_slice %100 {offsets = [0, 0], sizes = [8, 128], strides = [1, 1]} : vector<8x512xf32> to vector<8x128xf32>
    %cst_40 = arith.constant 0.000000e+00 : f32
    %102 = vector.broadcast %cst_40 : f32 to vector<8x128xf32>
    %103 = arith.subf %102, %101 : vector<8x128xf32>
    %104 = math.exp %103 : vector<8x128xf32>
    %cst_41 = arith.constant 1.000000e+00 : f32
    %105 = vector.broadcast %cst_41 : f32 to vector<8x128xf32>
    %106 = arith.addf %105, %104 : vector<8x128xf32>
    %107 = tpu.reciprocal %106 {approx = true} : vector<8x128xf32> -> vector<8x128xf32>
    %108 = vector.extract_strided_slice %100 {offsets = [0, 128], sizes = [8, 128], strides = [1, 1]} : vector<8x512xf32> to vector<8x128xf32>
    %cst_42 = arith.constant 0.000000e+00 : f32
    %109 = vector.broadcast %cst_42 : f32 to vector<8x128xf32>
    %110 = arith.subf %109, %108 : vector<8x128xf32>
    %111 = math.exp %110 : vector<8x128xf32>
    %cst_43 = arith.constant 1.000000e+00 : f32
    %112 = vector.broadcast %cst_43 : f32 to vector<8x128xf32>
    %113 = arith.addf %112, %111 : vector<8x128xf32>
    %114 = tpu.reciprocal %113 {approx = true} : vector<8x128xf32> -> vector<8x128xf32>
    %115 = vector.extract_strided_slice %100 {offsets = [0, 256], sizes = [8, 128], strides = [1, 1]} : vector<8x512xf32> to vector<8x128xf32>
    %116 = math.tanh %115 : vector<8x128xf32>
    %117 = vector.extract_strided_slice %100 {offsets = [0, 384], sizes = [8, 128], strides = [1, 1]} : vector<8x512xf32> to vector<8x128xf32>
    %cst_44 = arith.constant 0.000000e+00 : f32
    %118 = vector.broadcast %cst_44 : f32 to vector<8x128xf32>
    %119 = arith.subf %118, %117 : vector<8x128xf32>
    %120 = math.exp %119 : vector<8x128xf32>
    %cst_45 = arith.constant 1.000000e+00 : f32
    %121 = vector.broadcast %cst_45 : f32 to vector<8x128xf32>
    %122 = arith.addf %121, %120 : vector<8x128xf32>
    %123 = tpu.reciprocal %122 {approx = true} : vector<8x128xf32> -> vector<8x128xf32>
    %124 = arith.mulf %114, %86 : vector<8x128xf32>
    %125 = arith.mulf %107, %116 : vector<8x128xf32>
    %126 = arith.addf %124, %125 : vector<8x128xf32>
    %127 = math.tanh %126 : vector<8x128xf32>
    %128 = arith.mulf %123, %127 : vector<8x128xf32>
    %129 = arith.truncf %128 : vector<8x128xf32> to vector<8x128xbf16>
    %130 = arith.index_cast %c2_i32 : i32 to index
    %c0_46 = arith.constant 0 : index
    %c0_47 = arith.constant 0 : index
    %131 = vector.load %arg8[%130, %c0_46, %c0_47] : memref<8x8x128xbf16, #tpu.memory_space<vmem>>, vector<1x8x128xbf16>
    %132 = vector.shape_cast %131 : vector<1x8x128xbf16> to vector<8x128xbf16>
    %133 = vector.shape_cast %129 : vector<8x128xbf16> to vector<1x8x128xbf16>
    tpu.vector_store %arg8[%130, %c0_46, %c0_47], %133 {strides = array<i32>} : memref<8x8x128xbf16, #tpu.memory_space<vmem>>, vector<1x8x128xbf16>,
    %c3_i32 = arith.constant 3 : i32
    %c8_i32_48 = arith.constant 8 : i32
    %134 = arith.muli %c3_i32, %c8_i32_48 : i32
    %135 = tpu.assume_multiple %134, 8 : i32
    %136 = arith.index_cast %135 : i32 to index
    %c0_49 = arith.constant 0 : index
    %137 = vector.load %arg11[%136, %c0_49] : memref<64x512xf32, #tpu.memory_space<vmem>>, vector<8x512xf32>
    %138 = arith.truncf %128 : vector<8x128xf32> to vector<8x128xbf16>
    %cst_50 = arith.constant dense<0.000000e+00> : vector<8x512xf32>
    %139 = tpu.matmul %138, %11, %cst_50 {dimension_numbers = #tpu.dot_dimension_numbers<[1], [0], [0], [1], [0, 0, 1, 1], [], []>} : vector<8x128xbf16>, vector<128x512xbf16>, vector<8x512xf32> -> vector<8x512xf32>
    %140 = arith.addf %137, %139 : vector<8x512xf32>
    %141 = vector.extract_strided_slice %140 {offsets = [0, 0], sizes = [8, 128], strides = [1, 1]} : vector<8x512xf32> to vector<8x128xf32>
    %cst_51 = arith.constant 0.000000e+00 : f32
    %142 = vector.broadcast %cst_51 : f32 to vector<8x128xf32>
    %143 = arith.subf %142, %141 : vector<8x128xf32>
    %144 = math.exp %143 : vector<8x128xf32>
    %cst_52 = arith.constant 1.000000e+00 : f32
    %145 = vector.broadcast %cst_52 : f32 to vector<8x128xf32>
    %146 = arith.addf %145, %144 : vector<8x128xf32>
    %147 = tpu.reciprocal %146 {approx = true} : vector<8x128xf32> -> vector<8x128xf32>
    %148 = vector.extract_strided_slice %140 {offsets = [0, 128], sizes = [8, 128], strides = [1, 1]} : vector<8x512xf32> to vector<8x128xf32>
    %cst_53 = arith.constant 0.000000e+00 : f32
    %149 = vector.broadcast %cst_53 : f32 to vector<8x128xf32>
    %150 = arith.subf %149, %148 : vector<8x128xf32>
    %151 = math.exp %150 : vector<8x128xf32>
    %cst_54 = arith.constant 1.000000e+00 : f32
    %152 = vector.broadcast %cst_54 : f32 to vector<8x128xf32>
    %153 = arith.addf %152, %151 : vector<8x128xf32>
    %154 = tpu.reciprocal %153 {approx = true} : vector<8x128xf32> -> vector<8x128xf32>
    %155 = vector.extract_strided_slice %140 {offsets = [0, 256], sizes = [8, 128], strides = [1, 1]} : vector<8x512xf32> to vector<8x128xf32>
    %156 = math.tanh %155 : vector<8x128xf32>
    %157 = vector.extract_strided_slice %140 {offsets = [0, 384], sizes = [8, 128], strides = [1, 1]} : vector<8x512xf32> to vector<8x128xf32>
    %cst_55 = arith.constant 0.000000e+00 : f32
    %158 = vector.broadcast %cst_55 : f32 to vector<8x128xf32>
    %159 = arith.subf %158, %157 : vector<8x128xf32>
    %160 = math.exp %159 : vector<8x128xf32>
    %cst_56 = arith.constant 1.000000e+00 : f32
    %161 = vector.broadcast %cst_56 : f32 to vector<8x128xf32>
    %162 = arith.addf %161, %160 : vector<8x128xf32>
    %163 = tpu.reciprocal %162 {approx = true} : vector<8x128xf32> -> vector<8x128xf32>
    %164 = arith.mulf %154, %126 : vector<8x128xf32>
    %165 = arith.mulf %147, %156 : vector<8x128xf32>
    %166 = arith.addf %164, %165 : vector<8x128xf32>
    %167 = math.tanh %166 : vector<8x128xf32>
    %168 = arith.mulf %163, %167 : vector<8x128xf32>
    %169 = arith.truncf %168 : vector<8x128xf32> to vector<8x128xbf16>
    %170 = arith.index_cast %c3_i32 : i32 to index
    %c0_57 = arith.constant 0 : index
    %c0_58 = arith.constant 0 : index
    %171 = vector.load %arg8[%170, %c0_57, %c0_58] : memref<8x8x128xbf16, #tpu.memory_space<vmem>>, vector<1x8x128xbf16>
    %172 = vector.shape_cast %171 : vector<1x8x128xbf16> to vector<8x128xbf16>
    %173 = vector.shape_cast %169 : vector<8x128xbf16> to vector<1x8x128xbf16>
    tpu.vector_store %arg8[%170, %c0_57, %c0_58], %173 {strides = array<i32>} : memref<8x8x128xbf16, #tpu.memory_space<vmem>>, vector<1x8x128xbf16>,
    %c4_i32 = arith.constant 4 : i32
    %c8_i32_59 = arith.constant 8 : i32
    %174 = arith.muli %c4_i32, %c8_i32_59 : i32
    %175 = tpu.assume_multiple %174, 8 : i32
    %176 = arith.index_cast %175 : i32 to index
    %c0_60 = arith.constant 0 : index
    %177 = vector.load %arg11[%176, %c0_60] : memref<64x512xf32, #tpu.memory_space<vmem>>, vector<8x512xf32>
    %178 = arith.truncf %168 : vector<8x128xf32> to vector<8x128xbf16>
    %cst_61 = arith.constant dense<0.000000e+00> : vector<8x512xf32>
    %179 = tpu.matmul %178, %11, %cst_61 {dimension_numbers = #tpu.dot_dimension_numbers<[1], [0], [0], [1], [0, 0, 1, 1], [], []>} : vector<8x128xbf16>, vector<128x512xbf16>, vector<8x512xf32> -> vector<8x512xf32>
    %180 = arith.addf %177, %179 : vector<8x512xf32>
    %181 = vector.extract_strided_slice %180 {offsets = [0, 0], sizes = [8, 128], strides = [1, 1]} : vector<8x512xf32> to vector<8x128xf32>
    %cst_62 = arith.constant 0.000000e+00 : f32
    %182 = vector.broadcast %cst_62 : f32 to vector<8x128xf32>
    %183 = arith.subf %182, %181 : vector<8x128xf32>
    %184 = math.exp %183 : vector<8x128xf32>
    %cst_63 = arith.constant 1.000000e+00 : f32
    %185 = vector.broadcast %cst_63 : f32 to vector<8x128xf32>
    %186 = arith.addf %185, %184 : vector<8x128xf32>
    %187 = tpu.reciprocal %186 {approx = true} : vector<8x128xf32> -> vector<8x128xf32>
    %188 = vector.extract_strided_slice %180 {offsets = [0, 128], sizes = [8, 128], strides = [1, 1]} : vector<8x512xf32> to vector<8x128xf32>
    %cst_64 = arith.constant 0.000000e+00 : f32
    %189 = vector.broadcast %cst_64 : f32 to vector<8x128xf32>
    %190 = arith.subf %189, %188 : vector<8x128xf32>
    %191 = math.exp %190 : vector<8x128xf32>
    %cst_65 = arith.constant 1.000000e+00 : f32
    %192 = vector.broadcast %cst_65 : f32 to vector<8x128xf32>
    %193 = arith.addf %192, %191 : vector<8x128xf32>
    %194 = tpu.reciprocal %193 {approx = true} : vector<8x128xf32> -> vector<8x128xf32>
    %195 = vector.extract_strided_slice %180 {offsets = [0, 256], sizes = [8, 128], strides = [1, 1]} : vector<8x512xf32> to vector<8x128xf32>
    %196 = math.tanh %195 : vector<8x128xf32>
    %197 = vector.extract_strided_slice %180 {offsets = [0, 384], sizes = [8, 128], strides = [1, 1]} : vector<8x512xf32> to vector<8x128xf32>
    %cst_66 = arith.constant 0.000000e+00 : f32
    %198 = vector.broadcast %cst_66 : f32 to vector<8x128xf32>
    %199 = arith.subf %198, %197 : vector<8x128xf32>
    %200 = math.exp %199 : vector<8x128xf32>
    %cst_67 = arith.constant 1.000000e+00 : f32
    %201 = vector.broadcast %cst_67 : f32 to vector<8x128xf32>
    %202 = arith.addf %201, %200 : vector<8x128xf32>
    %203 = tpu.reciprocal %202 {approx = true} : vector<8x128xf32> -> vector<8x128xf32>
    %204 = arith.mulf %194, %166 : vector<8x128xf32>
    %205 = arith.mulf %187, %196 : vector<8x128xf32>
    %206 = arith.addf %204, %205 : vector<8x128xf32>
    %207 = math.tanh %206 : vector<8x128xf32>
    %208 = arith.mulf %203, %207 : vector<8x128xf32>
    %209 = arith.truncf %208 : vector<8x128xf32> to vector<8x128xbf16>
    %210 = arith.index_cast %c4_i32 : i32 to index
    %c0_68 = arith.constant 0 : index
    %c0_69 = arith.constant 0 : index
    %211 = vector.load %arg8[%210, %c0_68, %c0_69] : memref<8x8x128xbf16, #tpu.memory_space<vmem>>, vector<1x8x128xbf16>
    %212 = vector.shape_cast %211 : vector<1x8x128xbf16> to vector<8x128xbf16>
    %213 = vector.shape_cast %209 : vector<8x128xbf16> to vector<1x8x128xbf16>
    tpu.vector_store %arg8[%210, %c0_68, %c0_69], %213 {strides = array<i32>} : memref<8x8x128xbf16, #tpu.memory_space<vmem>>, vector<1x8x128xbf16>,
    %c5_i32 = arith.constant 5 : i32
    %c8_i32_70 = arith.constant 8 : i32
    %214 = arith.muli %c5_i32, %c8_i32_70 : i32
    %215 = tpu.assume_multiple %214, 8 : i32
    %216 = arith.index_cast %215 : i32 to index
    %c0_71 = arith.constant 0 : index
    %217 = vector.load %arg11[%216, %c0_71] : memref<64x512xf32, #tpu.memory_space<vmem>>, vector<8x512xf32>
    %218 = arith.truncf %208 : vector<8x128xf32> to vector<8x128xbf16>
    %cst_72 = arith.constant dense<0.000000e+00> : vector<8x512xf32>
    %219 = tpu.matmul %218, %11, %cst_72 {dimension_numbers = #tpu.dot_dimension_numbers<[1], [0], [0], [1], [0, 0, 1, 1], [], []>} : vector<8x128xbf16>, vector<128x512xbf16>, vector<8x512xf32> -> vector<8x512xf32>
    %220 = arith.addf %217, %219 : vector<8x512xf32>
    %221 = vector.extract_strided_slice %220 {offsets = [0, 0], sizes = [8, 128], strides = [1, 1]} : vector<8x512xf32> to vector<8x128xf32>
    %cst_73 = arith.constant 0.000000e+00 : f32
    %222 = vector.broadcast %cst_73 : f32 to vector<8x128xf32>
    %223 = arith.subf %222, %221 : vector<8x128xf32>
    %224 = math.exp %223 : vector<8x128xf32>
    %cst_74 = arith.constant 1.000000e+00 : f32
    %225 = vector.broadcast %cst_74 : f32 to vector<8x128xf32>
    %226 = arith.addf %225, %224 : vector<8x128xf32>
    %227 = tpu.reciprocal %226 {approx = true} : vector<8x128xf32> -> vector<8x128xf32>
    %228 = vector.extract_strided_slice %220 {offsets = [0, 128], sizes = [8, 128], strides = [1, 1]} : vector<8x512xf32> to vector<8x128xf32>
    %cst_75 = arith.constant 0.000000e+00 : f32
    %229 = vector.broadcast %cst_75 : f32 to vector<8x128xf32>
    %230 = arith.subf %229, %228 : vector<8x128xf32>
    %231 = math.exp %230 : vector<8x128xf32>
    %cst_76 = arith.constant 1.000000e+00 : f32
    %232 = vector.broadcast %cst_76 : f32 to vector<8x128xf32>
    %233 = arith.addf %232, %231 : vector<8x128xf32>
    %234 = tpu.reciprocal %233 {approx = true} : vector<8x128xf32> -> vector<8x128xf32>
    %235 = vector.extract_strided_slice %220 {offsets = [0, 256], sizes = [8, 128], strides = [1, 1]} : vector<8x512xf32> to vector<8x128xf32>
    %236 = math.tanh %235 : vector<8x128xf32>
    %237 = vector.extract_strided_slice %220 {offsets = [0, 384], sizes = [8, 128], strides = [1, 1]} : vector<8x512xf32> to vector<8x128xf32>
    %cst_77 = arith.constant 0.000000e+00 : f32
    %238 = vector.broadcast %cst_77 : f32 to vector<8x128xf32>
    %239 = arith.subf %238, %237 : vector<8x128xf32>
    %240 = math.exp %239 : vector<8x128xf32>
    %cst_78 = arith.constant 1.000000e+00 : f32
    %241 = vector.broadcast %cst_78 : f32 to vector<8x128xf32>
    %242 = arith.addf %241, %240 : vector<8x128xf32>
    %243 = tpu.reciprocal %242 {approx = true} : vector<8x128xf32> -> vector<8x128xf32>
    %244 = arith.mulf %234, %206 : vector<8x128xf32>
    %245 = arith.mulf %227, %236 : vector<8x128xf32>
    %246 = arith.addf %244, %245 : vector<8x128xf32>
    %247 = math.tanh %246 : vector<8x128xf32>
    %248 = arith.mulf %243, %247 : vector<8x128xf32>
    %249 = arith.truncf %248 : vector<8x128xf32> to vector<8x128xbf16>
    %250 = arith.index_cast %c5_i32 : i32 to index
    %c0_79 = arith.constant 0 : index
    %c0_80 = arith.constant 0 : index
    %251 = vector.load %arg8[%250, %c0_79, %c0_80] : memref<8x8x128xbf16, #tpu.memory_space<vmem>>, vector<1x8x128xbf16>
    %252 = vector.shape_cast %251 : vector<1x8x128xbf16> to vector<8x128xbf16>
    %253 = vector.shape_cast %249 : vector<8x128xbf16> to vector<1x8x128xbf16>
    tpu.vector_store %arg8[%250, %c0_79, %c0_80], %253 {strides = array<i32>} : memref<8x8x128xbf16, #tpu.memory_space<vmem>>, vector<1x8x128xbf16>,
    %c6_i32 = arith.constant 6 : i32
    %c8_i32_81 = arith.constant 8 : i32
    %254 = arith.muli %c6_i32, %c8_i32_81 : i32
    %255 = tpu.assume_multiple %254, 8 : i32
    %256 = arith.index_cast %255 : i32 to index
    %c0_82 = arith.constant 0 : index
    %257 = vector.load %arg11[%256, %c0_82] : memref<64x512xf32, #tpu.memory_space<vmem>>, vector<8x512xf32>
    %258 = arith.truncf %248 : vector<8x128xf32> to vector<8x128xbf16>
    %cst_83 = arith.constant dense<0.000000e+00> : vector<8x512xf32>
    %259 = tpu.matmul %258, %11, %cst_83 {dimension_numbers = #tpu.dot_dimension_numbers<[1], [0], [0], [1], [0, 0, 1, 1], [], []>} : vector<8x128xbf16>, vector<128x512xbf16>, vector<8x512xf32> -> vector<8x512xf32>
    %260 = arith.addf %257, %259 : vector<8x512xf32>
    %261 = vector.extract_strided_slice %260 {offsets = [0, 0], sizes = [8, 128], strides = [1, 1]} : vector<8x512xf32> to vector<8x128xf32>
    %cst_84 = arith.constant 0.000000e+00 : f32
    %262 = vector.broadcast %cst_84 : f32 to vector<8x128xf32>
    %263 = arith.subf %262, %261 : vector<8x128xf32>
    %264 = math.exp %263 : vector<8x128xf32>
    %cst_85 = arith.constant 1.000000e+00 : f32
    %265 = vector.broadcast %cst_85 : f32 to vector<8x128xf32>
    %266 = arith.addf %265, %264 : vector<8x128xf32>
    %267 = tpu.reciprocal %266 {approx = true} : vector<8x128xf32> -> vector<8x128xf32>
    %268 = vector.extract_strided_slice %260 {offsets = [0, 128], sizes = [8, 128], strides = [1, 1]} : vector<8x512xf32> to vector<8x128xf32>
    %cst_86 = arith.constant 0.000000e+00 : f32
    %269 = vector.broadcast %cst_86 : f32 to vector<8x128xf32>
    %270 = arith.subf %269, %268 : vector<8x128xf32>
    %271 = math.exp %270 : vector<8x128xf32>
    %cst_87 = arith.constant 1.000000e+00 : f32
    %272 = vector.broadcast %cst_87 : f32 to vector<8x128xf32>
    %273 = arith.addf %272, %271 : vector<8x128xf32>
    %274 = tpu.reciprocal %273 {approx = true} : vector<8x128xf32> -> vector<8x128xf32>
    %275 = vector.extract_strided_slice %260 {offsets = [0, 256], sizes = [8, 128], strides = [1, 1]} : vector<8x512xf32> to vector<8x128xf32>
    %276 = math.tanh %275 : vector<8x128xf32>
    %277 = vector.extract_strided_slice %260 {offsets = [0, 384], sizes = [8, 128], strides = [1, 1]} : vector<8x512xf32> to vector<8x128xf32>
    %cst_88 = arith.constant 0.000000e+00 : f32
    %278 = vector.broadcast %cst_88 : f32 to vector<8x128xf32>
    %279 = arith.subf %278, %277 : vector<8x128xf32>
    %280 = math.exp %279 : vector<8x128xf32>
    %cst_89 = arith.constant 1.000000e+00 : f32
    %281 = vector.broadcast %cst_89 : f32 to vector<8x128xf32>
    %282 = arith.addf %281, %280 : vector<8x128xf32>
    %283 = tpu.reciprocal %282 {approx = true} : vector<8x128xf32> -> vector<8x128xf32>
    %284 = arith.mulf %274, %246 : vector<8x128xf32>
    %285 = arith.mulf %267, %276 : vector<8x128xf32>
    %286 = arith.addf %284, %285 : vector<8x128xf32>
    %287 = math.tanh %286 : vector<8x128xf32>
    %288 = arith.mulf %283, %287 : vector<8x128xf32>
    %289 = arith.truncf %288 : vector<8x128xf32> to vector<8x128xbf16>
    %290 = arith.index_cast %c6_i32 : i32 to index
    %c0_90 = arith.constant 0 : index
    %c0_91 = arith.constant 0 : index
    %291 = vector.load %arg8[%290, %c0_90, %c0_91] : memref<8x8x128xbf16, #tpu.memory_space<vmem>>, vector<1x8x128xbf16>
    %292 = vector.shape_cast %291 : vector<1x8x128xbf16> to vector<8x128xbf16>
    %293 = vector.shape_cast %289 : vector<8x128xbf16> to vector<1x8x128xbf16>
    tpu.vector_store %arg8[%290, %c0_90, %c0_91], %293 {strides = array<i32>} : memref<8x8x128xbf16, #tpu.memory_space<vmem>>, vector<1x8x128xbf16>,
    %c7_i32 = arith.constant 7 : i32
    %c8_i32_92 = arith.constant 8 : i32
    %294 = arith.muli %c7_i32, %c8_i32_92 : i32
    %295 = tpu.assume_multiple %294, 8 : i32
    %296 = arith.index_cast %295 : i32 to index
    %c0_93 = arith.constant 0 : index
    %297 = vector.load %arg11[%296, %c0_93] : memref<64x512xf32, #tpu.memory_space<vmem>>, vector<8x512xf32>
    %298 = arith.truncf %288 : vector<8x128xf32> to vector<8x128xbf16>
    %cst_94 = arith.constant dense<0.000000e+00> : vector<8x512xf32>
    %299 = tpu.matmul %298, %11, %cst_94 {dimension_numbers = #tpu.dot_dimension_numbers<[1], [0], [0], [1], [0, 0, 1, 1], [], []>} : vector<8x128xbf16>, vector<128x512xbf16>, vector<8x512xf32> -> vector<8x512xf32>
    %300 = arith.addf %297, %299 : vector<8x512xf32>
    %301 = vector.extract_strided_slice %300 {offsets = [0, 0], sizes = [8, 128], strides = [1, 1]} : vector<8x512xf32> to vector<8x128xf32>
    %cst_95 = arith.constant 0.000000e+00 : f32
    %302 = vector.broadcast %cst_95 : f32 to vector<8x128xf32>
    %303 = arith.subf %302, %301 : vector<8x128xf32>
    %304 = math.exp %303 : vector<8x128xf32>
    %cst_96 = arith.constant 1.000000e+00 : f32
    %305 = vector.broadcast %cst_96 : f32 to vector<8x128xf32>
    %306 = arith.addf %305, %304 : vector<8x128xf32>
    %307 = tpu.reciprocal %306 {approx = true} : vector<8x128xf32> -> vector<8x128xf32>
    %308 = vector.extract_strided_slice %300 {offsets = [0, 128], sizes = [8, 128], strides = [1, 1]} : vector<8x512xf32> to vector<8x128xf32>
    %cst_97 = arith.constant 0.000000e+00 : f32
    %309 = vector.broadcast %cst_97 : f32 to vector<8x128xf32>
    %310 = arith.subf %309, %308 : vector<8x128xf32>
    %311 = math.exp %310 : vector<8x128xf32>
    %cst_98 = arith.constant 1.000000e+00 : f32
    %312 = vector.broadcast %cst_98 : f32 to vector<8x128xf32>
    %313 = arith.addf %312, %311 : vector<8x128xf32>
    %314 = tpu.reciprocal %313 {approx = true} : vector<8x128xf32> -> vector<8x128xf32>
    %315 = vector.extract_strided_slice %300 {offsets = [0, 256], sizes = [8, 128], strides = [1, 1]} : vector<8x512xf32> to vector<8x128xf32>
    %316 = math.tanh %315 : vector<8x128xf32>
    %317 = vector.extract_strided_slice %300 {offsets = [0, 384], sizes = [8, 128], strides = [1, 1]} : vector<8x512xf32> to vector<8x128xf32>
    %cst_99 = arith.constant 0.000000e+00 : f32
    %318 = vector.broadcast %cst_99 : f32 to vector<8x128xf32>
    %319 = arith.subf %318, %317 : vector<8x128xf32>
    %320 = math.exp %319 : vector<8x128xf32>
    %cst_100 = arith.constant 1.000000e+00 : f32
    %321 = vector.broadcast %cst_100 : f32 to vector<8x128xf32>
    %322 = arith.addf %321, %320 : vector<8x128xf32>
    %323 = tpu.reciprocal %322 {approx = true} : vector<8x128xf32> -> vector<8x128xf32>
    %324 = arith.mulf %314, %286 : vector<8x128xf32>
    %325 = arith.mulf %307, %316 : vector<8x128xf32>
    %326 = arith.addf %324, %325 : vector<8x128xf32>
    %327 = math.tanh %326 : vector<8x128xf32>
    %328 = arith.mulf %323, %327 : vector<8x128xf32>
    %329 = arith.truncf %328 : vector<8x128xf32> to vector<8x128xbf16>
    %330 = arith.index_cast %c7_i32 : i32 to index
    %c0_101 = arith.constant 0 : index
    %c0_102 = arith.constant 0 : index
    %331 = vector.load %arg8[%330, %c0_101, %c0_102] : memref<8x8x128xbf16, #tpu.memory_space<vmem>>, vector<1x8x128xbf16>
    %332 = vector.shape_cast %331 : vector<1x8x128xbf16> to vector<8x128xbf16>
    %333 = vector.shape_cast %329 : vector<8x128xbf16> to vector<1x8x128xbf16>
    tpu.vector_store %arg8[%330, %c0_101, %c0_102], %333 {strides = array<i32>} : memref<8x8x128xbf16, #tpu.memory_space<vmem>>, vector<1x8x128xbf16>,
    %c8_i32_103 = arith.constant 8 : i32
    %c0_104 = arith.constant 0 : index
    %c0_105 = arith.constant 0 : index
    %334 = vector.load %arg12[%c0_104, %c0_105] : memref<8x128xf32, #tpu.memory_space<vmem>>, vector<8x128xf32>
    tpu.vector_store %arg12[%c0_104, %c0_105], %328 {strides = array<i32>} : memref<8x128xf32, #tpu.memory_space<vmem>>, vector<8x128xf32>,
    %c0_106 = arith.constant 0 : index
    %c0_107 = arith.constant 0 : index
    %335 = vector.load %arg13[%c0_106, %c0_107] : memref<8x128xf32, #tpu.memory_space<vmem>>, vector<8x128xf32>
    tpu.vector_store %arg13[%c0_106, %c0_107], %326 {strides = array<i32>} : memref<8x128xf32, #tpu.memory_space<vmem>>, vector<8x128xf32>,
    %c0_i32_108 = arith.constant 0 : i32
    %336 = arith.cmpi eq, %arg1, %c0_i32_108 : i32
    %337 = arith.extui %336 : i1 to i32
    %c0_i32_109 = arith.constant 0 : i32
    %338 = arith.cmpi ne, %337, %c0_i32_109 : i32
    scf.if %338 {
      %c0_110 = arith.constant 0 : index
      %c0_111 = arith.constant 0 : index
      %339 = vector.load %arg12[%c0_110, %c0_111] : memref<8x128xf32, #tpu.memory_space<vmem>>, vector<8x128xf32>
      %c0_112 = arith.constant 0 : index
      %c0_113 = arith.constant 0 : index
      %340 = vector.load %arg9[%c0_112, %c0_113] : memref<8x128xf32, #tpu.memory_space<vmem>>, vector<8x128xf32>
      tpu.vector_store %arg9[%c0_112, %c0_113], %339 {strides = array<i32>} : memref<8x128xf32, #tpu.memory_space<vmem>>, vector<8x128xf32>,
      %c0_114 = arith.constant 0 : index
      %c0_115 = arith.constant 0 : index
      %341 = vector.load %arg13[%c0_114, %c0_115] : memref<8x128xf32, #tpu.memory_space<vmem>>, vector<8x128xf32>
      %c0_116 = arith.constant 0 : index
      %c0_117 = arith.constant 0 : index
      %342 = vector.load %arg10[%c0_116, %c0_117] : memref<8x128xf32, #tpu.memory_space<vmem>>, vector<8x128xf32>
      tpu.vector_store %arg10[%c0_116, %c0_117], %341 {strides = array<i32>} : memref<8x128xf32, #tpu.memory_space<vmem>>, vector<8x128xf32>,
    } else {
    }
    return
  }
  func.func @transform_0(%arg0: i32, %arg1: i32) -> (i32, i32, i32) {
    %c0_i32 = arith.constant 0 : i32
    %c0_i32_0 = arith.constant 0 : i32
    return %arg1, %arg0, %c0_i32 : i32, i32, i32
  }
  func.func @transform_1(%arg0: i32, %arg1: i32) -> (i32, i32) {
    %c0_i32 = arith.constant 0 : i32
    %c0_i32_0 = arith.constant 0 : i32
    %c0_i32_1 = arith.constant 0 : i32
    return %c0_i32, %c0_i32_0 : i32, i32
  }
  func.func @transform_2(%arg0: i32, %arg1: i32) -> (i32, i32) {
    %c0_i32 = arith.constant 0 : i32
    %c0_i32_0 = arith.constant 0 : i32
    %c0_i32_1 = arith.constant 0 : i32
    return %c0_i32, %c0_i32_0 : i32, i32
  }
  func.func @transform_3(%arg0: i32, %arg1: i32) -> (i32, i32) {
    %c0_i32 = arith.constant 0 : i32
    %c0_i32_0 = arith.constant 0 : i32
    %c0_i32_1 = arith.constant 0 : i32
    return %c0_i32, %c0_i32_0 : i32, i32
  }
  func.func @transform_4(%arg0: i32, %arg1: i32) -> (i32, i32) {
    %c0_i32 = arith.constant 0 : i32
    %c0_i32_0 = arith.constant 0 : i32
    return %arg0, %c0_i32 : i32, i32
  }
  func.func @transform_5(%arg0: i32, %arg1: i32) -> (i32, i32) {
    %c0_i32 = arith.constant 0 : i32
    %c0_i32_0 = arith.constant 0 : i32
    return %arg0, %c0_i32 : i32, i32
  }
  func.func @transform_6(%arg0: i32, %arg1: i32) -> (i32, i32, i32) {
    %c0_i32 = arith.constant 0 : i32
    %c0_i32_0 = arith.constant 0 : i32
    return %arg1, %arg0, %c0_i32 : i32, i32, i32
  }
  func.func @transform_7(%arg0: i32, %arg1: i32) -> (i32, i32) {
    %c0_i32 = arith.constant 0 : i32
    %c0_i32_0 = arith.constant 0 : i32
    return %arg0, %c0_i32 : i32, i32
  }
  func.func @transform_8(%arg0: i32, %arg1: i32) -> (i32, i32) {
    %c0_i32 = arith.constant 0 : i32
    %c0_i32_0 = arith.constant 0 : i32
    return %arg0, %c0_i32 : i32, i32
  }
}

</mosaic_0001>

<bundles_post_ra>
// kernel: tpu_custom_call.1
= control target key start
LH: loop header
LB: loop body
LE: loop exit
PB: predicated region body
PF: predicated region fallthrough
CT: control target
= control target key end

     0   :  { %14 = vsyncpa [#allocation6], 0  ;;  %s2719_s0 = inlined_call_operand.hbm [shape: bf16[8,8,8], index: 0, kind: input, shape index: {}]   ;;  %s2720_s1 = inlined_call_operand.hbm [shape: bf16[8,512], index: 1, kind: input, shape index: {}]   ;;  %s2721_s2 = inlined_call_operand.hbm [shape: f32[1,512], index: 2, kind: input, shape index: {}]   ;;  %s2722_s3 = inlined_call_operand.hbm [shape: bf16[128,512], index: 3, kind: input, shape index: {}]   ;;  %s2723_s4 = inlined_call_operand.vmem [shape: f32[8,128], index: 4, kind: input, shape index: {}]   ;;  %s2724_s5 = inlined_call_operand.vmem [shape: f32[8,128], index: 5, kind: input, shape index: {}]   ;;  %s2725_s6 = inlined_call_operand.hbm [shape: bf16[8,8,128], index: 6, kind: output, shape index: {0}]   ;;  %s2726_s7 = inlined_call_operand.hbm [shape: f32[8,128], index: 7, kind: output, shape index: {1}]   ;;  %s2727_s8 = inlined_call_operand.hbm [shape: f32[8,128], index: 8, kind: output, shape index: {2}]  }
   0x1   :  { %15 = vsyncpa [#allocation9], 0 }
   0x2   :  { %16 = vsyncpa [#allocation12], 0 }
   0x3   :  { %17 = vsyncpa [#allocation7], 0 }
   0x4   :  { %18 = vsyncpa [#allocation15], 0  ;;  %s1988_s27 = smov [#allocation8]   ;;  %s1989_s29 = smov [#allocation5]  }
   0x5   :  { %s37_s28 = sshll.u32 %s1988_s27, 4  ;;  %s24_s30 = sshll.u32 %s1989_s29, 4  ;;  %s38_s28 = int_to_ptr.vmem [resolvable:$true] %s37_s28  ;;  %s2045_s30 = int_to_ptr.vmem [resolvable:$true] %s24_s30 }
   0x6   :  { %s1824_s11 = scalar_lea.hbm %s2720_s1, 256 }
   0x7   :  { %p1825_p0 = scmp.ne.s32.totalorder %s2720_s1, %s1824_s11  ;;  %p1828_p1 = scmp.lt.u32.totalorder %s1824_s11, %s2720_s1 }
   0x9   :  { %p1830_p2 = pnand %p1828_p1, %p1825_p0 }
   0xb   :  { %1833 = shalt.err (!%p1830_p2)
}
   0xc   :  { %s1834_s16 = scalar_lea.vmem %s38_s28, 256  ;;  %p1839_p4 = scmp.lt.s32.totalorder %s38_s28, %s38_s28 }
   0xd   :  { %p1835_p3 = scmp.ne.s32.totalorder %s38_s28, %s1834_s16  ;;  %p1840_p5 = scmp.lt.s32.totalorder %s1834_s16, %s1834_s16 }
   0xf   :  { %p1841_p6 = por %p1840_p5, %p1839_p4 }
  0x11   :  { %p1842_p7 = pnand %p1841_p6, %p1835_p3 }
  0x13   :  { %1845 = shalt.err (!%p1842_p7)
}
  0x14   :  { %40 = dma.hbm_to_vmem [thread:$0]  %s2720_s1, 256, %s38_s28, [#allocation9]  }
  0x15   :  { %s1846_s21 = scalar_lea.hbm %s2719_s0, 512 }
  0x16   :  { %p1847_p8 = scmp.ne.s32.totalorder %s2719_s0, %s1846_s21  ;;  %p1850_p9 = scmp.lt.u32.totalorder %s1846_s21, %s2719_s0 }
  0x18   :  { %p1852_p10 = pnand %p1850_p9, %p1847_p8 }
  0x1a   :  { %1855 = shalt.err (!%p1852_p10)
}
  0x1b   :  { %s1856_s26 = scalar_lea.vmem %s2045_s30, 512  ;;  %p1861_p12 = scmp.lt.s32.totalorder %s2045_s30, %s2045_s30 }
  0x1c   :  { %p1857_p11 = scmp.ne.s32.totalorder %s2045_s30, %s1856_s26  ;;  %p1862_p13 = scmp.lt.s32.totalorder %s1856_s26, %s1856_s26 }
  0x1e   :  { %p1863_p0 = por %p1862_p13, %p1861_p12 }
  0x20   :  { %p1864_p1 = pnand %p1863_p0, %p1857_p11 }
  0x22   :  { %1867 = shalt.err (!%p1864_p1)
}
  0x23   :  { %s1990_s1 = smov 64   ;;  %s1991_s27 = smov 4  }
  0x24   :  { %30 = dma.hbm_to_vmem [thread:$0]  %s2719_s0, 512, %s2045_s30, [#allocation6], %s1990_s1, %s1990_s1, %s1991_s27  }
  0x25   :  { %s1992_s9 = smov [#allocation10]   ;;  %s1993_s11 = smov [#allocation11]  }
  0x26   :  { %s47_s10 = sshll.u32 %s1992_s9, 4  ;;  %s56_s12 = sshll.u32 %s1993_s11, 4  ;;  %s48_s10 = int_to_ptr.vmem [resolvable:$true] %s47_s10  ;;  %s2079_s12 = int_to_ptr.vmem [resolvable:$true] %s56_s12 }
  0x27   :  { %s1868_s15 = scalar_lea.hbm %s2721_s2, 64 }
  0x28   :  { %p1869_p2 = scmp.ne.s32.totalorder %s2721_s2, %s1868_s15  ;;  %p1872_p3 = scmp.lt.u32.totalorder %s1868_s15, %s2721_s2 }
  0x2a   :  { %p1874_p4 = pnand %p1872_p3, %p1869_p2 }
  0x2c   :  { %1877 = shalt.err (!%p1874_p4)
}
  0x2d   :  { %s1878_s0 = scalar_lea.vmem %s48_s10, 64  ;;  %p1883_p6 = scmp.lt.s32.totalorder %s48_s10, %s48_s10 }
  0x2e   :  { %p1879_p5 = scmp.ne.s32.totalorder %s48_s10, %s1878_s0  ;;  %p1884_p7 = scmp.lt.s32.totalorder %s1878_s0, %s1878_s0 }
  0x30   :  { %p1885_p8 = por %p1884_p7, %p1883_p6 }
  0x32   :  { %p1886_p9 = pnand %p1885_p8, %p1879_p5 }
  0x34   :  { %1889 = shalt.err (!%p1886_p9)
}
  0x35   :  { %50 = dma.hbm_to_vmem [thread:$0]  %s2721_s2, 64, %s48_s10, [#allocation9]  }
  0x36   :  { %s1890_s23 = scalar_lea.hbm %s2722_s3, 4096 }
  0x37   :  { %p1891_p10 = scmp.ne.s32.totalorder %s2722_s3, %s1890_s23  ;;  %p1894_p11 = scmp.lt.u32.totalorder %s1890_s23, %s2722_s3 }
  0x39   :  { %p1896_p12 = pnand %p1894_p11, %p1891_p10 }
  0x3b   :  { %1899 = shalt.err (!%p1896_p12)
}
  0x3c   :  { %s1900_s29 = scalar_lea.vmem %s2079_s12, 4096  ;;  %p1905_p0 = scmp.lt.s32.totalorder %s2079_s12, %s2079_s12 }
  0x3d   :  { %p1901_p13 = scmp.ne.s32.totalorder %s2079_s12, %s1900_s29  ;;  %p1906_p1 = scmp.lt.s32.totalorder %s1900_s29, %s1900_s29 }
  0x3f   :  { %p1907_p2 = por %p1906_p1, %p1905_p0 }
  0x41   :  { %p1908_p3 = pnand %p1907_p2, %p1901_p13 }
  0x43   :  { %1911 = shalt.err (!%p1908_p3)
}
  0x44   :  { %s1994_s2 = smov 256   ;;  %s1995_s9 = smov 16  }
  0x45   :  { %62 = dma.hbm_to_vmem [thread:$0]  %s2722_s3, 4096, %s2079_s12, [#allocation12], %s1994_s2, %s1994_s2, %s1995_s9  }
  0x46   :  { %1978 = dma.done.wait [#allocation6], 512  }
  0x47   :  { %1979 = vsyncadd [#allocation6], 4294966784 }
  0x48   :  { %1980 = dma.done.wait [#allocation9], 320  }
  0x49   :  { %1981 = vsyncadd [#allocation9], 4294966976 }
  0x4a   :  { %1982 = dma.done.wait [#allocation12], 4096  }
  0x4b   :  { %1983 = vsyncadd [#allocation12], 4294963200  ;;  %v2728_v0 = vmov 0   ;;  %v96_v1 = vld [vmem:[#allocation8] sm:$0xff]  ;;  %vm163_vm0 = vcmask 1043456   ;;  %v97_v2 = vld [vmem:[#allocation8 + $0x8] sm:$0xff]  ;;  %v100_v47 = vlaneseq }
  0x4c   :  { %208 = vmatprep.mubr.bf16.mxu0 %v2728_v0  ;;  %281 = vmatprep.mubr.bf16.mxu1 %v2728_v0  ;;  %v1551_v3 = vcombine.high %v96_v1, %v96_v1  ;;  %v1553_v4 = vcombine.high %v97_v2, %v97_v2  ;;  %v1550_v5 = vcombine.low %v96_v1, %v96_v1  ;;  %v1612_v7 = vld [vmem:[#allocation5] sm:$0xff]   ;;  %v2112_v8 = vld [vmem:[#allocation11 + $0x4] ss:$16 sps:$4 sm:$0xff]   ;;  %vm150_vm1 = vcmask 64512   ;;  %v2118_v13 = vld [vmem:[#allocation11 + $0x8] ss:$16 sps:$4 sm:$0xff]  }
  0x4d   :  { %v1552_v6 = vcombine.low %v97_v2, %v97_v2  ;;  %v2114_v11 = vld [vmem:[#allocation11 + $0xc] ss:$16 sps:$4 sm:$0xff]   ;;  %v2116_v12 = vld [vmem:[#allocation11] ss:$16 sps:$4 sm:$0xff]   ;;  %v2122_v14 = vld [vmem:[#allocation11 + $0x24] ss:$16 sps:$4 sm:$0xff]  }
  0x4e   :  { %1554 = vmatprep.subr.msk.bf16.mxu0 %vm163_vm0, %v1551_v3  ;;  %1559 = vmatprep.subr.msk.bf16.mxu1 %vm163_vm0, %v1553_v4  ;;  %v165_v9 = vsel %vm163_vm0, %v1550_v5, 0  ;;  %v2124_v15 = vld [vmem:[#allocation11 + $0x2c] ss:$16 sps:$4 sm:$0xff]   ;;  %v2126_v16 = vld [vmem:[#allocation11 + $0x20] ss:$16 sps:$4 sm:$0xff]   ;;  %v1625_v20 = vld [vmem:[#allocation5 + $0x8] sm:$0xff]  }
  0x4f   :  { %v171_v10 = vsel %vm163_vm0, %v1552_v6, 0  ;;  %177 = vmatpush1.bf16.msra.mxu0 %v165_v9  ;;  %v2130_v17 = vld [vmem:[#allocation11 + $0x28] ss:$16 sps:$4 sm:$0xff]   ;;  %v2134_v18 = vld [vmem:[#allocation11 + $0x44] ss:$16 sps:$4 sm:$0xff]   ;;  %v1638_v29 = vld [vmem:[#allocation5 + $0x10] sm:$0xff]  }
  0x50   :  { %250 = vmatpush1.bf16.msra.mxu1 %v171_v10  ;;  %556 = vmatprep.subr.bf16.mxu0 %v2112_v8  ;;  %v2138_v19 = vld [vmem:[#allocation11 + $0x4c] ss:$16 sps:$4 sm:$0xff]   ;;  %v2142_v21 = vld [vmem:[#allocation11 + $0x40] ss:$16 sps:$4 sm:$0xff]   ;;  %v2146_v22 = vld [vmem:[#allocation11 + $0x48] ss:$16 sps:$4 sm:$0xff]  }
  0x51   :  { %597 = vmatprep.subr.bf16.mxu1 %v2114_v11  ;;  %v2148_v23 = vld [vmem:[#allocation11 + $0x64] ss:$16 sps:$4 sm:$0xff]   ;;  %v2152_v24 = vld [vmem:[#allocation11 + $0x6c] ss:$16 sps:$4 sm:$0xff]   ;;  %v2158_v25 = vld [vmem:[#allocation11 + $0x60] ss:$16 sps:$4 sm:$0xff]  }
  0x52   :  { %1555 = vmatmul.mubr.msk.bf16.vlgmr.msra.gmra.mrb[0].mxu0 %vm150_vm1, %v1612_v7  ;;  %v2160_v26 = vld [vmem:[#allocation11 + $0x68] ss:$16 sps:$4 sm:$0xff]   ;;  %v2162_v27 = vld [vmem:[#allocation11 + $0x84] ss:$16 sps:$4 sm:$0xff]   ;;  %v2166_v28 = vld [vmem:[#allocation11 + $0x8c] ss:$16 sps:$4 sm:$0xff]  }
  0x53   :  { %1560 = vmatmul.mubr.msk.bf16.vlgmr.msra.gmra.mrb[0].mxu1 %vm150_vm1, %v1612_v7  ;;  %557 = vmatpush1.bf16.msra.mxu0 %v2116_v12  ;;  %v2170_v30 = vld [vmem:[#allocation11 + $0x80] ss:$16 sps:$4 sm:$0xff]   ;;  %v2172_v31 = vld [vmem:[#allocation11 + $0x88] ss:$16 sps:$4 sm:$0xff]   ;;  %v2176_v32 = vld [vmem:[#allocation11 + $0xa4] ss:$16 sps:$4 sm:$0xff]  }
  0x54   :  { %598 = vmatpush1.bf16.msra.mxu1 %v2118_v13  ;;  %558 = vmatprep.subr.bf16.mxu0 %v2122_v14  ;;  %v2180_v33 = vld [vmem:[#allocation11 + $0xac] ss:$16 sps:$4 sm:$0xff]   ;;  %v2184_v34 = vld [vmem:[#allocation11 + $0xa0] ss:$16 sps:$4 sm:$0xff]   ;;  %v2188_v35 = vld [vmem:[#allocation11 + $0xa8] ss:$16 sps:$4 sm:$0xff]  }
  0x55   :  { %599 = vmatprep.subr.bf16.mxu1 %v2124_v15  ;;  %218 = vmatprep.mubr.bf16.mxu0 %v2728_v0  ;;  %v2192_v36 = vld [vmem:[#allocation11 + $0xc4] ss:$16 sps:$4 sm:$0xff]   ;;  %v2194_v37 = vld [vmem:[#allocation11 + $0xcc] ss:$16 sps:$4 sm:$0xff]   ;;  %v2200_v39 = vld [vmem:[#allocation11 + $0xc0] ss:$16 sps:$4 sm:$0xff]  }
  0x56   :  { %291 = vmatprep.mubr.bf16.mxu1 %v2728_v0  ;;  %v1651_v38 = vld [vmem:[#allocation5 + $0x18] sm:$0xff]   ;;  %v2208_v42 = vld [vmem:[#allocation11 + $0xec] ss:$16 sps:$4 sm:$0xff]   ;;  %v2214_v43 = vld [vmem:[#allocation11 + $0xe0] ss:$16 sps:$4 sm:$0xff]   ;;  %v101_v48 = vshrl.u32 %v100_v47, 7 }
  0x57   :  { %559 = vmatpush1.bf16.msra.mxu0 %v2126_v16  ;;  %v2202_v40 = vld [vmem:[#allocation11 + $0xc8] ss:$16 sps:$4 sm:$0xff]   ;;  %v2206_v41 = vld [vmem:[#allocation11 + $0xe4] ss:$16 sps:$4 sm:$0xff]   ;;  %v84_v45 = vld [vmem:[%s2723_s4] sm:$0xff]  ;;  %s1998_s15 = smov [#allocation16]  }
  0x58   :  { %600 = vmatpush1.bf16.msra.mxu1 %v2130_v17  ;;  %560 = vmatprep.subr.bf16.mxu0 %v2134_v18  ;;  %v2216_v44 = vld [vmem:[#allocation11 + $0xe8] ss:$16 sps:$4 sm:$0xff]   ;;  %v395_v46 = vpack.c.bf16 %v84_v45, %v84_v45  ;;  %v110_v49 = vsub.s32 2, %v101_v48  ;;  %v114_v50 = vsub.s32 3, %v101_v48  ;;  %v102_v51 = vsub.s32 0, %v101_v48  ;;  %s1521_s16 = sshll.u32 %s1998_s15, 4  ;;  %s2666_s16 = int_to_ptr.vmem [resolvable:$true] %s1521_s16 }
  0x59   :  { %601 = vmatprep.subr.bf16.mxu1 %v2138_v19  ;;  %v98_v52 = vld [vmem:[#allocation10] sm:$0xf]  ;;  %v106_v53 = vsub.s32 1, %v101_v48  ;;  %s1999_s17 = smov [#allocation13]  }
  0x5a   :  { %1556 = vmatmul.mubr.msk.bf16.gmra.mrb[4].mxu0 %vm150_vm1, %v1625_v20  ;;  %v2263_v54 = vrot.slane %v98_v52, %v110_v49  ;;  %v2269_v57 = vrot.slane %v98_v52, %v114_v50  ;;  %v103_v58 = vrot.slane %v98_v52, %v102_v51  ;;  %s1498_s18 = sshll.u32 %s1999_s17, 4  ;;  %s2668_s18 = int_to_ptr.vmem [resolvable:$true] %s1498_s18 }
  0x5b   :  { %1561 = vmatmul.mubr.msk.bf16.gmra.mrb[4].mxu1 %vm150_vm1, %v1625_v20  ;;  %561 = vmatpush1.bf16.msra.mxu0 %v2142_v21  ;;  %v107_v61 = vrot.slane %v98_v52, %v106_v53 }
  0x5c   :  { %602 = vmatpush1.bf16.msra.mxu1 %v2146_v22  ;;  %562 = vmatprep.subr.bf16.mxu0 %v2148_v23 }
  0x5d   :  { %603 = vmatprep.subr.bf16.mxu1 %v2152_v24  ;;  %228 = vmatprep.mubr.bf16.mxu0 %v2728_v0 }
  0x5e   :  { %301 = vmatprep.mubr.bf16.mxu1 %v2728_v0 }
  0x5f   :  { %563 = vmatpush1.bf16.msra.mxu0 %v2158_v25 }
  0x60   :  { %604 = vmatpush1.bf16.msra.mxu1 %v2160_v26  ;;  %564 = vmatprep.subr.bf16.mxu0 %v2162_v27 }
  0x61   :  { %605 = vmatprep.subr.bf16.mxu1 %v2166_v28 }
  0x62   :  { %1557 = vmatmul.mubr.msk.bf16.gmra.mrb[8].mxu0 %vm150_vm1, %v1638_v29 }
  0x63   :  { %1562 = vmatmul.mubr.msk.bf16.gmra.mrb[8].mxu1 %vm150_vm1, %v1638_v29  ;;  %565 = vmatpush1.bf16.msra.mxu0 %v2170_v30 }
  0x64   :  { %606 = vmatpush1.bf16.msra.mxu1 %v2172_v31  ;;  %566 = vmatprep.subr.bf16.mxu0 %v2176_v32 }
  0x65   :  { %607 = vmatprep.subr.bf16.mxu1 %v2180_v33  ;;  %238 = vmatprep.mubr.bf16.mxu0 %v2728_v0 }
  0x66   :  { %311 = vmatprep.mubr.bf16.mxu1 %v2728_v0 }
  0x67   :  { %567 = vmatpush1.bf16.msra.mxu0 %v2184_v34 }
  0x68   :  { %608 = vmatpush1.bf16.msra.mxu1 %v2188_v35  ;;  %568 = vmatprep.subr.bf16.mxu0 %v2192_v36 }
  0x69   :  { %609 = vmatprep.subr.bf16.mxu1 %v2194_v37 }
  0x6a   :  { %1558 = vmatmul.mubr.msk.bf16.gmra.mrb[12].mxu0 %vm150_vm1, %v1651_v38 }
  0x6b   :  { %1563 = vmatmul.mubr.msk.bf16.gmra.mrb[12].mxu1 %vm150_vm1, %v1651_v38  ;;  %569 = vmatpush1.bf16.msra.mxu0 %v2200_v39 }
  0x6c   :  { %610 = vmatpush1.bf16.msra.mxu1 %v2202_v40  ;;  %570 = vmatprep.subr.bf16.mxu0 %v2206_v41 }
  0x6d   :  { %611 = vmatprep.subr.bf16.mxu1 %v2208_v42  ;;  %588 = vmatprep.mubr.bf16.mxu0 %v2728_v0 }
  0x6e   :  { %629 = vmatprep.mubr.bf16.mxu1 %v2728_v0 }
  0x6f   :  { %571 = vmatpush1.bf16.msra.mxu0 %v2214_v43 }
  0x70   :  { %612 = vmatpush1.bf16.msra.mxu1 %v2216_v44  ;;  %672 = vmatprep.subr.bf16.mxu0 %v2112_v8 }
  0x71   :  { %713 = vmatprep.subr.bf16.mxu1 %v2114_v11 }
  0x72   :  { %589 = vmatmul.mubr.bf16.vlgmr.msra.gmra.mrb[16].mxu0 %v395_v46 }
  0x73   :  { %630 = vmatmul.mubr.bf16.vlgmr.msra.gmra.mrb[16].mxu1 %v395_v46  ;;  %673 = vmatpush1.bf16.msra.mxu0 %v2116_v12 }
  0x74   :  { %714 = vmatpush1.bf16.msra.mxu1 %v2118_v13  ;;  %674 = vmatprep.subr.bf16.mxu0 %v2122_v14 }
  0x75   :  { %715 = vmatprep.subr.bf16.mxu1 %v2124_v15  ;;  %704 = vmatprep.mubr.bf16.mxu0 %v2728_v0 }
  0x76   :  { %745 = vmatprep.mubr.bf16.mxu1 %v2728_v0 }
  0x77   :  { %675 = vmatpush1.bf16.msra.mxu0 %v2126_v16 }
  0x78   :  { %716 = vmatpush1.bf16.msra.mxu1 %v2130_v17  ;;  %676 = vmatprep.subr.bf16.mxu0 %v2134_v18 }
  0x79   :  { %717 = vmatprep.subr.bf16.mxu1 %v2138_v19 }
  0x7b   :  { %677 = vmatpush1.bf16.msra.mxu0 %v2142_v21 }
  0x7c   :  { %718 = vmatpush1.bf16.msra.mxu1 %v2146_v22  ;;  %678 = vmatprep.subr.bf16.mxu0 %v2148_v23 }
  0x7d   :  { %719 = vmatprep.subr.bf16.mxu1 %v2152_v24 }
  0x7f   :  { %679 = vmatpush1.bf16.msra.mxu0 %v2158_v25 }
  0x80   :  { %720 = vmatpush1.bf16.msra.mxu1 %v2160_v26  ;;  %680 = vmatprep.subr.bf16.mxu0 %v2162_v27 }
  0x81   :  { %721 = vmatprep.subr.bf16.mxu1 %v2166_v28 }
  0x83   :  { %681 = vmatpush1.bf16.msra.mxu0 %v2170_v30 }
  0x84   :  { %722 = vmatpush1.bf16.msra.mxu1 %v2172_v31  ;;  %682 = vmatprep.subr.bf16.mxu0 %v2176_v32 }
  0x85   :  { %723 = vmatprep.subr.bf16.mxu1 %v2180_v33 }
  0x87   :  { %683 = vmatpush1.bf16.msra.mxu0 %v2184_v34 }
  0x88   :  { %724 = vmatpush1.bf16.msra.mxu1 %v2188_v35  ;;  %684 = vmatprep.subr.bf16.mxu0 %v2192_v36 }
  0x89   :  { %725 = vmatprep.subr.bf16.mxu1 %v2194_v37 }
  0x8b   :  { %685 = vmatpush1.bf16.msra.mxu0 %v2200_v39 }
  0x8c   :  { %726 = vmatpush1.bf16.msra.mxu1 %v2202_v40  ;;  %686 = vmatprep.subr.bf16.mxu0 %v2206_v41 }
  0x8d   :  { %727 = vmatprep.subr.bf16.mxu1 %v2208_v42 }
  0x8f   :  { %687 = vmatpush1.bf16.msra.mxu0 %v2214_v43 }
  0x90   :  { %728 = vmatpush1.bf16.msra.mxu1 %v2216_v44  ;;  %789 = vmatprep.subr.bf16.mxu0 %v2112_v8 }
  0x91   :  { %830 = vmatprep.subr.bf16.mxu1 %v2114_v11 }
 0x125   :  { %v2265_v55 = vpop.f32.mrb[0].mxu0 }
 0x126   :  { %v2267_v56 = vpop.f32.mrb[0].mxu1  ;;  %v212_v59 = vpop.f32.mrb[1].mxu0 }
 0x127   :  { %v285_v60 = vpop.f32.mrb[1].mxu1  ;;  %v214_v62 = vpop.f32.mrb[2].mxu0 }
 0x128   :  { %v287_v63 = vpop.f32.mrb[2].mxu1  ;;  %v2271_v1 = vadd.f32 %v214_v62, %v103_v58  ;;  %v216_v2 = vpop.f32.mrb[3].mxu0 }
 0x129   :  { %v2274_v3 = vadd.f32 %v287_v63, %v2263_v54  ;;  %v289_v4 = vpop.f32.mrb[3].mxu1  ;;  %v2276_v5 = vadd.f32 %v216_v2, %v107_v61 }
 0x12a   :  { %v2279_v6 = vadd.f32 %v289_v4, %v2269_v57 }
 0x12d   :  { %v220_v7 = vpop.f32.mrb[4].mxu0 }
 0x12e   :  { %v293_v9 = vpop.f32.mrb[4].mxu1  ;;  %v2281_v10 = vadd.f32 %v220_v7, %v103_v58  ;;  %v222_v20 = vpop.f32.mrb[5].mxu0 }
 0x12f   :  { %v2284_v29 = vadd.f32 %v293_v9, %v2263_v54  ;;  %v295_v38 = vpop.f32.mrb[5].mxu1  ;;  %v2286_v45 = vadd.f32 %v222_v20, %v107_v61  ;;  %v224_v46 = vpop.f32.mrb[6].mxu0 }
 0x130   :  { %v2289_v47 = vadd.f32 %v295_v38, %v2269_v57  ;;  %v297_v48 = vpop.f32.mrb[6].mxu1  ;;  %v2291_v49 = vadd.f32 %v224_v46, %v103_v58  ;;  %v226_v50 = vpop.f32.mrb[7].mxu0 }
 0x131   :  { %2730 = vst [vmem:[#allocation22_spill] sm:$0xff] %v2286_v45  ;;  %v2294_v51 = vadd.f32 %v297_v48, %v2263_v54  ;;  %v299_v52 = vpop.f32.mrb[7].mxu1  ;;  %v2296_v53 = vadd.f32 %v226_v50, %v107_v61 }
 0x132   :  { %2731 = vst [vmem:[#allocation23_spill] sm:$0xff] %v2289_v47  ;;  %2732 = vst [vmem:[#allocation24_spill] sm:$0xff] %v2291_v49  ;;  %v2299_v62 = vadd.f32 %v299_v52, %v2269_v57 }
 0x133   :  { %2733 = vst [vmem:[#allocation25_spill] sm:$0xff] %v2294_v51  ;;  %2734 = vst [vmem:[#allocation26_spill] sm:$0xff] %v2296_v53 }
 0x134   :  { %2735 = vst [vmem:[#allocation27_spill] sm:$0xff] %v2299_v62 }
 0x135   :  { %v230_v63 = vpop.f32.mrb[8].mxu0 }
 0x136   :  { %v303_v2 = vpop.f32.mrb[8].mxu1  ;;  %v2301_v4 = vadd.f32 %v230_v63, %v103_v58  ;;  %v232_v7 = vpop.f32.mrb[9].mxu0 }
 0x137   :  { %v2304_v9 = vadd.f32 %v303_v2, %v2263_v54  ;;  %v305_v20 = vpop.f32.mrb[9].mxu1  ;;  %v2306_v38 = vadd.f32 %v232_v7, %v107_v61  ;;  %v234_v46 = vpop.f32.mrb[10].mxu0 }
 0x138   :  { %2736 = vst [vmem:[#allocation28_spill] sm:$0xff] %v2301_v4  ;;  %v2309_v48 = vadd.f32 %v305_v20, %v2269_v57  ;;  %v307_v50 = vpop.f32.mrb[10].mxu1  ;;  %v2311_v0 = vadd.f32 %v234_v46, %v103_v58  ;;  %v236_v52 = vpop.f32.mrb[11].mxu0 }
 0x139   :  { %2737 = vst [vmem:[#allocation29_spill] sm:$0xff] %v2304_v9  ;;  %2738 = vst [vmem:[#allocation30_spill] sm:$0xff] %v2306_v38  ;;  %v2314_v62 = vadd.f32 %v307_v50, %v2263_v54  ;;  %v309_v63 = vpop.f32.mrb[11].mxu1  ;;  %v2316_v4 = vadd.f32 %v236_v52, %v107_v61 }
 0x13a   :  { %2739 = vst [vmem:[#allocation31_spill] sm:$0xff] %v2309_v48  ;;  %2740 = vst [vmem:[#allocation32_spill] sm:$0xff] %v2311_v0  ;;  %v2319_v2 = vadd.f32 %v309_v63, %v2269_v57 }
 0x13b   :  { %2741 = vst [vmem:[#allocation33_spill] sm:$0xff] %v2314_v62  ;;  %2742 = vst [vmem:[#allocation34_spill] sm:$0xff] %v2316_v4 }
 0x13c   :  { %2743 = vst [vmem:[#allocation35_spill] sm:$0xff] %v2319_v2 }
 0x13d   :  { %v240_v9 = vpop.f32.mrb[12].mxu0 }
 0x13e   :  { %v313_v7 = vpop.f32.mrb[12].mxu1  ;;  %v2321_v38 = vadd.f32 %v240_v9, %v103_v58  ;;  %v242_v53 = vpop.f32.mrb[13].mxu0 }
 0x13f   :  { %v2324_v20 = vadd.f32 %v313_v7, %v2263_v54  ;;  %v315_v46 = vpop.f32.mrb[13].mxu1  ;;  %v2326_v0 = vadd.f32 %v242_v53, %v107_v61  ;;  %v244_v48 = vpop.f32.mrb[14].mxu0  ;;  %v211_v53 = vadd.f32 %v2265_v55, %v103_v58 }
 0x140   :  { %2744 = vst [vmem:[#allocation36_spill] sm:$0xff] %v2321_v38  ;;  %v2329_v50 = vadd.f32 %v315_v46, %v2269_v57  ;;  %v317_v52 = vpop.f32.mrb[14].mxu1  ;;  %v2331_v4 = vadd.f32 %v244_v48, %v103_v58  ;;  %v246_v63 = vpop.f32.mrb[15].mxu0  ;;  %v213_v46 = vadd.f32 %v212_v59, %v107_v61 }
 0x141   :  { %2745 = vst [vmem:[#allocation37_spill] sm:$0xff] %v2324_v20  ;;  %2746 = vst [vmem:[#allocation38_spill] sm:$0xff] %v2326_v0  ;;  %v2334_v2 = vadd.f32 %v317_v52, %v2263_v54  ;;  %v319_v9 = vpop.f32.mrb[15].mxu1  ;;  %v2336_v38 = vadd.f32 %v246_v63, %v107_v61  ;;  %v284_v0 = vadd.f32 %v2267_v56, %v2263_v54 }
 0x142   :  { %2747 = vst [vmem:[#allocation39_spill] sm:$0xff] %v2329_v50  ;;  %2748 = vst [vmem:[#allocation40_spill] sm:$0xff] %v2331_v4  ;;  %v2339_v7 = vadd.f32 %v319_v9, %v2269_v57  ;;  %v286_v50 = vadd.f32 %v285_v60, %v2269_v57 }
 0x143   :  { %2749 = vst [vmem:[#allocation41_spill] sm:$0xff] %v2334_v2  ;;  %2750 = vst [vmem:[#allocation42_spill] sm:$0xff] %v2336_v38 }
 0x144   :  { %2751 = vst [vmem:[#allocation43_spill] sm:$0xff] %v2339_v7 }
 0x145   :  { %v590_v48 = vpop.f32.mrb[16].mxu0 }
 0x146   :  { %v631_v4 = vpop.f32.mrb[16].mxu1  ;;  %v638_v20 = vadd.f32 %v590_v48, %v211_v53  ;;  %v592_v52 = vpop.f32.mrb[17].mxu0 }
 0x147   :  { %v640_v62 = vadd.f32 %v631_v4, %v284_v0  ;;  %v633_v2 = vpop.f32.mrb[17].mxu1  ;;  %v639_v51 = vadd.f32 %v592_v52, %v213_v46  ;;  %v594_v38 = vpop.f32.mrb[18].mxu0  ;;  %v2752_v46 = vmov 0  }
 0x148   :  { %v641_v63 = vadd.f32 %v633_v2, %v286_v50  ;;  %v635_v49 = vpop.f32.mrb[18].mxu1  ;;  %v642_v9 = vsub.f32 0.0, %v638_v20  ;;  %v595_v7 = vpop.f32.mrb[19].mxu0 }
 0x149   :  { %v636_v47 = vpop.f32.mrb[19].mxu1  ;;  %v647_v55 = vsub.f32 0.0, %v639_v51 }
 0x14a   :  { %v643_v58 = vmul.f32 1.442695, %v642_v9  ;;  %v653_v54 = vsub.f32 0.0, %v641_v63  ;;  %v86_v47 = vld [vmem:[%s2724_s5] sm:$0xff]  ;;  %s1997_s5 = smov [#allocation14]  }
 0x14b   :  { %v648_v45 = vmul.f32 1.442695, %v647_v55  ;;  %s1511_s14 = sshll.u32 %s1997_s5, 4  ;;  %s1512_s14 = int_to_ptr.vmem [resolvable:$true] %s1511_s14 }
 0x14c   :  { %1664 = vpow2.f32 %v643_v58  ;;  %v654_v56 = vmul.f32 1.442695, %v653_v54  ;;  %s1912_s19 = scalar_lea.vmem %s1512_s14, 128  ;;  %p1917_p5 = scmp.lt.s32.totalorder %s1512_s14, %s1512_s14 }
 0x14d   :  { %1666 = vpow2.f32 %v648_v45  ;;  %p1913_p4 = scmp.ne.s32.totalorder %s1512_s14, %s1912_s19  ;;  %p1918_p6 = scmp.lt.s32.totalorder %s1912_s19, %s1912_s19 }
 0x14e   :  { %1668 = vpow2.f32 %v654_v56 }
 0x14f   :  { %1670 = vtanh.f32 %v640_v62  ;;  %p1919_p7 = por %p1918_p6, %p1917_p5 }
 0x151   :  { %p1920_p8 = pnand %p1919_p7, %p1913_p4 }
 0x156   :  { %v1665_v57 = vpop.eup %1664 }
 0x157   :  { %v1667_v59 = vpop.eup %1666  ;;  %v645_v60 = vadd.f32 1.0, %v1665_v57 }
 0x158   :  { %v650_v0 = vadd.f32 1.0, %v1667_v59  ;;  %v1669_v61 = vpop.eup %1668 }
 0x159   :  { %1672 = vrcp.f32 %v645_v60  ;;  %v1671_v49 = vpop.eup %1670  ;;  %v656_v45 = vadd.f32 1.0, %v1669_v61 }
 0x15a   :  { %1674 = vrcp.f32 %v650_v0 }
 0x15b   :  { %1676 = vrcp.f32 %v656_v45 }
 0x163   :  { %v1673_v51 = vpop.eup %1672 }
 0x164   :  { %v1675_v4 = vpop.eup %1674  ;;  %v659_v38 = vmul.f32 %v1673_v51, %v1671_v49 }
 0x165   :  { %v658_v2 = vmul.f32 %v1675_v4, %v86_v47  ;;  %v1677_v62 = vpop.eup %1676 }
 0x167   :  { %v2348_v20 = vadd.f32 %v659_v38, %v658_v2 }
 0x169   :  { %1678 = vtanh.f32 %v2348_v20 }
 0x173   :  { %v1679_v50 = vpop.eup %1678 }
 0x174   :  { %v662_v7 = vmul.f32 %v1679_v50, %v1677_v62 }
 0x176   :  { %v663_v53 = vpack.c.bf16 %v662_v7, %v662_v7 }
 0x178   :  { %664 = vst [vmem:[#allocation13] sm:$0xf] %v663_v53  ;;  %705 = vmatmul.mubr.bf16.vlgmr.msra.gmra.mrb[20].mxu0 %v663_v53  ;;  %746 = vmatmul.mubr.bf16.vlgmr.msra.gmra.mrb[20].mxu1 %v663_v53 }
 0x179   :  { %790 = vmatpush1.bf16.msra.mxu0 %v2116_v12  ;;  %831 = vmatpush1.bf16.msra.mxu1 %v2118_v13 }
 0x17a   :  { %791 = vmatprep.subr.bf16.mxu0 %v2122_v14  ;;  %832 = vmatprep.subr.bf16.mxu1 %v2124_v15 }
 0x17b   :  { %821 = vmatprep.mubr.bf16.mxu0 %v2752_v46  ;;  %862 = vmatprep.mubr.bf16.mxu1 %v2752_v46 }
 0x17d   :  { %792 = vmatpush1.bf16.msra.mxu0 %v2126_v16  ;;  %833 = vmatpush1.bf16.msra.mxu1 %v2130_v17 }
 0x17e   :  { %793 = vmatprep.subr.bf16.mxu0 %v2134_v18  ;;  %834 = vmatprep.subr.bf16.mxu1 %v2138_v19 }
 0x181   :  { %794 = vmatpush1.bf16.msra.mxu0 %v2142_v21  ;;  %835 = vmatpush1.bf16.msra.mxu1 %v2146_v22 }
 0x182   :  { %795 = vmatprep.subr.bf16.mxu0 %v2148_v23  ;;  %836 = vmatprep.subr.bf16.mxu1 %v2152_v24 }
 0x185   :  { %796 = vmatpush1.bf16.msra.mxu0 %v2158_v25  ;;  %837 = vmatpush1.bf16.msra.mxu1 %v2160_v26 }
 0x186   :  { %797 = vmatprep.subr.bf16.mxu0 %v2162_v27  ;;  %838 = vmatprep.subr.bf16.mxu1 %v2166_v28 }
 0x189   :  { %798 = vmatpush1.bf16.msra.mxu0 %v2170_v30  ;;  %839 = vmatpush1.bf16.msra.mxu1 %v2172_v31 }
 0x18a   :  { %799 = vmatprep.subr.bf16.mxu0 %v2176_v32  ;;  %840 = vmatprep.subr.bf16.mxu1 %v2180_v33 }
 0x18d   :  { %800 = vmatpush1.bf16.msra.mxu0 %v2184_v34  ;;  %841 = vmatpush1.bf16.msra.mxu1 %v2188_v35 }
 0x18e   :  { %801 = vmatprep.subr.bf16.mxu0 %v2192_v36  ;;  %842 = vmatprep.subr.bf16.mxu1 %v2194_v37 }
 0x191   :  { %802 = vmatpush1.bf16.msra.mxu0 %v2200_v39  ;;  %843 = vmatpush1.bf16.msra.mxu1 %v2202_v40 }
 0x192   :  { %803 = vmatprep.subr.bf16.mxu0 %v2206_v41  ;;  %844 = vmatprep.subr.bf16.mxu1 %v2208_v42 }
 0x195   :  { %804 = vmatpush1.bf16.msra.mxu0 %v2214_v43  ;;  %845 = vmatpush1.bf16.msra.mxu1 %v2216_v44 }
 0x196   :  { %906 = vmatprep.subr.bf16.mxu0 %v2112_v8  ;;  %947 = vmatprep.subr.bf16.mxu1 %v2114_v11 }
 0x24b   :  { %v706_v48 = vpop.f32.mrb[20].mxu0  ;;  %v747_v52 = vpop.f32.mrb[20].mxu1 }
 0x24c   :  { %v754_v63 = vadd.f32 %v706_v48, %v2271_v1  ;;  %v756_v9 = vadd.f32 %v747_v52, %v2274_v3  ;;  %v708_v55 = vpop.f32.mrb[21].mxu0  ;;  %v749_v58 = vpop.f32.mrb[21].mxu1 }
 0x24d   :  { %v755_v54 = vadd.f32 %v708_v55, %v2276_v5  ;;  %v757_v56 = vadd.f32 %v749_v58, %v2279_v6  ;;  %v710_v57 = vpop.f32.mrb[22].mxu0  ;;  %v751_v59 = vpop.f32.mrb[22].mxu1 }
 0x24e   :  { %v758_v60 = vsub.f32 0.0, %v754_v63  ;;  %v711_v0 = vpop.f32.mrb[23].mxu0  ;;  %v752_v61 = vpop.f32.mrb[23].mxu1 }
 0x24f   :  { %v763_v49 = vsub.f32 0.0, %v755_v54  ;;  %v769_v4 = vsub.f32 0.0, %v757_v56  ;;  %v2753_v0 = vld [vmem:[#allocation22_spill] sm:$0xff] }
 0x250   :  { %v759_v47 = vmul.f32 1.442695, %v758_v60 }
 0x251   :  { %v764_v51 = vmul.f32 1.442695, %v763_v49  ;;  %v770_v1 = vmul.f32 1.442695, %v769_v4  ;;  %v2754_v49 = vld [vmem:[#allocation23_spill] sm:$0xff] }
 0x252   :  { %1680 = vpow2.f32 %v759_v47 }
 0x253   :  { %1682 = vpow2.f32 %v764_v51 }
 0x254   :  { %1684 = vpow2.f32 %v770_v1 }
 0x255   :  { %1686 = vtanh.f32 %v756_v9 }
 0x25c   :  { %v1681_v38 = vpop.eup %1680 }
 0x25d   :  { %v1683_v3 = vpop.eup %1682  ;;  %v761_v45 = vadd.f32 1.0, %v1681_v38 }
 0x25e   :  { %v766_v5 = vadd.f32 1.0, %v1683_v3  ;;  %v1685_v6 = vpop.eup %1684 }
 0x25f   :  { %1688 = vrcp.f32 %v761_v45  ;;  %v1687_v2 = vpop.eup %1686  ;;  %v772_v53 = vadd.f32 1.0, %v1685_v6 }
 0x260   :  { %1690 = vrcp.f32 %v766_v5 }
 0x261   :  { %1692 = vrcp.f32 %v772_v53 }
 0x269   :  { %v1689_v62 = vpop.eup %1688 }
 0x26a   :  { %v1691_v50 = vpop.eup %1690  ;;  %v775_v7 = vmul.f32 %v1689_v62, %v1687_v2 }
 0x26b   :  { %v774_v48 = vmul.f32 %v1691_v50, %v2348_v20  ;;  %v1693_v63 = vpop.eup %1692 }
 0x26d   :  { %v2390_v52 = vadd.f32 %v775_v7, %v774_v48 }
 0x26f   :  { %1694 = vtanh.f32 %v2390_v52 }
 0x279   :  { %v1695_v55 = vpop.eup %1694 }
 0x27a   :  { %v778_v58 = vmul.f32 %v1695_v55, %v1693_v63 }
 0x27c   :  { %v779_v9 = vpack.c.bf16 %v778_v58, %v778_v58 }
 0x27e   :  { %781 = vst [vmem:[#allocation13 + $0x4] sm:$0xf] %v779_v9  ;;  %822 = vmatmul.mubr.bf16.vlgmr.msra.gmra.mrb[24].mxu0 %v779_v9  ;;  %863 = vmatmul.mubr.bf16.vlgmr.msra.gmra.mrb[24].mxu1 %v779_v9 }
 0x27f   :  { %907 = vmatpush1.bf16.msra.mxu0 %v2116_v12  ;;  %948 = vmatpush1.bf16.msra.mxu1 %v2118_v13 }
 0x280   :  { %908 = vmatprep.subr.bf16.mxu0 %v2122_v14  ;;  %949 = vmatprep.subr.bf16.mxu1 %v2124_v15 }
 0x281   :  { %938 = vmatprep.mubr.bf16.mxu0 %v2752_v46  ;;  %979 = vmatprep.mubr.bf16.mxu1 %v2752_v46 }
 0x283   :  { %909 = vmatpush1.bf16.msra.mxu0 %v2126_v16  ;;  %950 = vmatpush1.bf16.msra.mxu1 %v2130_v17 }
 0x284   :  { %910 = vmatprep.subr.bf16.mxu0 %v2134_v18  ;;  %951 = vmatprep.subr.bf16.mxu1 %v2138_v19 }
 0x287   :  { %911 = vmatpush1.bf16.msra.mxu0 %v2142_v21  ;;  %952 = vmatpush1.bf16.msra.mxu1 %v2146_v22 }
 0x288   :  { %912 = vmatprep.subr.bf16.mxu0 %v2148_v23  ;;  %953 = vmatprep.subr.bf16.mxu1 %v2152_v24 }
 0x28b   :  { %913 = vmatpush1.bf16.msra.mxu0 %v2158_v25  ;;  %954 = vmatpush1.bf16.msra.mxu1 %v2160_v26 }
 0x28c   :  { %914 = vmatprep.subr.bf16.mxu0 %v2162_v27  ;;  %955 = vmatprep.subr.bf16.mxu1 %v2166_v28 }
 0x28f   :  { %915 = vmatpush1.bf16.msra.mxu0 %v2170_v30  ;;  %956 = vmatpush1.bf16.msra.mxu1 %v2172_v31 }
 0x290   :  { %916 = vmatprep.subr.bf16.mxu0 %v2176_v32  ;;  %957 = vmatprep.subr.bf16.mxu1 %v2180_v33 }
 0x293   :  { %917 = vmatpush1.bf16.msra.mxu0 %v2184_v34  ;;  %958 = vmatpush1.bf16.msra.mxu1 %v2188_v35 }
 0x294   :  { %918 = vmatprep.subr.bf16.mxu0 %v2192_v36  ;;  %959 = vmatprep.subr.bf16.mxu1 %v2194_v37 }
 0x297   :  { %919 = vmatpush1.bf16.msra.mxu0 %v2200_v39  ;;  %960 = vmatpush1.bf16.msra.mxu1 %v2202_v40 }
 0x298   :  { %920 = vmatprep.subr.bf16.mxu0 %v2206_v41  ;;  %961 = vmatprep.subr.bf16.mxu1 %v2208_v42 }
 0x29b   :  { %921 = vmatpush1.bf16.msra.mxu0 %v2214_v43  ;;  %962 = vmatpush1.bf16.msra.mxu1 %v2216_v44 }
 0x29c   :  { %1023 = vmatprep.subr.bf16.mxu0 %v2112_v8  ;;  %1064 = vmatprep.subr.bf16.mxu1 %v2114_v11 }
 0x351   :  { %v823_v20 = vpop.f32.mrb[24].mxu0  ;;  %v864_v54 = vpop.f32.mrb[24].mxu1 }
 0x352   :  { %v871_v56 = vadd.f32 %v823_v20, %v2281_v10  ;;  %v873_v57 = vadd.f32 %v864_v54, %v2284_v29  ;;  %v825_v59 = vpop.f32.mrb[25].mxu0  ;;  %v866_v60 = vpop.f32.mrb[25].mxu1 }
 0x353   :  { %v872_v61 = vadd.f32 %v825_v59, %v2753_v0  ;;  %v874_v47 = vadd.f32 %v866_v60, %v2754_v49  ;;  %v827_v51 = vpop.f32.mrb[26].mxu0  ;;  %v868_v4 = vpop.f32.mrb[26].mxu1 }
 0x354   :  { %v875_v1 = vsub.f32 0.0, %v871_v56  ;;  %v828_v38 = vpop.f32.mrb[27].mxu0  ;;  %v869_v3 = vpop.f32.mrb[27].mxu1  ;;  %v2757_v4 = vld [vmem:[#allocation26_spill] sm:$0xff] }
 0x355   :  { %v880_v45 = vsub.f32 0.0, %v872_v61  ;;  %v886_v2 = vsub.f32 0.0, %v874_v47  ;;  %v2756_v61 = vld [vmem:[#allocation25_spill] sm:$0xff]  ;;  %v2758_v38 = vld [vmem:[#allocation27_spill] sm:$0xff] }
 0x356   :  { %v876_v5 = vmul.f32 1.442695, %v875_v1 }
 0x357   :  { %v881_v6 = vmul.f32 1.442695, %v880_v45  ;;  %v887_v10 = vmul.f32 1.442695, %v886_v2 }
 0x358   :  { %1696 = vpow2.f32 %v876_v5 }
 0x359   :  { %1698 = vpow2.f32 %v881_v6 }
 0x35a   :  { %1700 = vpow2.f32 %v887_v10 }
 0x35b   :  { %1702 = vtanh.f32 %v873_v57 }
 0x362   :  { %v1697_v62 = vpop.eup %1696 }
 0x363   :  { %v1699_v29 = vpop.eup %1698  ;;  %v878_v50 = vadd.f32 1.0, %v1697_v62 }
 0x364   :  { %v883_v7 = vadd.f32 1.0, %v1699_v29  ;;  %v1701_v53 = vpop.eup %1700 }
 0x365   :  { %1704 = vrcp.f32 %v878_v50  ;;  %v1703_v48 = vpop.eup %1702  ;;  %v889_v9 = vadd.f32 1.0, %v1701_v53 }
 0x366   :  { %1706 = vrcp.f32 %v883_v7 }
 0x367   :  { %1708 = vrcp.f32 %v889_v9 }
 0x36f   :  { %v1705_v63 = vpop.eup %1704 }
 0x370   :  { %v1707_v55 = vpop.eup %1706  ;;  %v892_v58 = vmul.f32 %v1705_v63, %v1703_v48 }
 0x371   :  { %v891_v20 = vmul.f32 %v1707_v55, %v2390_v52  ;;  %v1709_v56 = vpop.eup %1708  ;;  %v2755_v52 = vld [vmem:[#allocation24_spill] sm:$0xff] }
 0x373   :  { %v2432_v54 = vadd.f32 %v892_v58, %v891_v20 }
 0x375   :  { %1710 = vtanh.f32 %v2432_v54 }
 0x37f   :  { %v1711_v59 = vpop.eup %1710 }
 0x380   :  { %v895_v60 = vmul.f32 %v1711_v59, %v1709_v56 }
 0x382   :  { %v896_v57 = vpack.c.bf16 %v895_v60, %v895_v60 }
 0x384   :  { %898 = vst [vmem:[#allocation13 + $0x8] sm:$0xf] %v896_v57  ;;  %939 = vmatmul.mubr.bf16.vlgmr.msra.gmra.mrb[28].mxu0 %v896_v57  ;;  %980 = vmatmul.mubr.bf16.vlgmr.msra.gmra.mrb[28].mxu1 %v896_v57 }
 0x385   :  { %1024 = vmatpush1.bf16.msra.mxu0 %v2116_v12  ;;  %1065 = vmatpush1.bf16.msra.mxu1 %v2118_v13 }
 0x386   :  { %1025 = vmatprep.subr.bf16.mxu0 %v2122_v14  ;;  %1066 = vmatprep.subr.bf16.mxu1 %v2124_v15 }
 0x387   :  { %1055 = vmatprep.mubr.bf16.mxu0 %v2752_v46  ;;  %1096 = vmatprep.mubr.bf16.mxu1 %v2752_v46 }
 0x389   :  { %1026 = vmatpush1.bf16.msra.mxu0 %v2126_v16  ;;  %1067 = vmatpush1.bf16.msra.mxu1 %v2130_v17 }
 0x38a   :  { %1027 = vmatprep.subr.bf16.mxu0 %v2134_v18  ;;  %1068 = vmatprep.subr.bf16.mxu1 %v2138_v19 }
 0x38d   :  { %1028 = vmatpush1.bf16.msra.mxu0 %v2142_v21  ;;  %1069 = vmatpush1.bf16.msra.mxu1 %v2146_v22 }
 0x38e   :  { %1029 = vmatprep.subr.bf16.mxu0 %v2148_v23  ;;  %1070 = vmatprep.subr.bf16.mxu1 %v2152_v24 }
 0x391   :  { %1030 = vmatpush1.bf16.msra.mxu0 %v2158_v25  ;;  %1071 = vmatpush1.bf16.msra.mxu1 %v2160_v26 }
 0x392   :  { %1031 = vmatprep.subr.bf16.mxu0 %v2162_v27  ;;  %1072 = vmatprep.subr.bf16.mxu1 %v2166_v28 }
 0x395   :  { %1032 = vmatpush1.bf16.msra.mxu0 %v2170_v30  ;;  %1073 = vmatpush1.bf16.msra.mxu1 %v2172_v31 }
 0x396   :  { %1033 = vmatprep.subr.bf16.mxu0 %v2176_v32  ;;  %1074 = vmatprep.subr.bf16.mxu1 %v2180_v33 }
 0x399   :  { %1034 = vmatpush1.bf16.msra.mxu0 %v2184_v34  ;;  %1075 = vmatpush1.bf16.msra.mxu1 %v2188_v35 }
 0x39a   :  { %1035 = vmatprep.subr.bf16.mxu0 %v2192_v36  ;;  %1076 = vmatprep.subr.bf16.mxu1 %v2194_v37 }
 0x39d   :  { %1036 = vmatpush1.bf16.msra.mxu0 %v2200_v39  ;;  %1077 = vmatpush1.bf16.msra.mxu1 %v2202_v40 }
 0x39e   :  { %1037 = vmatprep.subr.bf16.mxu0 %v2206_v41  ;;  %1078 = vmatprep.subr.bf16.mxu1 %v2208_v42 }
 0x3a1   :  { %1038 = vmatpush1.bf16.msra.mxu0 %v2214_v43  ;;  %1079 = vmatpush1.bf16.msra.mxu1 %v2216_v44 }
 0x3a2   :  { %1140 = vmatprep.subr.bf16.mxu0 %v2112_v8  ;;  %1181 = vmatprep.subr.bf16.mxu1 %v2114_v11 }
 0x457   :  { %v940_v12 = vpop.f32.mrb[28].mxu0  ;;  %v981_v13 = vpop.f32.mrb[28].mxu1 }
 0x458   :  { %v988_v0 = vadd.f32 %v940_v12, %v2755_v52  ;;  %v990_v49 = vadd.f32 %v981_v13, %v2756_v61  ;;  %v942_v47 = vpop.f32.mrb[29].mxu0  ;;  %v983_v51 = vpop.f32.mrb[29].mxu1  ;;  %v2477_v61 = vld [vmem:[#allocation11] ss:$16 sps:$4 sm:$0xff]  }
 0x459   :  { %v989_v1 = vadd.f32 %v942_v47, %v2757_v4  ;;  %v991_v3 = vadd.f32 %v983_v51, %v2758_v38  ;;  %v944_v45 = vpop.f32.mrb[30].mxu0  ;;  %v985_v5 = vpop.f32.mrb[30].mxu1 }
 0x45a   :  { %v992_v6 = vsub.f32 0.0, %v988_v0  ;;  %v945_v2 = vpop.f32.mrb[31].mxu0  ;;  %v986_v10 = vpop.f32.mrb[31].mxu1 }
 0x45b   :  { %v997_v8 = vsub.f32 0.0, %v989_v1  ;;  %v1003_v29 = vsub.f32 0.0, %v991_v3 }
 0x45c   :  { %v993_v62 = vmul.f32 1.442695, %v992_v6 }
 0x45d   :  { %v998_v11 = vmul.f32 1.442695, %v997_v8  ;;  %v1004_v50 = vmul.f32 1.442695, %v1003_v29  ;;  %v2529_v8 = vld [vmem:[#allocation11 + $0x24] ss:$16 sps:$4 sm:$0xff]  }
 0x45e   :  { %1712 = vpow2.f32 %v993_v62  ;;  %v2532_v62 = vld [vmem:[#allocation11 + $0x2c] ss:$16 sps:$4 sm:$0xff]   ;;  %v2540_v29 = vld [vmem:[#allocation11 + $0x28] ss:$16 sps:$4 sm:$0xff]  }
 0x45f   :  { %1714 = vpow2.f32 %v998_v11  ;;  %v2537_v11 = vld [vmem:[#allocation11 + $0x20] ss:$16 sps:$4 sm:$0xff]  }
 0x460   :  { %1716 = vpow2.f32 %v1004_v50  ;;  %v2543_v50 = vld [vmem:[#allocation11 + $0x44] ss:$16 sps:$4 sm:$0xff]  }
 0x461   :  { %1718 = vtanh.f32 %v990_v49  ;;  %v2480_v49 = vld [vmem:[#allocation11 + $0x8] ss:$16 sps:$4 sm:$0xff]  }
 0x468   :  { %v1713_v7 = vpop.eup %1712 }
 0x469   :  { %v1715_v53 = vpop.eup %1714  ;;  %v995_v48 = vadd.f32 1.0, %v1713_v7  ;;  %v2546_v7 = vld [vmem:[#allocation11 + $0x4c] ss:$16 sps:$4 sm:$0xff]  }
 0x46a   :  { %v1000_v63 = vadd.f32 1.0, %v1715_v53  ;;  %v1717_v55 = vpop.eup %1716  ;;  %v2549_v53 = vld [vmem:[#allocation11 + $0x40] ss:$16 sps:$4 sm:$0xff]  }
 0x46b   :  { %1720 = vrcp.f32 %v995_v48  ;;  %v1719_v58 = vpop.eup %1718  ;;  %v1006_v59 = vadd.f32 1.0, %v1717_v55  ;;  %v2552_v48 = vld [vmem:[#allocation11 + $0x48] ss:$16 sps:$4 sm:$0xff]   ;;  %v2558_v55 = vld [vmem:[#allocation11 + $0x6c] ss:$16 sps:$4 sm:$0xff]  }
 0x46c   :  { %1722 = vrcp.f32 %v1000_v63  ;;  %v2555_v63 = vld [vmem:[#allocation11 + $0x64] ss:$16 sps:$4 sm:$0xff]  }
 0x46d   :  { %1724 = vrcp.f32 %v1006_v59  ;;  %v2573_v59 = vld [vmem:[#allocation11 + $0x80] ss:$16 sps:$4 sm:$0xff]  }
 0x475   :  { %v1721_v9 = vpop.eup %1720 }
 0x476   :  { %v1723_v20 = vpop.eup %1722  ;;  %v1009_v56 = vmul.f32 %v1721_v9, %v1719_v58  ;;  %v2561_v58 = vld [vmem:[#allocation11 + $0x60] ss:$16 sps:$4 sm:$0xff]   ;;  %v2564_v9 = vld [vmem:[#allocation11 + $0x68] ss:$16 sps:$4 sm:$0xff]  }
 0x477   :  { %v1008_v60 = vmul.f32 %v1723_v20, %v2432_v54  ;;  %v1725_v12 = vpop.eup %1724  ;;  %v2567_v20 = vld [vmem:[#allocation11 + $0x84] ss:$16 sps:$4 sm:$0xff]  }
 0x479   :  { %v2474_v57 = vadd.f32 %v1009_v56, %v1008_v60  ;;  %v2570_v56 = vld [vmem:[#allocation11 + $0x8c] ss:$16 sps:$4 sm:$0xff]   ;;  %v2576_v60 = vld [vmem:[#allocation11 + $0x88] ss:$16 sps:$4 sm:$0xff]  }
 0x47b   :  { %1726 = vtanh.f32 %v2474_v57 }
 0x485   :  { %v1727_v13 = vpop.eup %1726 }
 0x486   :  { %v1012_v52 = vmul.f32 %v1727_v13, %v1725_v12  ;;  %v2582_v12 = vld [vmem:[#allocation11 + $0xac] ss:$16 sps:$4 sm:$0xff]   ;;  %v2585_v13 = vld [vmem:[#allocation11 + $0xa0] ss:$16 sps:$4 sm:$0xff]  }
 0x488   :  { %v1013_v0 = vpack.c.bf16 %v1012_v52, %v1012_v52  ;;  %v2588_v52 = vld [vmem:[#allocation11 + $0xa8] ss:$16 sps:$4 sm:$0xff]  }
 0x48a   :  { %1015 = vst [vmem:[#allocation13 + $0xc] sm:$0xf] %v1013_v0  ;;  %1056 = vmatmul.mubr.bf16.vlgmr.msra.gmra.mrb[32].mxu0 %v1013_v0  ;;  %1097 = vmatmul.mubr.bf16.vlgmr.msra.gmra.mrb[32].mxu1 %v1013_v0  ;;  %v2591_v0 = vld [vmem:[#allocation11 + $0xc4] ss:$16 sps:$4 sm:$0xff]  }
 0x48b   :  { %1141 = vmatpush1.bf16.msra.mxu0 %v2477_v61  ;;  %1182 = vmatpush1.bf16.msra.mxu1 %v2480_v49 }
 0x48c   :  { %1142 = vmatprep.subr.bf16.mxu0 %v2122_v14  ;;  %1183 = vmatprep.subr.bf16.mxu1 %v2124_v15  ;;  %v2513_v14 = vld [vmem:[#allocation11 + $0x4] ss:$16 sps:$4 sm:$0xff]   ;;  %v2516_v15 = vld [vmem:[#allocation11 + $0xc] ss:$16 sps:$4 sm:$0xff]  }
 0x48d   :  { %1172 = vmatprep.mubr.bf16.mxu0 %v2752_v46  ;;  %1213 = vmatprep.mubr.bf16.mxu1 %v2752_v46 }
 0x48f   :  { %1143 = vmatpush1.bf16.msra.mxu0 %v2126_v16  ;;  %1184 = vmatpush1.bf16.msra.mxu1 %v2130_v17 }
 0x490   :  { %1144 = vmatprep.subr.bf16.mxu0 %v2134_v18  ;;  %1185 = vmatprep.subr.bf16.mxu1 %v2138_v19  ;;  %v2759_v18 = vld [vmem:[#allocation28_spill] sm:$0xff] }
 0x493   :  { %1145 = vmatpush1.bf16.msra.mxu0 %v2142_v21  ;;  %1186 = vmatpush1.bf16.msra.mxu1 %v2146_v22  ;;  %v2760_v21 = vld [vmem:[#allocation29_spill] sm:$0xff] }
 0x494   :  { %1146 = vmatprep.subr.bf16.mxu0 %v2148_v23  ;;  %1187 = vmatprep.subr.bf16.mxu1 %v2152_v24 }
 0x497   :  { %1147 = vmatpush1.bf16.msra.mxu0 %v2158_v25  ;;  %1188 = vmatpush1.bf16.msra.mxu1 %v2160_v26  ;;  %v2761_v25 = vld [vmem:[#allocation30_spill] sm:$0xff] }
 0x498   :  { %1148 = vmatprep.subr.bf16.mxu0 %v2162_v27  ;;  %1189 = vmatprep.subr.bf16.mxu1 %v2166_v28  ;;  %v2762_v27 = vld [vmem:[#allocation31_spill] sm:$0xff] }
 0x49b   :  { %1149 = vmatpush1.bf16.msra.mxu0 %v2170_v30  ;;  %1190 = vmatpush1.bf16.msra.mxu1 %v2172_v31 }
 0x49c   :  { %1150 = vmatprep.subr.bf16.mxu0 %v2176_v32  ;;  %1191 = vmatprep.subr.bf16.mxu1 %v2180_v33 }
 0x49f   :  { %1151 = vmatpush1.bf16.msra.mxu0 %v2184_v34  ;;  %1192 = vmatpush1.bf16.msra.mxu1 %v2188_v35 }
 0x4a0   :  { %1152 = vmatprep.subr.bf16.mxu0 %v2192_v36  ;;  %1193 = vmatprep.subr.bf16.mxu1 %v2194_v37 }
 0x4a3   :  { %1153 = vmatpush1.bf16.msra.mxu0 %v2200_v39  ;;  %1194 = vmatpush1.bf16.msra.mxu1 %v2202_v40 }
 0x4a4   :  { %1154 = vmatprep.subr.bf16.mxu0 %v2206_v41  ;;  %1195 = vmatprep.subr.bf16.mxu1 %v2208_v42 }
 0x4a7   :  { %1155 = vmatpush1.bf16.msra.mxu0 %v2214_v43  ;;  %1196 = vmatpush1.bf16.msra.mxu1 %v2216_v44 }
 0x4a8   :  { %1257 = vmatprep.subr.bf16.mxu0 %v2513_v14  ;;  %1298 = vmatprep.subr.bf16.mxu1 %v2516_v15 }
 0x55d   :  { %v1057_v16 = vpop.f32.mrb[32].mxu0  ;;  %v1098_v17 = vpop.f32.mrb[32].mxu1 }
 0x55e   :  { %v1105_v19 = vadd.f32 %v1057_v16, %v2759_v18  ;;  %v1107_v22 = vadd.f32 %v1098_v17, %v2760_v21  ;;  %v1059_v23 = vpop.f32.mrb[33].mxu0  ;;  %v1100_v24 = vpop.f32.mrb[33].mxu1  ;;  %v2594_v16 = vld [vmem:[#allocation11 + $0xcc] ss:$16 sps:$4 sm:$0xff]   ;;  %v2597_v17 = vld [vmem:[#allocation11 + $0xc0] ss:$16 sps:$4 sm:$0xff]  }
 0x55f   :  { %v1106_v26 = vadd.f32 %v1059_v23, %v2761_v25  ;;  %v1108_v28 = vadd.f32 %v1100_v24, %v2762_v27  ;;  %v1061_v30 = vpop.f32.mrb[34].mxu0  ;;  %v1102_v31 = vpop.f32.mrb[34].mxu1  ;;  %v2600_v18 = vld [vmem:[#allocation11 + $0xc8] ss:$16 sps:$4 sm:$0xff]   ;;  %v2606_v21 = vld [vmem:[#allocation11 + $0xec] ss:$16 sps:$4 sm:$0xff]  }
 0x560   :  { %v1109_v32 = vsub.f32 0.0, %v1105_v19  ;;  %v1062_v33 = vpop.f32.mrb[35].mxu0  ;;  %v1103_v34 = vpop.f32.mrb[35].mxu1  ;;  %v2603_v19 = vld [vmem:[#allocation11 + $0xe4] ss:$16 sps:$4 sm:$0xff]  }
 0x561   :  { %v1114_v35 = vsub.f32 0.0, %v1106_v26  ;;  %v1120_v39 = vsub.f32 0.0, %v1108_v28  ;;  %v2612_v23 = vld [vmem:[#allocation11 + $0xe8] ss:$16 sps:$4 sm:$0xff]   ;;  %v2763_v26 = vld [vmem:[#allocation32_spill] sm:$0xff]  ;;  %v2765_v33 = vld [vmem:[#allocation34_spill] sm:$0xff] }
 0x562   :  { %v1110_v36 = vmul.f32 1.442695, %v1109_v32  ;;  %v2764_v28 = vld [vmem:[#allocation33_spill] sm:$0xff] }
 0x563   :  { %v1115_v37 = vmul.f32 1.442695, %v1114_v35  ;;  %v1121_v40 = vmul.f32 1.442695, %v1120_v39  ;;  %v2766_v35 = vld [vmem:[#allocation35_spill] sm:$0xff] }
 0x564   :  { %1728 = vpow2.f32 %v1110_v36 }
 0x565   :  { %1730 = vpow2.f32 %v1115_v37 }
 0x566   :  { %1732 = vpow2.f32 %v1121_v40 }
 0x567   :  { %1734 = vtanh.f32 %v1107_v22  ;;  %v2609_v22 = vld [vmem:[#allocation11 + $0xe0] ss:$16 sps:$4 sm:$0xff]  }
 0x56e   :  { %v1729_v41 = vpop.eup %1728 }
 0x56f   :  { %v1731_v42 = vpop.eup %1730  ;;  %v1112_v43 = vadd.f32 1.0, %v1729_v41 }
 0x570   :  { %v1117_v44 = vadd.f32 1.0, %v1731_v42  ;;  %v1733_v54 = vpop.eup %1732 }
 0x571   :  { %1736 = vrcp.f32 %v1112_v43  ;;  %v1735_v47 = vpop.eup %1734  ;;  %v1123_v38 = vadd.f32 1.0, %v1733_v54 }
 0x572   :  { %1738 = vrcp.f32 %v1117_v44 }
 0x573   :  { %1740 = vrcp.f32 %v1123_v38 }
 0x57b   :  { %v1737_v51 = vpop.eup %1736 }
 0x57c   :  { %v1739_v4 = vpop.eup %1738  ;;  %v1126_v1 = vmul.f32 %v1737_v51, %v1735_v47 }
 0x57d   :  { %v1125_v3 = vmul.f32 %v1739_v4, %v2474_v57  ;;  %v1741_v5 = vpop.eup %1740  ;;  %v2579_v57 = vld [vmem:[#allocation11 + $0xa4] ss:$16 sps:$4 sm:$0xff]  }
 0x57f   :  { %v2524_v45 = vadd.f32 %v1126_v1, %v1125_v3 }
 0x581   :  { %1742 = vtanh.f32 %v2524_v45 }
 0x58b   :  { %v1743_v6 = vpop.eup %1742 }
 0x58c   :  { %v1129_v2 = vmul.f32 %v1743_v6, %v1741_v5 }
 0x58e   :  { %v1130_v10 = vpack.c.bf16 %v1129_v2, %v1129_v2 }
 0x590   :  { %1132 = vst [vmem:[#allocation13 + $0x10] sm:$0xf] %v1130_v10  ;;  %1173 = vmatmul.mubr.bf16.vlgmr.msra.gmra.mrb[36].mxu0 %v1130_v10  ;;  %1214 = vmatmul.mubr.bf16.vlgmr.msra.gmra.mrb[36].mxu1 %v1130_v10 }
 0x591   :  { %1258 = vmatpush1.bf16.msra.mxu0 %v2477_v61  ;;  %1299 = vmatpush1.bf16.msra.mxu1 %v2480_v49 }
 0x592   :  { %1259 = vmatprep.subr.bf16.mxu0 %v2529_v8  ;;  %1300 = vmatprep.subr.bf16.mxu1 %v2532_v62 }
 0x593   :  { %1289 = vmatprep.mubr.bf16.mxu0 %v2752_v46  ;;  %1330 = vmatprep.mubr.bf16.mxu1 %v2752_v46 }
 0x595   :  { %1260 = vmatpush1.bf16.msra.mxu0 %v2537_v11  ;;  %1301 = vmatpush1.bf16.msra.mxu1 %v2540_v29 }
 0x596   :  { %1261 = vmatprep.subr.bf16.mxu0 %v2543_v50  ;;  %1302 = vmatprep.subr.bf16.mxu1 %v2546_v7 }
 0x599   :  { %1262 = vmatpush1.bf16.msra.mxu0 %v2549_v53  ;;  %1303 = vmatpush1.bf16.msra.mxu1 %v2552_v48 }
 0x59a   :  { %1263 = vmatprep.subr.bf16.mxu0 %v2555_v63  ;;  %1304 = vmatprep.subr.bf16.mxu1 %v2558_v55 }
 0x59d   :  { %1264 = vmatpush1.bf16.msra.mxu0 %v2561_v58  ;;  %1305 = vmatpush1.bf16.msra.mxu1 %v2564_v9 }
 0x59e   :  { %1265 = vmatprep.subr.bf16.mxu0 %v2567_v20  ;;  %1306 = vmatprep.subr.bf16.mxu1 %v2570_v56 }
 0x5a1   :  { %1266 = vmatpush1.bf16.msra.mxu0 %v2573_v59  ;;  %1307 = vmatpush1.bf16.msra.mxu1 %v2576_v60 }
 0x5a2   :  { %1267 = vmatprep.subr.bf16.mxu0 %v2579_v57  ;;  %1308 = vmatprep.subr.bf16.mxu1 %v2582_v12 }
 0x5a5   :  { %1268 = vmatpush1.bf16.msra.mxu0 %v2585_v13  ;;  %1309 = vmatpush1.bf16.msra.mxu1 %v2588_v52 }
 0x5a6   :  { %1269 = vmatprep.subr.bf16.mxu0 %v2591_v0  ;;  %1310 = vmatprep.subr.bf16.mxu1 %v2594_v16 }
 0x5a9   :  { %1270 = vmatpush1.bf16.msra.mxu0 %v2597_v17  ;;  %1311 = vmatpush1.bf16.msra.mxu1 %v2600_v18 }
 0x5aa   :  { %1271 = vmatprep.subr.bf16.mxu0 %v2603_v19  ;;  %1312 = vmatprep.subr.bf16.mxu1 %v2606_v21 }
 0x5ad   :  { %1272 = vmatpush1.bf16.msra.mxu0 %v2609_v22  ;;  %1313 = vmatpush1.bf16.msra.mxu1 %v2612_v23 }
 0x5ae   :  { %1374 = vmatprep.subr.bf16.mxu0 %v2513_v14  ;;  %1415 = vmatprep.subr.bf16.mxu1 %v2516_v15 }
 0x663   :  { %v1174_v24 = vpop.f32.mrb[36].mxu0  ;;  %v1215_v25 = vpop.f32.mrb[36].mxu1 }
 0x664   :  { %v1222_v27 = vadd.f32 %v1174_v24, %v2763_v26  ;;  %v1224_v30 = vadd.f32 %v1215_v25, %v2764_v28  ;;  %v1176_v31 = vpop.f32.mrb[37].mxu0  ;;  %v1217_v32 = vpop.f32.mrb[37].mxu1 }
 0x665   :  { %v1223_v34 = vadd.f32 %v1176_v31, %v2765_v33  ;;  %v1225_v36 = vadd.f32 %v1217_v32, %v2766_v35  ;;  %v1178_v37 = vpop.f32.mrb[38].mxu0  ;;  %v1219_v39 = vpop.f32.mrb[38].mxu1 }
 0x666   :  { %v1226_v40 = vsub.f32 0.0, %v1222_v27  ;;  %v1179_v41 = vpop.f32.mrb[39].mxu0  ;;  %v1220_v42 = vpop.f32.mrb[39].mxu1 }
 0x667   :  { %v1231_v14 = vsub.f32 0.0, %v1223_v34  ;;  %v1237_v44 = vsub.f32 0.0, %v1225_v36  ;;  %v2772_v42 = vld [vmem:[#allocation41_spill] sm:$0xff] }
 0x668   :  { %v1227_v43 = vmul.f32 1.442695, %v1226_v40  ;;  %v2771_v40 = vld [vmem:[#allocation40_spill] sm:$0xff] }
 0x669   :  { %v1232_v15 = vmul.f32 1.442695, %v1231_v14  ;;  %v1238_v54 = vmul.f32 1.442695, %v1237_v44  ;;  %v2773_v44 = vld [vmem:[#allocation42_spill] sm:$0xff] }
 0x66a   :  { %1744 = vpow2.f32 %v1227_v43 }
 0x66b   :  { %1746 = vpow2.f32 %v1232_v15 }
 0x66c   :  { %1748 = vpow2.f32 %v1238_v54 }
 0x66d   :  { %1750 = vtanh.f32 %v1224_v30 }
 0x674   :  { %v1745_v47 = vpop.eup %1744 }
 0x675   :  { %v1747_v51 = vpop.eup %1746  ;;  %v1229_v4 = vadd.f32 1.0, %v1745_v47  ;;  %v2774_v47 = vld [vmem:[#allocation43_spill] sm:$0xff] }
 0x676   :  { %v1234_v1 = vadd.f32 1.0, %v1747_v51  ;;  %v1749_v38 = vpop.eup %1748 }
 0x677   :  { %1752 = vrcp.f32 %v1229_v4  ;;  %v1751_v3 = vpop.eup %1750  ;;  %v1240_v10 = vadd.f32 1.0, %v1749_v38 }
 0x678   :  { %1754 = vrcp.f32 %v1234_v1 }
 0x679   :  { %1756 = vrcp.f32 %v1240_v10 }
 0x681   :  { %v1753_v5 = vpop.eup %1752 }
 0x682   :  { %v1755_v6 = vpop.eup %1754  ;;  %v1243_v2 = vmul.f32 %v1753_v5, %v1751_v3 }
 0x683   :  { %v1242_v24 = vmul.f32 %v1755_v6, %v2524_v45  ;;  %v1757_v26 = vpop.eup %1756 }
 0x685   :  { %v2622_v25 = vadd.f32 %v1243_v2, %v1242_v24 }
 0x687   :  { %1758 = vtanh.f32 %v2622_v25 }
 0x691   :  { %v1759_v27 = vpop.eup %1758 }
 0x692   :  { %v1246_v28 = vmul.f32 %v1759_v27, %v1757_v26 }
 0x694   :  { %v1247_v30 = vpack.c.bf16 %v1246_v28, %v1246_v28 }
 0x696   :  { %1249 = vst [vmem:[#allocation13 + $0x14] sm:$0xf] %v1247_v30  ;;  %1290 = vmatmul.mubr.bf16.vlgmr.msra.gmra.mrb[40].mxu0 %v1247_v30  ;;  %1331 = vmatmul.mubr.bf16.vlgmr.msra.gmra.mrb[40].mxu1 %v1247_v30 }
 0x697   :  { %1375 = vmatpush1.bf16.msra.mxu0 %v2477_v61  ;;  %1416 = vmatpush1.bf16.msra.mxu1 %v2480_v49  ;;  %v2767_v49 = vld [vmem:[#allocation36_spill] sm:$0xff] }
 0x698   :  { %1376 = vmatprep.subr.bf16.mxu0 %v2529_v8  ;;  %1417 = vmatprep.subr.bf16.mxu1 %v2532_v62  ;;  %v2768_v8 = vld [vmem:[#allocation37_spill] sm:$0xff] }
 0x699   :  { %1406 = vmatprep.mubr.bf16.mxu0 %v2752_v46  ;;  %1447 = vmatprep.mubr.bf16.mxu1 %v2752_v46 }
 0x69b   :  { %1377 = vmatpush1.bf16.msra.mxu0 %v2537_v11  ;;  %1418 = vmatpush1.bf16.msra.mxu1 %v2540_v29 }
 0x69c   :  { %1378 = vmatprep.subr.bf16.mxu0 %v2543_v50  ;;  %1419 = vmatprep.subr.bf16.mxu1 %v2546_v7  ;;  %v2769_v50 = vld [vmem:[#allocation38_spill] sm:$0xff] }
 0x69f   :  { %1379 = vmatpush1.bf16.msra.mxu0 %v2549_v53  ;;  %1420 = vmatpush1.bf16.msra.mxu1 %v2552_v48  ;;  %v2770_v53 = vld [vmem:[#allocation39_spill] sm:$0xff] }
 0x6a0   :  { %1380 = vmatprep.subr.bf16.mxu0 %v2555_v63  ;;  %1421 = vmatprep.subr.bf16.mxu1 %v2558_v55 }
 0x6a3   :  { %1381 = vmatpush1.bf16.msra.mxu0 %v2561_v58  ;;  %1422 = vmatpush1.bf16.msra.mxu1 %v2564_v9 }
 0x6a4   :  { %1382 = vmatprep.subr.bf16.mxu0 %v2567_v20  ;;  %1423 = vmatprep.subr.bf16.mxu1 %v2570_v56 }
 0x6a7   :  { %1383 = vmatpush1.bf16.msra.mxu0 %v2573_v59  ;;  %1424 = vmatpush1.bf16.msra.mxu1 %v2576_v60 }
 0x6a8   :  { %1384 = vmatprep.subr.bf16.mxu0 %v2579_v57  ;;  %1425 = vmatprep.subr.bf16.mxu1 %v2582_v12 }
 0x6ab   :  { %1385 = vmatpush1.bf16.msra.mxu0 %v2585_v13  ;;  %1426 = vmatpush1.bf16.msra.mxu1 %v2588_v52 }
 0x6ac   :  { %1386 = vmatprep.subr.bf16.mxu0 %v2591_v0  ;;  %1427 = vmatprep.subr.bf16.mxu1 %v2594_v16 }
 0x6af   :  { %1387 = vmatpush1.bf16.msra.mxu0 %v2597_v17  ;;  %1428 = vmatpush1.bf16.msra.mxu1 %v2600_v18 }
 0x6b0   :  { %1388 = vmatprep.subr.bf16.mxu0 %v2603_v19  ;;  %1429 = vmatprep.subr.bf16.mxu1 %v2606_v21 }
 0x6b3   :  { %1389 = vmatpush1.bf16.msra.mxu0 %v2609_v22  ;;  %1430 = vmatpush1.bf16.msra.mxu1 %v2612_v23 }
 0x769   :  { %v1291_v46 = vpop.f32.mrb[40].mxu0  ;;  %v1332_v61 = vpop.f32.mrb[40].mxu1 }
 0x76a   :  { %v1339_v45 = vadd.f32 %v1291_v46, %v2767_v49  ;;  %v1341_v62 = vadd.f32 %v1332_v61, %v2768_v8  ;;  %v1293_v11 = vpop.f32.mrb[41].mxu0  ;;  %v1334_v29 = vpop.f32.mrb[41].mxu1 }
 0x76b   :  { %v1340_v7 = vadd.f32 %v1293_v11, %v2769_v50  ;;  %v1342_v48 = vadd.f32 %v1334_v29, %v2770_v53  ;;  %v1295_v63 = vpop.f32.mrb[42].mxu0  ;;  %v1336_v55 = vpop.f32.mrb[42].mxu1 }
 0x76c   :  { %v1343_v58 = vsub.f32 0.0, %v1339_v45  ;;  %v1296_v9 = vpop.f32.mrb[43].mxu0  ;;  %v1337_v20 = vpop.f32.mrb[43].mxu1 }
 0x76d   :  { %v1348_v56 = vsub.f32 0.0, %v1340_v7  ;;  %v1354_v57 = vsub.f32 0.0, %v1342_v48 }
 0x76e   :  { %v1344_v59 = vmul.f32 1.442695, %v1343_v58 }
 0x76f   :  { %v1349_v60 = vmul.f32 1.442695, %v1348_v56  ;;  %v1355_v12 = vmul.f32 1.442695, %v1354_v57 }
 0x770   :  { %1760 = vpow2.f32 %v1344_v59 }
 0x771   :  { %1762 = vpow2.f32 %v1349_v60 }
 0x772   :  { %1764 = vpow2.f32 %v1355_v12 }
 0x773   :  { %1766 = vtanh.f32 %v1341_v62 }
 0x77a   :  { %v1761_v13 = vpop.eup %1760 }
 0x77b   :  { %v1763_v52 = vpop.eup %1762  ;;  %v1346_v0 = vadd.f32 1.0, %v1761_v13 }
 0x77c   :  { %v1351_v16 = vadd.f32 1.0, %v1763_v52  ;;  %v1765_v17 = vpop.eup %1764 }
 0x77d   :  { %1768 = vrcp.f32 %v1346_v0  ;;  %v1767_v18 = vpop.eup %1766  ;;  %v1357_v23 = vadd.f32 1.0, %v1765_v17 }
 0x77e   :  { %1770 = vrcp.f32 %v1351_v16 }
 0x77f   :  { %1772 = vrcp.f32 %v1357_v23 }
 0x787   :  { %v1769_v19 = vpop.eup %1768 }
 0x788   :  { %v1771_v21 = vpop.eup %1770  ;;  %v1360_v22 = vmul.f32 %v1769_v19, %v1767_v18 }
 0x789   :  { %v1359_v31 = vmul.f32 %v1771_v21, %v2622_v25  ;;  %v1773_v33 = vpop.eup %1772 }
 0x78b   :  { %v1361_v32 = vadd.f32 %v1360_v22, %v1359_v31 }
 0x78d   :  { %1774 = vtanh.f32 %v1361_v32 }
 0x797   :  { %v1775_v34 = vpop.eup %1774 }
 0x798   :  { %v1363_v35 = vmul.f32 %v1775_v34, %v1773_v33 }
 0x79a   :  { %v1364_v36 = vpack.c.bf16 %v1363_v35, %v1363_v35 }
 0x79c   :  { %1366 = vst [vmem:[#allocation13 + $0x18] sm:$0xf] %v1364_v36  ;;  %1407 = vmatmul.mubr.bf16.vlgmr.msra.gmra.mrb[44].mxu0 %v1364_v36  ;;  %1448 = vmatmul.mubr.bf16.vlgmr.msra.gmra.mrb[44].mxu1 %v1364_v36 }
 0x86f   :  { %v1408_v37 = vpop.f32.mrb[44].mxu0  ;;  %v1449_v39 = vpop.f32.mrb[44].mxu1 }
 0x870   :  { %v1456_v41 = vadd.f32 %v1408_v37, %v2771_v40  ;;  %v1458_v14 = vadd.f32 %v1449_v39, %v2772_v42  ;;  %v1410_v43 = vpop.f32.mrb[45].mxu0  ;;  %v1451_v15 = vpop.f32.mrb[45].mxu1 }
 0x871   :  { %v1457_v54 = vadd.f32 %v1410_v43, %v2773_v44  ;;  %v1459_v51 = vadd.f32 %v1451_v15, %v2774_v47  ;;  %v1412_v4 = vpop.f32.mrb[46].mxu0  ;;  %v1453_v1 = vpop.f32.mrb[46].mxu1 }
 0x872   :  { %v1460_v38 = vsub.f32 0.0, %v1456_v41  ;;  %v1413_v3 = vpop.f32.mrb[47].mxu0  ;;  %v1454_v5 = vpop.f32.mrb[47].mxu1 }
 0x873   :  { %v1465_v6 = vsub.f32 0.0, %v1457_v54  ;;  %v1471_v24 = vsub.f32 0.0, %v1459_v51 }
 0x874   :  { %v1461_v2 = vmul.f32 1.442695, %v1460_v38 }
 0x875   :  { %v1466_v10 = vmul.f32 1.442695, %v1465_v6  ;;  %v1472_v25 = vmul.f32 1.442695, %v1471_v24 }
 0x876   :  { %1776 = vpow2.f32 %v1461_v2 }
 0x877   :  { %1778 = vpow2.f32 %v1466_v10 }
 0x878   :  { %1780 = vpow2.f32 %v1472_v25 }
 0x879   :  { %1782 = vtanh.f32 %v1458_v14 }
 0x880   :  { %v1777_v26 = vpop.eup %1776 }
 0x881   :  { %v1779_v27 = vpop.eup %1778  ;;  %v1463_v28 = vadd.f32 1.0, %v1777_v26 }
 0x882   :  { %v1468_v30 = vadd.f32 1.0, %v1779_v27  ;;  %v1781_v46 = vpop.eup %1780 }
 0x883   :  { %1784 = vrcp.f32 %v1463_v28  ;;  %v1783_v61 = vpop.eup %1782  ;;  %v1474_v62 = vadd.f32 1.0, %v1781_v46 }
 0x884   :  { %1786 = vrcp.f32 %v1468_v30 }
 0x885   :  { %1788 = vrcp.f32 %v1474_v62 }
 0x88d   :  { %v1785_v49 = vpop.eup %1784 }
 0x88e   :  { %v1787_v45 = vpop.eup %1786  ;;  %v1477_v8 = vmul.f32 %v1785_v49, %v1783_v61 }
 0x88f   :  { %v1476_v11 = vmul.f32 %v1787_v45, %v1361_v32  ;;  %v1789_v50 = vpop.eup %1788 }
 0x891   :  { %v1478_v29 = vadd.f32 %v1477_v8, %v1476_v11 }
 0x893   :  { %1790 = vtanh.f32 %v1478_v29  ;;  %1492 = vst [vmem:[#allocation16] sm:$0xff] %v1478_v29 }
 0x89d   :  { %v1791_v7 = vpop.eup %1790 }
 0x89e   :  { %v1480_v53 = vmul.f32 %v1791_v7, %v1789_v50 }
 0x8a0   :  { %v1481_v48 = vpack.c.bf16 %v1480_v53, %v1480_v53  ;;  %1490 = vst [vmem:[#allocation14] sm:$0xff] %v1480_v53 }
 0x8a1   :  { %1923 = shalt.err (!%p1920_p8)
}
 0x8a2   :  { %s1924_s20 = scalar_lea.hbm %s2726_s7, 128 }
 0x8a3   :  { %p1925_p9 = scmp.ne.s32.totalorder %s2726_s7, %s1924_s20  ;;  %p1928_p10 = scmp.lt.u32.totalorder %s1924_s20, %s2726_s7 }
 0x8a5   :  { %p1930_p11 = pnand %p1928_p10, %p1925_p9 }
 0x8a7   :  { %1933 = shalt.err (!%p1930_p11)
}
 0x8a8   :  { %1514 = dma.vmem_to_hbm [thread:$0]  %s1512_s14, 128, %s2726_s7, [#allocation15]   ;;  %1483 = vst [vmem:[#allocation13 + $0x1c] sm:$0xf] %v1481_v48 }
 0x8a9   :  { %s1934_s28 = scalar_lea.vmem %s2666_s16, 128  ;;  %p1939_p13 = scmp.lt.s32.totalorder %s2666_s16, %s2666_s16 }
 0x8aa   :  { %p1935_p12 = scmp.ne.s32.totalorder %s2666_s16, %s1934_s28  ;;  %p1940_p0 = scmp.lt.s32.totalorder %s1934_s28, %s1934_s28 }
 0x8ac   :  { %p1941_p1 = por %p1940_p0, %p1939_p13 }
 0x8ae   :  { %p1942_p2 = pnand %p1941_p1, %p1935_p12 }
 0x8b0   :  { %1945 = shalt.err (!%p1942_p2)
}
 0x8b1   :  { %s1946_s9 = scalar_lea.hbm %s2727_s8, 128 }
 0x8b2   :  { %p1947_p3 = scmp.ne.s32.totalorder %s2727_s8, %s1946_s9  ;;  %p1950_p4 = scmp.lt.u32.totalorder %s1946_s9, %s2727_s8 }
 0x8b4   :  { %p1952_p5 = pnand %p1950_p4, %p1947_p3 }
 0x8b6   :  { %1955 = shalt.err (!%p1952_p5)
}
 0x8b7   :  { %1524 = dma.vmem_to_hbm [thread:$0]  %s2666_s16, 128, %s2727_s8, [#allocation15]  }
 0x8b8   :  { %s1956_s13 = scalar_lea.vmem %s2668_s18, 512  ;;  %p1961_p7 = scmp.lt.s32.totalorder %s2668_s18, %s2668_s18 }
 0x8b9   :  { %p1957_p6 = scmp.ne.s32.totalorder %s2668_s18, %s1956_s13  ;;  %p1962_p8 = scmp.lt.s32.totalorder %s1956_s13, %s1956_s13 }
 0x8bb   :  { %p1963_p9 = por %p1962_p8, %p1961_p7 }
 0x8bd   :  { %p1964_p10 = pnand %p1963_p9, %p1957_p6 }
 0x8bf   :  { %1967 = shalt.err (!%p1964_p10)
}
 0x8c0   :  { %s1968_s15 = scalar_lea.hbm %s2725_s6, 512 }
 0x8c1   :  { %p1969_p11 = scmp.ne.s32.totalorder %s2725_s6, %s1968_s15  ;;  %p1972_p12 = scmp.lt.u32.totalorder %s1968_s15, %s2725_s6 }
 0x8c3   :  { %p1974_p13 = pnand %p1972_p12, %p1969_p11 }
 0x8c5   :  { %1977 = shalt.err (!%p1974_p13)
}
 0x8c6   :  { %1504 = dma.vmem_to_hbm [thread:$0]  %s2668_s18, 512, %s2725_s6, [#allocation7], %s1990_s1, %s1990_s1, %s1991_s27  }
 0x8c7   :  { %1984 = dma.done.wait [#allocation7], 512  }
 0x8c8   :  { %1985 = vsyncadd [#allocation7], 4294966784 }
 0x8c9   :  { %1986 = dma.done.wait [#allocation15], 256  }
 0x8ca   :  { %1987 = vsyncadd [#allocation15], 4294967040 }
 0x8cb   :  { %1534 = vsyncpa [#allocation6], 1 }
 0x8cc   :  { %1535 = vsyncpa [#allocation9], 1 }
 0x8cd   :  { %1536 = vsyncpa [#allocation12], 1 }
 0x8ce   :  { %1537 = vsyncpa [#allocation7], 1 }
 0x8cf   :  { %1538 = vsyncpa [#allocation15], 1 }

// kernel: tpu_custom_call.1
= control target key start
LH: loop header
LB: loop body
LE: loop exit
PB: predicated region body
PF: predicated region fallthrough
CT: control target
= control target key end

     0   :  { %14 = vsyncpa [#allocation6], 0  ;;  %s2719_s0 = inlined_call_operand.hbm [shape: bf16[8,8,8], index: 0, kind: input, shape index: {}]   ;;  %s2720_s1 = inlined_call_operand.hbm [shape: bf16[8,512], index: 1, kind: input, shape index: {}]   ;;  %s2721_s2 = inlined_call_operand.hbm [shape: f32[1,512], index: 2, kind: input, shape index: {}]   ;;  %s2722_s3 = inlined_call_operand.hbm [shape: bf16[128,512], index: 3, kind: input, shape index: {}]   ;;  %s2723_s4 = inlined_call_operand.vmem [shape: f32[8,128], index: 4, kind: input, shape index: {}]   ;;  %s2724_s5 = inlined_call_operand.vmem [shape: f32[8,128], index: 5, kind: input, shape index: {}]   ;;  %s2725_s6 = inlined_call_operand.hbm [shape: bf16[8,8,128], index: 6, kind: output, shape index: {0}]   ;;  %s2726_s7 = inlined_call_operand.hbm [shape: f32[8,128], index: 7, kind: output, shape index: {1}]   ;;  %s2727_s8 = inlined_call_operand.hbm [shape: f32[8,128], index: 8, kind: output, shape index: {2}]  }
   0x1   :  { %15 = vsyncpa [#allocation9], 0 }
   0x2   :  { %16 = vsyncpa [#allocation12], 0 }
   0x3   :  { %17 = vsyncpa [#allocation7], 0 }
   0x4   :  { %18 = vsyncpa [#allocation15], 0  ;;  %s1988_s27 = smov [#allocation8]   ;;  %s1989_s29 = smov [#allocation5]  }
   0x5   :  { %s37_s28 = sshll.u32 %s1988_s27, 4  ;;  %s24_s30 = sshll.u32 %s1989_s29, 4  ;;  %s38_s28 = int_to_ptr.vmem [resolvable:$true] %s37_s28  ;;  %s2045_s30 = int_to_ptr.vmem [resolvable:$true] %s24_s30 }
   0x6   :  { %s1824_s11 = scalar_lea.hbm %s2720_s1, 256 }
   0x7   :  { %p1825_p0 = scmp.ne.s32.totalorder %s2720_s1, %s1824_s11  ;;  %p1828_p1 = scmp.lt.u32.totalorder %s1824_s11, %s2720_s1 }
   0x9   :  { %p1830_p2 = pnand %p1828_p1, %p1825_p0 }
   0xb   :  { %1833 = shalt.err (!%p1830_p2)
}
   0xc   :  { %s1834_s16 = scalar_lea.vmem %s38_s28, 256  ;;  %p1839_p4 = scmp.lt.s32.totalorder %s38_s28, %s38_s28 }
   0xd   :  { %p1835_p3 = scmp.ne.s32.totalorder %s38_s28, %s1834_s16  ;;  %p1840_p5 = scmp.lt.s32.totalorder %s1834_s16, %s1834_s16 }
   0xf   :  { %p1841_p6 = por %p1840_p5, %p1839_p4 }
  0x11   :  { %p1842_p7 = pnand %p1841_p6, %p1835_p3 }
  0x13   :  { %1845 = shalt.err (!%p1842_p7)
}
  0x14   :  { %40 = dma.hbm_to_vmem [thread:$0]  %s2720_s1, 256, %s38_s28, [#allocation9]  }
  0x15   :  { %s1846_s21 = scalar_lea.hbm %s2719_s0, 512 }
  0x16   :  { %p1847_p8 = scmp.ne.s32.totalorder %s2719_s0, %s1846_s21  ;;  %p1850_p9 = scmp.lt.u32.totalorder %s1846_s21, %s2719_s0 }
  0x18   :  { %p1852_p10 = pnand %p1850_p9, %p1847_p8 }
  0x1a   :  { %1855 = shalt.err (!%p1852_p10)
}
  0x1b   :  { %s1856_s26 = scalar_lea.vmem %s2045_s30, 512  ;;  %p1861_p12 = scmp.lt.s32.totalorder %s2045_s30, %s2045_s30 }
  0x1c   :  { %p1857_p11 = scmp.ne.s32.totalorder %s2045_s30, %s1856_s26  ;;  %p1862_p13 = scmp.lt.s32.totalorder %s1856_s26, %s1856_s26 }
  0x1e   :  { %p1863_p0 = por %p1862_p13, %p1861_p12 }
  0x20   :  { %p1864_p1 = pnand %p1863_p0, %p1857_p11 }
  0x22   :  { %1867 = shalt.err (!%p1864_p1)
}
  0x23   :  { %s1990_s1 = smov 64   ;;  %s1991_s27 = smov 4  }
  0x24   :  { %30 = dma.hbm_to_vmem [thread:$0]  %s2719_s0, 512, %s2045_s30, [#allocation6], %s1990_s1, %s1990_s1, %s1991_s27  }
  0x25   :  { %s1992_s9 = smov [#allocation10]   ;;  %s1993_s11 = smov [#allocation11]  }
  0x26   :  { %s47_s10 = sshll.u32 %s1992_s9, 4  ;;  %s56_s12 = sshll.u32 %s1993_s11, 4  ;;  %s48_s10 = int_to_ptr.vmem [resolvable:$true] %s47_s10  ;;  %s2079_s12 = int_to_ptr.vmem [resolvable:$true] %s56_s12 }
  0x27   :  { %s1868_s15 = scalar_lea.hbm %s2721_s2, 64 }
  0x28   :  { %p1869_p2 = scmp.ne.s32.totalorder %s2721_s2, %s1868_s15  ;;  %p1872_p3 = scmp.lt.u32.totalorder %s1868_s15, %s2721_s2 }
  0x2a   :  { %p1874_p4 = pnand %p1872_p3, %p1869_p2 }
  0x2c   :  { %1877 = shalt.err (!%p1874_p4)
}
  0x2d   :  { %s1878_s0 = scalar_lea.vmem %s48_s10, 64  ;;  %p1883_p6 = scmp.lt.s32.totalorder %s48_s10, %s48_s10 }
  0x2e   :  { %p1879_p5 = scmp.ne.s32.totalorder %s48_s10, %s1878_s0  ;;  %p1884_p7 = scmp.lt.s32.totalorder %s1878_s0, %s1878_s0 }
  0x30   :  { %p1885_p8 = por %p1884_p7, %p1883_p6 }
  0x32   :  { %p1886_p9 = pnand %p1885_p8, %p1879_p5 }
  0x34   :  { %1889 = shalt.err (!%p1886_p9)
}
  0x35   :  { %50 = dma.hbm_to_vmem [thread:$0]  %s2721_s2, 64, %s48_s10, [#allocation9]  }
  0x36   :  { %s1890_s23 = scalar_lea.hbm %s2722_s3, 4096 }
  0x37   :  { %p1891_p10 = scmp.ne.s32.totalorder %s2722_s3, %s1890_s23  ;;  %p1894_p11 = scmp.lt.u32.totalorder %s1890_s23, %s2722_s3 }
  0x39   :  { %p1896_p12 = pnand %p1894_p11, %p1891_p10 }
  0x3b   :  { %1899 = shalt.err (!%p1896_p12)
}
  0x3c   :  { %s1900_s29 = scalar_lea.vmem %s2079_s12, 4096  ;;  %p1905_p0 = scmp.lt.s32.totalorder %s2079_s12, %s2079_s12 }
  0x3d   :  { %p1901_p13 = scmp.ne.s32.totalorder %s2079_s12, %s1900_s29  ;;  %p1906_p1 = scmp.lt.s32.totalorder %s1900_s29, %s1900_s29 }
  0x3f   :  { %p1907_p2 = por %p1906_p1, %p1905_p0 }
  0x41   :  { %p1908_p3 = pnand %p1907_p2, %p1901_p13 }
  0x43   :  { %1911 = shalt.err (!%p1908_p3)
}
  0x44   :  { %s1994_s2 = smov 256   ;;  %s1995_s9 = smov 16  }
  0x45   :  { %62 = dma.hbm_to_vmem [thread:$0]  %s2722_s3, 4096, %s2079_s12, [#allocation12], %s1994_s2, %s1994_s2, %s1995_s9  }
  0x46   :  { %1978 = dma.done.wait [#allocation6], 512  }
  0x47   :  { %1979 = vsyncadd [#allocation6], 4294966784 }
  0x48   :  { %1980 = dma.done.wait [#allocation9], 320  }
  0x49   :  { %1981 = vsyncadd [#allocation9], 4294966976 }
  0x4a   :  { %1982 = dma.done.wait [#allocation12], 4096  }
  0x4b   :  { %1983 = vsyncadd [#allocation12], 4294963200  ;;  %v2728_v0 = vmov 0   ;;  %v96_v1 = vld [vmem:[#allocation8] sm:$0xff]  ;;  %vm163_vm0 = vcmask 1043456   ;;  %v97_v2 = vld [vmem:[#allocation8 + $0x8] sm:$0xff]  ;;  %v100_v47 = vlaneseq }
  0x4c   :  { %208 = vmatprep.mubr.bf16.mxu0 %v2728_v0  ;;  %281 = vmatprep.mubr.bf16.mxu1 %v2728_v0  ;;  %v1551_v3 = vcombine.high %v96_v1, %v96_v1  ;;  %v1553_v4 = vcombine.high %v97_v2, %v97_v2  ;;  %v1550_v5 = vcombine.low %v96_v1, %v96_v1  ;;  %v1612_v7 = vld [vmem:[#allocation5] sm:$0xff]   ;;  %v2112_v8 = vld [vmem:[#allocation11 + $0x4] ss:$16 sps:$4 sm:$0xff]   ;;  %vm150_vm1 = vcmask 64512   ;;  %v2118_v13 = vld [vmem:[#allocation11 + $0x8] ss:$16 sps:$4 sm:$0xff]  }
  0x4d   :  { %v1552_v6 = vcombine.low %v97_v2, %v97_v2  ;;  %v2114_v11 = vld [vmem:[#allocation11 + $0xc] ss:$16 sps:$4 sm:$0xff]   ;;  %v2116_v12 = vld [vmem:[#allocation11] ss:$16 sps:$4 sm:$0xff]   ;;  %v2122_v14 = vld [vmem:[#allocation11 + $0x24] ss:$16 sps:$4 sm:$0xff]  }
  0x4e   :  { %1554 = vmatprep.subr.msk.bf16.mxu0 %vm163_vm0, %v1551_v3  ;;  %1559 = vmatprep.subr.msk.bf16.mxu1 %vm163_vm0, %v1553_v4  ;;  %v165_v9 = vsel %vm163_vm0, %v1550_v5, 0  ;;  %v2124_v15 = vld [vmem:[#allocation11 + $0x2c] ss:$16 sps:$4 sm:$0xff]   ;;  %v2126_v16 = vld [vmem:[#allocation11 + $0x20] ss:$16 sps:$4 sm:$0xff]   ;;  %v1625_v20 = vld [vmem:[#allocation5 + $0x8] sm:$0xff]  }
  0x4f   :  { %v171_v10 = vsel %vm163_vm0, %v1552_v6, 0  ;;  %177 = vmatpush1.bf16.msra.mxu0 %v165_v9  ;;  %v2130_v17 = vld [vmem:[#allocation11 + $0x28] ss:$16 sps:$4 sm:$0xff]   ;;  %v2134_v18 = vld [vmem:[#allocation11 + $0x44] ss:$16 sps:$4 sm:$0xff]   ;;  %v1638_v29 = vld [vmem:[#allocation5 + $0x10] sm:$0xff]  }
  0x50   :  { %250 = vmatpush1.bf16.msra.mxu1 %v171_v10  ;;  %556 = vmatprep.subr.bf16.mxu0 %v2112_v8  ;;  %v2138_v19 = vld [vmem:[#allocation11 + $0x4c] ss:$16 sps:$4 sm:$0xff]   ;;  %v2142_v21 = vld [vmem:[#allocation11 + $0x40] ss:$16 sps:$4 sm:$0xff]   ;;  %v2146_v22 = vld [vmem:[#allocation11 + $0x48] ss:$16 sps:$4 sm:$0xff]  }
  0x51   :  { %597 = vmatprep.subr.bf16.mxu1 %v2114_v11  ;;  %v2148_v23 = vld [vmem:[#allocation11 + $0x64] ss:$16 sps:$4 sm:$0xff]   ;;  %v2152_v24 = vld [vmem:[#allocation11 + $0x6c] ss:$16 sps:$4 sm:$0xff]   ;;  %v2158_v25 = vld [vmem:[#allocation11 + $0x60] ss:$16 sps:$4 sm:$0xff]  }
  0x52   :  { %1555 = vmatmul.mubr.msk.bf16.vlgmr.msra.gmra.mrb[0].mxu0 %vm150_vm1, %v1612_v7  ;;  %v2160_v26 = vld [vmem:[#allocation11 + $0x68] ss:$16 sps:$4 sm:$0xff]   ;;  %v2162_v27 = vld [vmem:[#allocation11 + $0x84] ss:$16 sps:$4 sm:$0xff]   ;;  %v2166_v28 = vld [vmem:[#allocation11 + $0x8c] ss:$16 sps:$4 sm:$0xff]  }
  0x53   :  { %1560 = vmatmul.mubr.msk.bf16.vlgmr.msra.gmra.mrb[0].mxu1 %vm150_vm1, %v1612_v7  ;;  %557 = vmatpush1.bf16.msra.mxu0 %v2116_v12  ;;  %v2170_v30 = vld [vmem:[#allocation11 + $0x80] ss:$16 sps:$4 sm:$0xff]   ;;  %v2172_v31 = vld [vmem:[#allocation11 + $0x88] ss:$16 sps:$4 sm:$0xff]   ;;  %v2176_v32 = vld [vmem:[#allocation11 + $0xa4] ss:$16 sps:$4 sm:$0xff]  }
  0x54   :  { %598 = vmatpush1.bf16.msra.mxu1 %v2118_v13  ;;  %558 = vmatprep.subr.bf16.mxu0 %v2122_v14  ;;  %v2180_v33 = vld [vmem:[#allocation11 + $0xac] ss:$16 sps:$4 sm:$0xff]   ;;  %v2184_v34 = vld [vmem:[#allocation11 + $0xa0] ss:$16 sps:$4 sm:$0xff]   ;;  %v2188_v35 = vld [vmem:[#allocation11 + $0xa8] ss:$16 sps:$4 sm:$0xff]  }
  0x55   :  { %599 = vmatprep.subr.bf16.mxu1 %v2124_v15  ;;  %218 = vmatprep.mubr.bf16.mxu0 %v2728_v0  ;;  %v2192_v36 = vld [vmem:[#allocation11 + $0xc4] ss:$16 sps:$4 sm:$0xff]   ;;  %v2194_v37 = vld [vmem:[#allocation11 + $0xcc] ss:$16 sps:$4 sm:$0xff]   ;;  %v2200_v39 = vld [vmem:[#allocation11 + $0xc0] ss:$16 sps:$4 sm:$0xff]  }
  0x56   :  { %291 = vmatprep.mubr.bf16.mxu1 %v2728_v0  ;;  %v1651_v38 = vld [vmem:[#allocation5 + $0x18] sm:$0xff]   ;;  %v2208_v42 = vld [vmem:[#allocation11 + $0xec] ss:$16 sps:$4 sm:$0xff]   ;;  %v2214_v43 = vld [vmem:[#allocation11 + $0xe0] ss:$16 sps:$4 sm:$0xff]   ;;  %v101_v48 = vshrl.u32 %v100_v47, 7 }
  0x57   :  { %559 = vmatpush1.bf16.msra.mxu0 %v2126_v16  ;;  %v2202_v40 = vld [vmem:[#allocation11 + $0xc8] ss:$16 sps:$4 sm:$0xff]   ;;  %v2206_v41 = vld [vmem:[#allocation11 + $0xe4] ss:$16 sps:$4 sm:$0xff]   ;;  %v84_v45 = vld [vmem:[%s2723_s4] sm:$0xff]  ;;  %s1998_s15 = smov [#allocation16]  }
  0x58   :  { %600 = vmatpush1.bf16.msra.mxu1 %v2130_v17  ;;  %560 = vmatprep.subr.bf16.mxu0 %v2134_v18  ;;  %v2216_v44 = vld [vmem:[#allocation11 + $0xe8] ss:$16 sps:$4 sm:$0xff]   ;;  %v395_v46 = vpack.c.bf16 %v84_v45, %v84_v45  ;;  %v110_v49 = vsub.s32 2, %v101_v48  ;;  %v114_v50 = vsub.s32 3, %v101_v48  ;;  %v102_v51 = vsub.s32 0, %v101_v48  ;;  %s1521_s16 = sshll.u32 %s1998_s15, 4  ;;  %s2666_s16 = int_to_ptr.vmem [resolvable:$true] %s1521_s16 }
  0x59   :  { %601 = vmatprep.subr.bf16.mxu1 %v2138_v19  ;;  %v98_v52 = vld [vmem:[#allocation10] sm:$0xf]  ;;  %v106_v53 = vsub.s32 1, %v101_v48  ;;  %s1999_s17 = smov [#allocation13]  }
  0x5a   :  { %1556 = vmatmul.mubr.msk.bf16.gmra.mrb[4].mxu0 %vm150_vm1, %v1625_v20  ;;  %v2263_v54 = vrot.slane %v98_v52, %v110_v49  ;;  %v2269_v57 = vrot.slane %v98_v52, %v114_v50  ;;  %v103_v58 = vrot.slane %v98_v52, %v102_v51  ;;  %s1498_s18 = sshll.u32 %s1999_s17, 4  ;;  %s2668_s18 = int_to_ptr.vmem [resolvable:$true] %s1498_s18 }
  0x5b   :  { %1561 = vmatmul.mubr.msk.bf16.gmra.mrb[4].mxu1 %vm150_vm1, %v1625_v20  ;;  %561 = vmatpush1.bf16.msra.mxu0 %v2142_v21  ;;  %v107_v61 = vrot.slane %v98_v52, %v106_v53 }
  0x5c   :  { %602 = vmatpush1.bf16.msra.mxu1 %v2146_v22  ;;  %562 = vmatprep.subr.bf16.mxu0 %v2148_v23 }
  0x5d   :  { %603 = vmatprep.subr.bf16.mxu1 %v2152_v24  ;;  %228 = vmatprep.mubr.bf16.mxu0 %v2728_v0 }
  0x5e   :  { %301 = vmatprep.mubr.bf16.mxu1 %v2728_v0 }
  0x5f   :  { %563 = vmatpush1.bf16.msra.mxu0 %v2158_v25 }
  0x60   :  { %604 = vmatpush1.bf16.msra.mxu1 %v2160_v26  ;;  %564 = vmatprep.subr.bf16.mxu0 %v2162_v27 }
  0x61   :  { %605 = vmatprep.subr.bf16.mxu1 %v2166_v28 }
  0x62   :  { %1557 = vmatmul.mubr.msk.bf16.gmra.mrb[8].mxu0 %vm150_vm1, %v1638_v29 }
  0x63   :  { %1562 = vmatmul.mubr.msk.bf16.gmra.mrb[8].mxu1 %vm150_vm1, %v1638_v29  ;;  %565 = vmatpush1.bf16.msra.mxu0 %v2170_v30 }
  0x64   :  { %606 = vmatpush1.bf16.msra.mxu1 %v2172_v31  ;;  %566 = vmatprep.subr.bf16.mxu0 %v2176_v32 }
  0x65   :  { %607 = vmatprep.subr.bf16.mxu1 %v2180_v33  ;;  %238 = vmatprep.mubr.bf16.mxu0 %v2728_v0 }
  0x66   :  { %311 = vmatprep.mubr.bf16.mxu1 %v2728_v0 }
  0x67   :  { %567 = vmatpush1.bf16.msra.mxu0 %v2184_v34 }
  0x68   :  { %608 = vmatpush1.bf16.msra.mxu1 %v2188_v35  ;;  %568 = vmatprep.subr.bf16.mxu0 %v2192_v36 }
  0x69   :  { %609 = vmatprep.subr.bf16.mxu1 %v2194_v37 }
  0x6a   :  { %1558 = vmatmul.mubr.msk.bf16.gmra.mrb[12].mxu0 %vm150_vm1, %v1651_v38 }
  0x6b   :  { %1563 = vmatmul.mubr.msk.bf16.gmra.mrb[12].mxu1 %vm150_vm1, %v1651_v38  ;;  %569 = vmatpush1.bf16.msra.mxu0 %v2200_v39 }
  0x6c   :  { %610 = vmatpush1.bf16.msra.mxu1 %v2202_v40  ;;  %570 = vmatprep.subr.bf16.mxu0 %v2206_v41 }
  0x6d   :  { %611 = vmatprep.subr.bf16.mxu1 %v2208_v42  ;;  %588 = vmatprep.mubr.bf16.mxu0 %v2728_v0 }
  0x6e   :  { %629 = vmatprep.mubr.bf16.mxu1 %v2728_v0 }
  0x6f   :  { %571 = vmatpush1.bf16.msra.mxu0 %v2214_v43 }
  0x70   :  { %612 = vmatpush1.bf16.msra.mxu1 %v2216_v44  ;;  %672 = vmatprep.subr.bf16.mxu0 %v2112_v8 }
  0x71   :  { %713 = vmatprep.subr.bf16.mxu1 %v2114_v11 }
  0x72   :  { %589 = vmatmul.mubr.bf16.vlgmr.msra.gmra.mrb[16].mxu0 %v395_v46 }
  0x73   :  { %630 = vmatmul.mubr.bf16.vlgmr.msra.gmra.mrb[16].mxu1 %v395_v46  ;;  %673 = vmatpush1.bf16.msra.mxu0 %v2116_v12 }
  0x74   :  { %714 = vmatpush1.bf16.msra.mxu1 %v2118_v13  ;;  %674 = vmatprep.subr.bf16.mxu0 %v2122_v14 }
  0x75   :  { %715 = vmatprep.subr.bf16.mxu1 %v2124_v15  ;;  %704 = vmatprep.mubr.bf16.mxu0 %v2728_v0 }
  0x76   :  { %745 = vmatprep.mubr.bf16.mxu1 %v2728_v0 }
  0x77   :  { %675 = vmatpush1.bf16.msra.mxu0 %v2126_v16 }
  0x78   :  { %716 = vmatpush1.bf16.msra.mxu1 %v2130_v17  ;;  %676 = vmatprep.subr.bf16.mxu0 %v2134_v18 }
  0x79   :  { %717 = vmatprep.subr.bf16.mxu1 %v2138_v19 }
  0x7b   :  { %677 = vmatpush1.bf16.msra.mxu0 %v2142_v21 }
  0x7c   :  { %718 = vmatpush1.bf16.msra.mxu1 %v2146_v22  ;;  %678 = vmatprep.subr.bf16.mxu0 %v2148_v23 }
  0x7d   :  { %719 = vmatprep.subr.bf16.mxu1 %v2152_v24 }
  0x7f   :  { %679 = vmatpush1.bf16.msra.mxu0 %v2158_v25 }
  0x80   :  { %720 = vmatpush1.bf16.msra.mxu1 %v2160_v26  ;;  %680 = vmatprep.subr.bf16.mxu0 %v2162_v27 }
  0x81   :  { %721 = vmatprep.subr.bf16.mxu1 %v2166_v28 }
  0x83   :  { %681 = vmatpush1.bf16.msra.mxu0 %v2170_v30 }
  0x84   :  { %722 = vmatpush1.bf16.msra.mxu1 %v2172_v31  ;;  %682 = vmatprep.subr.bf16.mxu0 %v2176_v32 }
  0x85   :  { %723 = vmatprep.subr.bf16.mxu1 %v2180_v33 }
  0x87   :  { %683 = vmatpush1.bf16.msra.mxu0 %v2184_v34 }
  0x88   :  { %724 = vmatpush1.bf16.msra.mxu1 %v2188_v35  ;;  %684 = vmatprep.subr.bf16.mxu0 %v2192_v36 }
  0x89   :  { %725 = vmatprep.subr.bf16.mxu1 %v2194_v37 }
  0x8b   :  { %685 = vmatpush1.bf16.msra.mxu0 %v2200_v39 }
  0x8c   :  { %726 = vmatpush1.bf16.msra.mxu1 %v2202_v40  ;;  %686 = vmatprep.subr.bf16.mxu0 %v2206_v41 }
  0x8d   :  { %727 = vmatprep.subr.bf16.mxu1 %v2208_v42 }
  0x8f   :  { %687 = vmatpush1.bf16.msra.mxu0 %v2214_v43 }
  0x90   :  { %728 = vmatpush1.bf16.msra.mxu1 %v2216_v44  ;;  %789 = vmatprep.subr.bf16.mxu0 %v2112_v8 }
  0x91   :  { %830 = vmatprep.subr.bf16.mxu1 %v2114_v11 }
 0x125   :  { %v2265_v55 = vpop.f32.mrb[0].mxu0 }
 0x126   :  { %v2267_v56 = vpop.f32.mrb[0].mxu1  ;;  %v212_v59 = vpop.f32.mrb[1].mxu0 }
 0x127   :  { %v285_v60 = vpop.f32.mrb[1].mxu1  ;;  %v214_v62 = vpop.f32.mrb[2].mxu0 }
 0x128   :  { %v287_v63 = vpop.f32.mrb[2].mxu1  ;;  %v2271_v1 = vadd.f32 %v214_v62, %v103_v58  ;;  %v216_v2 = vpop.f32.mrb[3].mxu0 }
 0x129   :  { %v2274_v3 = vadd.f32 %v287_v63, %v2263_v54  ;;  %v289_v4 = vpop.f32.mrb[3].mxu1  ;;  %v2276_v5 = vadd.f32 %v216_v2, %v107_v61 }
 0x12a   :  { %v2279_v6 = vadd.f32 %v289_v4, %v2269_v57 }
 0x12d   :  { %v220_v7 = vpop.f32.mrb[4].mxu0 }
 0x12e   :  { %v293_v9 = vpop.f32.mrb[4].mxu1  ;;  %v2281_v10 = vadd.f32 %v220_v7, %v103_v58  ;;  %v222_v20 = vpop.f32.mrb[5].mxu0 }
 0x12f   :  { %v2284_v29 = vadd.f32 %v293_v9, %v2263_v54  ;;  %v295_v38 = vpop.f32.mrb[5].mxu1  ;;  %v2286_v45 = vadd.f32 %v222_v20, %v107_v61  ;;  %v224_v46 = vpop.f32.mrb[6].mxu0 }
 0x130   :  { %v2289_v47 = vadd.f32 %v295_v38, %v2269_v57  ;;  %v297_v48 = vpop.f32.mrb[6].mxu1  ;;  %v2291_v49 = vadd.f32 %v224_v46, %v103_v58  ;;  %v226_v50 = vpop.f32.mrb[7].mxu0 }
 0x131   :  { %2730 = vst [vmem:[#allocation22_spill] sm:$0xff] %v2286_v45  ;;  %v2294_v51 = vadd.f32 %v297_v48, %v2263_v54  ;;  %v299_v52 = vpop.f32.mrb[7].mxu1  ;;  %v2296_v53 = vadd.f32 %v226_v50, %v107_v61 }
 0x132   :  { %2731 = vst [vmem:[#allocation23_spill] sm:$0xff] %v2289_v47  ;;  %2732 = vst [vmem:[#allocation24_spill] sm:$0xff] %v2291_v49  ;;  %v2299_v62 = vadd.f32 %v299_v52, %v2269_v57 }
 0x133   :  { %2733 = vst [vmem:[#allocation25_spill] sm:$0xff] %v2294_v51  ;;  %2734 = vst [vmem:[#allocation26_spill] sm:$0xff] %v2296_v53 }
 0x134   :  { %2735 = vst [vmem:[#allocation27_spill] sm:$0xff] %v2299_v62 }
 0x135   :  { %v230_v63 = vpop.f32.mrb[8].mxu0 }
 0x136   :  { %v303_v2 = vpop.f32.mrb[8].mxu1  ;;  %v2301_v4 = vadd.f32 %v230_v63, %v103_v58  ;;  %v232_v7 = vpop.f32.mrb[9].mxu0 }
 0x137   :  { %v2304_v9 = vadd.f32 %v303_v2, %v2263_v54  ;;  %v305_v20 = vpop.f32.mrb[9].mxu1  ;;  %v2306_v38 = vadd.f32 %v232_v7, %v107_v61  ;;  %v234_v46 = vpop.f32.mrb[10].mxu0 }
 0x138   :  { %2736 = vst [vmem:[#allocation28_spill] sm:$0xff] %v2301_v4  ;;  %v2309_v48 = vadd.f32 %v305_v20, %v2269_v57  ;;  %v307_v50 = vpop.f32.mrb[10].mxu1  ;;  %v2311_v0 = vadd.f32 %v234_v46, %v103_v58  ;;  %v236_v52 = vpop.f32.mrb[11].mxu0 }
 0x139   :  { %2737 = vst [vmem:[#allocation29_spill] sm:$0xff] %v2304_v9  ;;  %2738 = vst [vmem:[#allocation30_spill] sm:$0xff] %v2306_v38  ;;  %v2314_v62 = vadd.f32 %v307_v50, %v2263_v54  ;;  %v309_v63 = vpop.f32.mrb[11].mxu1  ;;  %v2316_v4 = vadd.f32 %v236_v52, %v107_v61 }
 0x13a   :  { %2739 = vst [vmem:[#allocation31_spill] sm:$0xff] %v2309_v48  ;;  %2740 = vst [vmem:[#allocation32_spill] sm:$0xff] %v2311_v0  ;;  %v2319_v2 = vadd.f32 %v309_v63, %v2269_v57 }
 0x13b   :  { %2741 = vst [vmem:[#allocation33_spill] sm:$0xff] %v2314_v62  ;;  %2742 = vst [vmem:[#allocation34_spill] sm:$0xff] %v2316_v4 }
 0x13c   :  { %2743 = vst [vmem:[#allocation35_spill] sm:$0xff] %v2319_v2 }
 0x13d   :  { %v240_v9 = vpop.f32.mrb[12].mxu0 }
 0x13e   :  { %v313_v7 = vpop.f32.mrb[12].mxu1  ;;  %v2321_v38 = vadd.f32 %v240_v9, %v103_v58  ;;  %v242_v53 = vpop.f32.mrb[13].mxu0 }
 0x13f   :  { %v2324_v20 = vadd.f32 %v313_v7, %v2263_v54  ;;  %v315_v46 = vpop.f32.mrb[13].mxu1  ;;  %v2326_v0 = vadd.f32 %v242_v53, %v107_v61  ;;  %v244_v48 = vpop.f32.mrb[14].mxu0  ;;  %v211_v53 = vadd.f32 %v2265_v55, %v103_v58 }
 0x140   :  { %2744 = vst [vmem:[#allocation36_spill] sm:$0xff] %v2321_v38  ;;  %v2329_v50 = vadd.f32 %v315_v46, %v2269_v57  ;;  %v317_v52 = vpop.f32.mrb[14].mxu1  ;;  %v2331_v4 = vadd.f32 %v244_v48, %v103_v58  ;;  %v246_v63 = vpop.f32.mrb[15].mxu0  ;;  %v213_v46 = vadd.f32 %v212_v59, %v107_v61 }
 0x141   :  { %2745 = vst [vmem:[#allocation37_spill] sm:$0xff] %v2324_v20  ;;  %2746 = vst [vmem:[#allocation38_spill] sm:$0xff] %v2326_v0  ;;  %v2334_v2 = vadd.f32 %v317_v52, %v2263_v54  ;;  %v319_v9 = vpop.f32.mrb[15].mxu1  ;;  %v2336_v38 = vadd.f32 %v246_v63, %v107_v61  ;;  %v284_v0 = vadd.f32 %v2267_v56, %v2263_v54 }
 0x142   :  { %2747 = vst [vmem:[#allocation39_spill] sm:$0xff] %v2329_v50  ;;  %2748 = vst [vmem:[#allocation40_spill] sm:$0xff] %v2331_v4  ;;  %v2339_v7 = vadd.f32 %v319_v9, %v2269_v57  ;;  %v286_v50 = vadd.f32 %v285_v60, %v2269_v57 }
 0x143   :  { %2749 = vst [vmem:[#allocation41_spill] sm:$0xff] %v2334_v2  ;;  %2750 = vst [vmem:[#allocation42_spill] sm:$0xff] %v2336_v38 }
 0x144   :  { %2751 = vst [vmem:[#allocation43_spill] sm:$0xff] %v2339_v7 }
 0x145   :  { %v590_v48 = vpop.f32.mrb[16].mxu0 }
 0x146   :  { %v631_v4 = vpop.f32.mrb[16].mxu1  ;;  %v638_v20 = vadd.f32 %v590_v48, %v211_v53  ;;  %v592_v52 = vpop.f32.mrb[17].mxu0 }
 0x147   :  { %v640_v62 = vadd.f32 %v631_v4, %v284_v0  ;;  %v633_v2 = vpop.f32.mrb[17].mxu1  ;;  %v639_v51 = vadd.f32 %v592_v52, %v213_v46  ;;  %v594_v38 = vpop.f32.mrb[18].mxu0  ;;  %v2752_v46 = vmov 0  }
 0x148   :  { %v641_v63 = vadd.f32 %v633_v2, %v286_v50  ;;  %v635_v49 = vpop.f32.mrb[18].mxu1  ;;  %v642_v9 = vsub.f32 0.0, %v638_v20  ;;  %v595_v7 = vpop.f32.mrb[19].mxu0 }
 0x149   :  { %v636_v47 = vpop.f32.mrb[19].mxu1  ;;  %v647_v55 = vsub.f32 0.0, %v639_v51 }
 0x14a   :  { %v643_v58 = vmul.f32 1.442695, %v642_v9  ;;  %v653_v54 = vsub.f32 0.0, %v641_v63  ;;  %v86_v47 = vld [vmem:[%s2724_s5] sm:$0xff]  ;;  %s1997_s5 = smov [#allocation14]  }
 0x14b   :  { %v648_v45 = vmul.f32 1.442695, %v647_v55  ;;  %s1511_s14 = sshll.u32 %s1997_s5, 4  ;;  %s1512_s14 = int_to_ptr.vmem [resolvable:$true] %s1511_s14 }
 0x14c   :  { %1664 = vpow2.f32 %v643_v58  ;;  %v654_v56 = vmul.f32 1.442695, %v653_v54  ;;  %s1912_s19 = scalar_lea.vmem %s1512_s14, 128  ;;  %p1917_p5 = scmp.lt.s32.totalorder %s1512_s14, %s1512_s14 }
 0x14d   :  { %1666 = vpow2.f32 %v648_v45  ;;  %p1913_p4 = scmp.ne.s32.totalorder %s1512_s14, %s1912_s19  ;;  %p1918_p6 = scmp.lt.s32.totalorder %s1912_s19, %s1912_s19 }
 0x14e   :  { %1668 = vpow2.f32 %v654_v56 }
 0x14f   :  { %1670 = vtanh.f32 %v640_v62  ;;  %p1919_p7 = por %p1918_p6, %p1917_p5 }
 0x151   :  { %p1920_p8 = pnand %p1919_p7, %p1913_p4 }
 0x156   :  { %v1665_v57 = vpop.eup %1664 }
 0x157   :  { %v1667_v59 = vpop.eup %1666  ;;  %v645_v60 = vadd.f32 1.0, %v1665_v57 }
 0x158   :  { %v650_v0 = vadd.f32 1.0, %v1667_v59  ;;  %v1669_v61 = vpop.eup %1668 }
 0x159   :  { %1672 = vrcp.f32 %v645_v60  ;;  %v1671_v49 = vpop.eup %1670  ;;  %v656_v45 = vadd.f32 1.0, %v1669_v61 }
 0x15a   :  { %1674 = vrcp.f32 %v650_v0 }
 0x15b   :  { %1676 = vrcp.f32 %v656_v45 }
 0x163   :  { %v1673_v51 = vpop.eup %1672 }
 0x164   :  { %v1675_v4 = vpop.eup %1674  ;;  %v659_v38 = vmul.f32 %v1673_v51, %v1671_v49 }
 0x165   :  { %v658_v2 = vmul.f32 %v1675_v4, %v86_v47  ;;  %v1677_v62 = vpop.eup %1676 }
 0x167   :  { %v2348_v20 = vadd.f32 %v659_v38, %v658_v2 }
 0x169   :  { %1678 = vtanh.f32 %v2348_v20 }
 0x173   :  { %v1679_v50 = vpop.eup %1678 }
 0x174   :  { %v662_v7 = vmul.f32 %v1679_v50, %v1677_v62 }
 0x176   :  { %v663_v53 = vpack.c.bf16 %v662_v7, %v662_v7 }
 0x178   :  { %664 = vst [vmem:[#allocation13] sm:$0xf] %v663_v53  ;;  %705 = vmatmul.mubr.bf16.vlgmr.msra.gmra.mrb[20].mxu0 %v663_v53  ;;  %746 = vmatmul.mubr.bf16.vlgmr.msra.gmra.mrb[20].mxu1 %v663_v53 }
 0x179   :  { %790 = vmatpush1.bf16.msra.mxu0 %v2116_v12  ;;  %831 = vmatpush1.bf16.msra.mxu1 %v2118_v13 }
 0x17a   :  { %791 = vmatprep.subr.bf16.mxu0 %v2122_v14  ;;  %832 = vmatprep.subr.bf16.mxu1 %v2124_v15 }
 0x17b   :  { %821 = vmatprep.mubr.bf16.mxu0 %v2752_v46  ;;  %862 = vmatprep.mubr.bf16.mxu1 %v2752_v46 }
 0x17d   :  { %792 = vmatpush1.bf16.msra.mxu0 %v2126_v16  ;;  %833 = vmatpush1.bf16.msra.mxu1 %v2130_v17 }
 0x17e   :  { %793 = vmatprep.subr.bf16.mxu0 %v2134_v18  ;;  %834 = vmatprep.subr.bf16.mxu1 %v2138_v19 }
 0x181   :  { %794 = vmatpush1.bf16.msra.mxu0 %v2142_v21  ;;  %835 = vmatpush1.bf16.msra.mxu1 %v2146_v22 }
 0x182   :  { %795 = vmatprep.subr.bf16.mxu0 %v2148_v23  ;;  %836 = vmatprep.subr.bf16.mxu1 %v2152_v24 }
 0x185   :  { %796 = vmatpush1.bf16.msra.mxu0 %v2158_v25  ;;  %837 = vmatpush1.bf16.msra.mxu1 %v2160_v26 }
 0x186   :  { %797 = vmatprep.subr.bf16.mxu0 %v2162_v27  ;;  %838 = vmatprep.subr.bf16.mxu1 %v2166_v28 }
 0x189   :  { %798 = vmatpush1.bf16.msra.mxu0 %v2170_v30  ;;  %839 = vmatpush1.bf16.msra.mxu1 %v2172_v31 }
 0x18a   :  { %799 = vmatprep.subr.bf16.mxu0 %v2176_v32  ;;  %840 = vmatprep.subr.bf16.mxu1 %v2180_v33 }
 0x18d   :  { %800 = vmatpush1.bf16.msra.mxu0 %v2184_v34  ;;  %841 = vmatpush1.bf16.msra.mxu1 %v2188_v35 }
 0x18e   :  { %801 = vmatprep.subr.bf16.mxu0 %v2192_v36  ;;  %842 = vmatprep.subr.bf16.mxu1 %v2194_v37 }
 0x191   :  { %802 = vmatpush1.bf16.msra.mxu0 %v2200_v39  ;;  %843 = vmatpush1.bf16.msra.mxu1 %v2202_v40 }
 0x192   :  { %803 = vmatprep.subr.bf16.mxu0 %v2206_v41  ;;  %844 = vmatprep.subr.bf16.mxu1 %v2208_v42 }
 0x195   :  { %804 = vmatpush1.bf16.msra.mxu0 %v2214_v43  ;;  %845 = vmatpush1.bf16.msra.mxu1 %v2216_v44 }
 0x196   :  { %906 = vmatprep.subr.bf16.mxu0 %v2112_v8  ;;  %947 = vmatprep.subr.bf16.mxu1 %v2114_v11 }
 0x24b   :  { %v706_v48 = vpop.f32.mrb[20].mxu0  ;;  %v747_v52 = vpop.f32.mrb[20].mxu1 }
 0x24c   :  { %v754_v63 = vadd.f32 %v706_v48, %v2271_v1  ;;  %v756_v9 = vadd.f32 %v747_v52, %v2274_v3  ;;  %v708_v55 = vpop.f32.mrb[21].mxu0  ;;  %v749_v58 = vpop.f32.mrb[21].mxu1 }
 0x24d   :  { %v755_v54 = vadd.f32 %v708_v55, %v2276_v5  ;;  %v757_v56 = vadd.f32 %v749_v58, %v2279_v6  ;;  %v710_v57 = vpop.f32.mrb[22].mxu0  ;;  %v751_v59 = vpop.f32.mrb[22].mxu1 }
 0x24e   :  { %v758_v60 = vsub.f32 0.0, %v754_v63  ;;  %v711_v0 = vpop.f32.mrb[23].mxu0  ;;  %v752_v61 = vpop.f32.mrb[23].mxu1 }
 0x24f   :  { %v763_v49 = vsub.f32 0.0, %v755_v54  ;;  %v769_v4 = vsub.f32 0.0, %v757_v56  ;;  %v2753_v0 = vld [vmem:[#allocation22_spill] sm:$0xff] }
 0x250   :  { %v759_v47 = vmul.f32 1.442695, %v758_v60 }
 0x251   :  { %v764_v51 = vmul.f32 1.442695, %v763_v49  ;;  %v770_v1 = vmul.f32 1.442695, %v769_v4  ;;  %v2754_v49 = vld [vmem:[#allocation23_spill] sm:$0xff] }
 0x252   :  { %1680 = vpow2.f32 %v759_v47 }
 0x253   :  { %1682 = vpow2.f32 %v764_v51 }
 0x254   :  { %1684 = vpow2.f32 %v770_v1 }
 0x255   :  { %1686 = vtanh.f32 %v756_v9 }
 0x25c   :  { %v1681_v38 = vpop.eup %1680 }
 0x25d   :  { %v1683_v3 = vpop.eup %1682  ;;  %v761_v45 = vadd.f32 1.0, %v1681_v38 }
 0x25e   :  { %v766_v5 = vadd.f32 1.0, %v1683_v3  ;;  %v1685_v6 = vpop.eup %1684 }
 0x25f   :  { %1688 = vrcp.f32 %v761_v45  ;;  %v1687_v2 = vpop.eup %1686  ;;  %v772_v53 = vadd.f32 1.0, %v1685_v6 }
 0x260   :  { %1690 = vrcp.f32 %v766_v5 }
 0x261   :  { %1692 = vrcp.f32 %v772_v53 }
 0x269   :  { %v1689_v62 = vpop.eup %1688 }
 0x26a   :  { %v1691_v50 = vpop.eup %1690  ;;  %v775_v7 = vmul.f32 %v1689_v62, %v1687_v2 }
 0x26b   :  { %v774_v48 = vmul.f32 %v1691_v50, %v2348_v20  ;;  %v1693_v63 = vpop.eup %1692 }
 0x26d   :  { %v2390_v52 = vadd.f32 %v775_v7, %v774_v48 }
 0x26f   :  { %1694 = vtanh.f32 %v2390_v52 }
 0x279   :  { %v1695_v55 = vpop.eup %1694 }
 0x27a   :  { %v778_v58 = vmul.f32 %v1695_v55, %v1693_v63 }
 0x27c   :  { %v779_v9 = vpack.c.bf16 %v778_v58, %v778_v58 }
 0x27e   :  { %781 = vst [vmem:[#allocation13 + $0x4] sm:$0xf] %v779_v9  ;;  %822 = vmatmul.mubr.bf16.vlgmr.msra.gmra.mrb[24].mxu0 %v779_v9  ;;  %863 = vmatmul.mubr.bf16.vlgmr.msra.gmra.mrb[24].mxu1 %v779_v9 }
 0x27f   :  { %907 = vmatpush1.bf16.msra.mxu0 %v2116_v12  ;;  %948 = vmatpush1.bf16.msra.mxu1 %v2118_v13 }
 0x280   :  { %908 = vmatprep.subr.bf16.mxu0 %v2122_v14  ;;  %949 = vmatprep.subr.bf16.mxu1 %v2124_v15 }
 0x281   :  { %938 = vmatprep.mubr.bf16.mxu0 %v2752_v46  ;;  %979 = vmatprep.mubr.bf16.mxu1 %v2752_v46 }
 0x283   :  { %909 = vmatpush1.bf16.msra.mxu0 %v2126_v16  ;;  %950 = vmatpush1.bf16.msra.mxu1 %v2130_v17 }
 0x284   :  { %910 = vmatprep.subr.bf16.mxu0 %v2134_v18  ;;  %951 = vmatprep.subr.bf16.mxu1 %v2138_v19 }
 0x287   :  { %911 = vmatpush1.bf16.msra.mxu0 %v2142_v21  ;;  %952 = vmatpush1.bf16.msra.mxu1 %v2146_v22 }
 0x288   :  { %912 = vmatprep.subr.bf16.mxu0 %v2148_v23  ;;  %953 = vmatprep.subr.bf16.mxu1 %v2152_v24 }
 0x28b   :  { %913 = vmatpush1.bf16.msra.mxu0 %v2158_v25  ;;  %954 = vmatpush1.bf16.msra.mxu1 %v2160_v26 }
 0x28c   :  { %914 = vmatprep.subr.bf16.mxu0 %v2162_v27  ;;  %955 = vmatprep.subr.bf16.mxu1 %v2166_v28 }
 0x28f   :  { %915 = vmatpush1.bf16.msra.mxu0 %v2170_v30  ;;  %956 = vmatpush1.bf16.msra.mxu1 %v2172_v31 }
 0x290   :  { %916 = vmatprep.subr.bf16.mxu0 %v2176_v32  ;;  %957 = vmatprep.subr.bf16.mxu1 %v2180_v33 }
 0x293   :  { %917 = vmatpush1.bf16.msra.mxu0 %v2184_v34  ;;  %958 = vmatpush1.bf16.msra.mxu1 %v2188_v35 }
 0x294   :  { %918 = vmatprep.subr.bf16.mxu0 %v2192_v36  ;;  %959 = vmatprep.subr.bf16.mxu1 %v2194_v37 }
 0x297   :  { %919 = vmatpush1.bf16.msra.mxu0 %v2200_v39  ;;  %960 = vmatpush1.bf16.msra.mxu1 %v2202_v40 }
 0x298   :  { %920 = vmatprep.subr.bf16.mxu0 %v2206_v41  ;;  %961 = vmatprep.subr.bf16.mxu1 %v2208_v42 }
 0x29b   :  { %921 = vmatpush1.bf16.msra.mxu0 %v2214_v43  ;;  %962 = vmatpush1.bf16.msra.mxu1 %v2216_v44 }
 0x29c   :  { %1023 = vmatprep.subr.bf16.mxu0 %v2112_v8  ;;  %1064 = vmatprep.subr.bf16.mxu1 %v2114_v11 }
 0x351   :  { %v823_v20 = vpop.f32.mrb[24].mxu0  ;;  %v864_v54 = vpop.f32.mrb[24].mxu1 }
 0x352   :  { %v871_v56 = vadd.f32 %v823_v20, %v2281_v10  ;;  %v873_v57 = vadd.f32 %v864_v54, %v2284_v29  ;;  %v825_v59 = vpop.f32.mrb[25].mxu0  ;;  %v866_v60 = vpop.f32.mrb[25].mxu1 }
 0x353   :  { %v872_v61 = vadd.f32 %v825_v59, %v2753_v0  ;;  %v874_v47 = vadd.f32 %v866_v60, %v2754_v49  ;;  %v827_v51 = vpop.f32.mrb[26].mxu0  ;;  %v868_v4 = vpop.f32.mrb[26].mxu1 }
 0x354   :  { %v875_v1 = vsub.f32 0.0, %v871_v56  ;;  %v828_v38 = vpop.f32.mrb[27].mxu0  ;;  %v869_v3 = vpop.f32.mrb[27].mxu1  ;;  %v2757_v4 = vld [vmem:[#allocation26_spill] sm:$0xff] }
 0x355   :  { %v880_v45 = vsub.f32 0.0, %v872_v61  ;;  %v886_v2 = vsub.f32 0.0, %v874_v47  ;;  %v2756_v61 = vld [vmem:[#allocation25_spill] sm:$0xff]  ;;  %v2758_v38 = vld [vmem:[#allocation27_spill] sm:$0xff] }
 0x356   :  { %v876_v5 = vmul.f32 1.442695, %v875_v1 }
 0x357   :  { %v881_v6 = vmul.f32 1.442695, %v880_v45  ;;  %v887_v10 = vmul.f32 1.442695, %v886_v2 }
 0x358   :  { %1696 = vpow2.f32 %v876_v5 }
 0x359   :  { %1698 = vpow2.f32 %v881_v6 }
 0x35a   :  { %1700 = vpow2.f32 %v887_v10 }
 0x35b   :  { %1702 = vtanh.f32 %v873_v57 }
 0x362   :  { %v1697_v62 = vpop.eup %1696 }
 0x363   :  { %v1699_v29 = vpop.eup %1698  ;;  %v878_v50 = vadd.f32 1.0, %v1697_v62 }
 0x364   :  { %v883_v7 = vadd.f32 1.0, %v1699_v29  ;;  %v1701_v53 = vpop.eup %1700 }
 0x365   :  { %1704 = vrcp.f32 %v878_v50  ;;  %v1703_v48 = vpop.eup %1702  ;;  %v889_v9 = vadd.f32 1.0, %v1701_v53 }
 0x366   :  { %1706 = vrcp.f32 %v883_v7 }
 0x367   :  { %1708 = vrcp.f32 %v889_v9 }
 0x36f   :  { %v1705_v63 = vpop.eup %1704 }
 0x370   :  { %v1707_v55 = vpop.eup %1706  ;;  %v892_v58 = vmul.f32 %v1705_v63, %v1703_v48 }
 0x371   :  { %v891_v20 = vmul.f32 %v1707_v55, %v2390_v52  ;;  %v1709_v56 = vpop.eup %1708  ;;  %v2755_v52 = vld [vmem:[#allocation24_spill] sm:$0xff] }
 0x373   :  { %v2432_v54 = vadd.f32 %v892_v58, %v891_v20 }
 0x375   :  { %1710 = vtanh.f32 %v2432_v54 }
 0x37f   :  { %v1711_v59 = vpop.eup %1710 }
 0x380   :  { %v895_v60 = vmul.f32 %v1711_v59, %v1709_v56 }
 0x382   :  { %v896_v57 = vpack.c.bf16 %v895_v60, %v895_v60 }
 0x384   :  { %898 = vst [vmem:[#allocation13 + $0x8] sm:$0xf] %v896_v57  ;;  %939 = vmatmul.mubr.bf16.vlgmr.msra.gmra.mrb[28].mxu0 %v896_v57  ;;  %980 = vmatmul.mubr.bf16.vlgmr.msra.gmra.mrb[28].mxu1 %v896_v57 }
 0x385   :  { %1024 = vmatpush1.bf16.msra.mxu0 %v2116_v12  ;;  %1065 = vmatpush1.bf16.msra.mxu1 %v2118_v13 }
 0x386   :  { %1025 = vmatprep.subr.bf16.mxu0 %v2122_v14  ;;  %1066 = vmatprep.subr.bf16.mxu1 %v2124_v15 }
 0x387   :  { %1055 = vmatprep.mubr.bf16.mxu0 %v2752_v46  ;;  %1096 = vmatprep.mubr.bf16.mxu1 %v2752_v46 }
 0x389   :  { %1026 = vmatpush1.bf16.msra.mxu0 %v2126_v16  ;;  %1067 = vmatpush1.bf16.msra.mxu1 %v2130_v17 }
 0x38a   :  { %1027 = vmatprep.subr.bf16.mxu0 %v2134_v18  ;;  %1068 = vmatprep.subr.bf16.mxu1 %v2138_v19 }
 0x38d   :  { %1028 = vmatpush1.bf16.msra.mxu0 %v2142_v21  ;;  %1069 = vmatpush1.bf16.msra.mxu1 %v2146_v22 }
 0x38e   :  { %1029 = vmatprep.subr.bf16.mxu0 %v2148_v23  ;;  %1070 = vmatprep.subr.bf16.mxu1 %v2152_v24 }
 0x391   :  { %1030 = vmatpush1.bf16.msra.mxu0 %v2158_v25  ;;  %1071 = vmatpush1.bf16.msra.mxu1 %v2160_v26 }
 0x392   :  { %1031 = vmatprep.subr.bf16.mxu0 %v2162_v27  ;;  %1072 = vmatprep.subr.bf16.mxu1 %v2166_v28 }
 0x395   :  { %1032 = vmatpush1.bf16.msra.mxu0 %v2170_v30  ;;  %1073 = vmatpush1.bf16.msra.mxu1 %v2172_v31 }
 0x396   :  { %1033 = vmatprep.subr.bf16.mxu0 %v2176_v32  ;;  %1074 = vmatprep.subr.bf16.mxu1 %v2180_v33 }
 0x399   :  { %1034 = vmatpush1.bf16.msra.mxu0 %v2184_v34  ;;  %1075 = vmatpush1.bf16.msra.mxu1 %v2188_v35 }
 0x39a   :  { %1035 = vmatprep.subr.bf16.mxu0 %v2192_v36  ;;  %1076 = vmatprep.subr.bf16.mxu1 %v2194_v37 }
 0x39d   :  { %1036 = vmatpush1.bf16.msra.mxu0 %v2200_v39  ;;  %1077 = vmatpush1.bf16.msra.mxu1 %v2202_v40 }
 0x39e   :  { %1037 = vmatprep.subr.bf16.mxu0 %v2206_v41  ;;  %1078 = vmatprep.subr.bf16.mxu1 %v2208_v42 }
 0x3a1   :  { %1038 = vmatpush1.bf16.msra.mxu0 %v2214_v43  ;;  %1079 = vmatpush1.bf16.msra.mxu1 %v2216_v44 }
 0x3a2   :  { %1140 = vmatprep.subr.bf16.mxu0 %v2112_v8  ;;  %1181 = vmatprep.subr.bf16.mxu1 %v2114_v11 }
 0x457   :  { %v940_v12 = vpop.f32.mrb[28].mxu0  ;;  %v981_v13 = vpop.f32.mrb[28].mxu1 }
 0x458   :  { %v988_v0 = vadd.f32 %v940_v12, %v2755_v52  ;;  %v990_v49 = vadd.f32 %v981_v13, %v2756_v61  ;;  %v942_v47 = vpop.f32.mrb[29].mxu0  ;;  %v983_v51 = vpop.f32.mrb[29].mxu1  ;;  %v2477_v61 = vld [vmem:[#allocation11] ss:$16 sps:$4 sm:$0xff]  }
 0x459   :  { %v989_v1 = vadd.f32 %v942_v47, %v2757_v4  ;;  %v991_v3 = vadd.f32 %v983_v51, %v2758_v38  ;;  %v944_v45 = vpop.f32.mrb[30].mxu0  ;;  %v985_v5 = vpop.f32.mrb[30].mxu1 }
 0x45a   :  { %v992_v6 = vsub.f32 0.0, %v988_v0  ;;  %v945_v2 = vpop.f32.mrb[31].mxu0  ;;  %v986_v10 = vpop.f32.mrb[31].mxu1 }
 0x45b   :  { %v997_v8 = vsub.f32 0.0, %v989_v1  ;;  %v1003_v29 = vsub.f32 0.0, %v991_v3 }
 0x45c   :  { %v993_v62 = vmul.f32 1.442695, %v992_v6 }
 0x45d   :  { %v998_v11 = vmul.f32 1.442695, %v997_v8  ;;  %v1004_v50 = vmul.f32 1.442695, %v1003_v29  ;;  %v2529_v8 = vld [vmem:[#allocation11 + $0x24] ss:$16 sps:$4 sm:$0xff]  }
 0x45e   :  { %1712 = vpow2.f32 %v993_v62  ;;  %v2532_v62 = vld [vmem:[#allocation11 + $0x2c] ss:$16 sps:$4 sm:$0xff]   ;;  %v2540_v29 = vld [vmem:[#allocation11 + $0x28] ss:$16 sps:$4 sm:$0xff]  }
 0x45f   :  { %1714 = vpow2.f32 %v998_v11  ;;  %v2537_v11 = vld [vmem:[#allocation11 + $0x20] ss:$16 sps:$4 sm:$0xff]  }
 0x460   :  { %1716 = vpow2.f32 %v1004_v50  ;;  %v2543_v50 = vld [vmem:[#allocation11 + $0x44] ss:$16 sps:$4 sm:$0xff]  }
 0x461   :  { %1718 = vtanh.f32 %v990_v49  ;;  %v2480_v49 = vld [vmem:[#allocation11 + $0x8] ss:$16 sps:$4 sm:$0xff]  }
 0x468   :  { %v1713_v7 = vpop.eup %1712 }
 0x469   :  { %v1715_v53 = vpop.eup %1714  ;;  %v995_v48 = vadd.f32 1.0, %v1713_v7  ;;  %v2546_v7 = vld [vmem:[#allocation11 + $0x4c] ss:$16 sps:$4 sm:$0xff]  }
 0x46a   :  { %v1000_v63 = vadd.f32 1.0, %v1715_v53  ;;  %v1717_v55 = vpop.eup %1716  ;;  %v2549_v53 = vld [vmem:[#allocation11 + $0x40] ss:$16 sps:$4 sm:$0xff]  }
 0x46b   :  { %1720 = vrcp.f32 %v995_v48  ;;  %v1719_v58 = vpop.eup %1718  ;;  %v1006_v59 = vadd.f32 1.0, %v1717_v55  ;;  %v2552_v48 = vld [vmem:[#allocation11 + $0x48] ss:$16 sps:$4 sm:$0xff]   ;;  %v2558_v55 = vld [vmem:[#allocation11 + $0x6c] ss:$16 sps:$4 sm:$0xff]  }
 0x46c   :  { %1722 = vrcp.f32 %v1000_v63  ;;  %v2555_v63 = vld [vmem:[#allocation11 + $0x64] ss:$16 sps:$4 sm:$0xff]  }
 0x46d   :  { %1724 = vrcp.f32 %v1006_v59  ;;  %v2573_v59 = vld [vmem:[#allocation11 + $0x80] ss:$16 sps:$4 sm:$0xff]  }
 0x475   :  { %v1721_v9 = vpop.eup %1720 }
 0x476   :  { %v1723_v20 = vpop.eup %1722  ;;  %v1009_v56 = vmul.f32 %v1721_v9, %v1719_v58  ;;  %v2561_v58 = vld [vmem:[#allocation11 + $0x60] ss:$16 sps:$4 sm:$0xff]   ;;  %v2564_v9 = vld [vmem:[#allocation11 + $0x68] ss:$16 sps:$4 sm:$0xff]  }
 0x477   :  { %v1008_v60 = vmul.f32 %v1723_v20, %v2432_v54  ;;  %v1725_v12 = vpop.eup %1724  ;;  %v2567_v20 = vld [vmem:[#allocation11 + $0x84] ss:$16 sps:$4 sm:$0xff]  }
 0x479   :  { %v2474_v57 = vadd.f32 %v1009_v56, %v1008_v60  ;;  %v2570_v56 = vld [vmem:[#allocation11 + $0x8c] ss:$16 sps:$4 sm:$0xff]   ;;  %v2576_v60 = vld [vmem:[#allocation11 + $0x88] ss:$16 sps:$4 sm:$0xff]  }
 0x47b   :  { %1726 = vtanh.f32 %v2474_v57 }
 0x485   :  { %v1727_v13 = vpop.eup %1726 }
 0x486   :  { %v1012_v52 = vmul.f32 %v1727_v13, %v1725_v12  ;;  %v2582_v12 = vld [vmem:[#allocation11 + $0xac] ss:$16 sps:$4 sm:$0xff]   ;;  %v2585_v13 = vld [vmem:[#allocation11 + $0xa0] ss:$16 sps:$4 sm:$0xff]  }
 0x488   :  { %v1013_v0 = vpack.c.bf16 %v1012_v52, %v1012_v52  ;;  %v2588_v52 = vld [vmem:[#allocation11 + $0xa8] ss:$16 sps:$4 sm:$0xff]  }
 0x48a   :  { %1015 = vst [vmem:[#allocation13 + $0xc] sm:$0xf] %v1013_v0  ;;  %1056 = vmatmul.mubr.bf16.vlgmr.msra.gmra.mrb[32].mxu0 %v1013_v0  ;;  %1097 = vmatmul.mubr.bf16.vlgmr.msra.gmra.mrb[32].mxu1 %v1013_v0  ;;  %v2591_v0 = vld [vmem:[#allocation11 + $0xc4] ss:$16 sps:$4 sm:$0xff]  }
 0x48b   :  { %1141 = vmatpush1.bf16.msra.mxu0 %v2477_v61  ;;  %1182 = vmatpush1.bf16.msra.mxu1 %v2480_v49 }
 0x48c   :  { %1142 = vmatprep.subr.bf16.mxu0 %v2122_v14  ;;  %1183 = vmatprep.subr.bf16.mxu1 %v2124_v15  ;;  %v2513_v14 = vld [vmem:[#allocation11 + $0x4] ss:$16 sps:$4 sm:$0xff]   ;;  %v2516_v15 = vld [vmem:[#allocation11 + $0xc] ss:$16 sps:$4 sm:$0xff]  }
 0x48d   :  { %1172 = vmatprep.mubr.bf16.mxu0 %v2752_v46  ;;  %1213 = vmatprep.mubr.bf16.mxu1 %v2752_v46 }
 0x48f   :  { %1143 = vmatpush1.bf16.msra.mxu0 %v2126_v16  ;;  %1184 = vmatpush1.bf16.msra.mxu1 %v2130_v17 }
 0x490   :  { %1144 = vmatprep.subr.bf16.mxu0 %v2134_v18  ;;  %1185 = vmatprep.subr.bf16.mxu1 %v2138_v19  ;;  %v2759_v18 = vld [vmem:[#allocation28_spill] sm:$0xff] }
 0x493   :  { %1145 = vmatpush1.bf16.msra.mxu0 %v2142_v21  ;;  %1186 = vmatpush1.bf16.msra.mxu1 %v2146_v22  ;;  %v2760_v21 = vld [vmem:[#allocation29_spill] sm:$0xff] }
 0x494   :  { %1146 = vmatprep.subr.bf16.mxu0 %v2148_v23  ;;  %1187 = vmatprep.subr.bf16.mxu1 %v2152_v24 }
 0x497   :  { %1147 = vmatpush1.bf16.msra.mxu0 %v2158_v25  ;;  %1188 = vmatpush1.bf16.msra.mxu1 %v2160_v26  ;;  %v2761_v25 = vld [vmem:[#allocation30_spill] sm:$0xff] }
 0x498   :  { %1148 = vmatprep.subr.bf16.mxu0 %v2162_v27  ;;  %1189 = vmatprep.subr.bf16.mxu1 %v2166_v28  ;;  %v2762_v27 = vld [vmem:[#allocation31_spill] sm:$0xff] }
 0x49b   :  { %1149 = vmatpush1.bf16.msra.mxu0 %v2170_v30  ;;  %1190 = vmatpush1.bf16.msra.mxu1 %v2172_v31 }
 0x49c   :  { %1150 = vmatprep.subr.bf16.mxu0 %v2176_v32  ;;  %1191 = vmatprep.subr.bf16.mxu1 %v2180_v33 }
 0x49f   :  { %1151 = vmatpush1.bf16.msra.mxu0 %v2184_v34  ;;  %1192 = vmatpush1.bf16.msra.mxu1 %v2188_v35 }
 0x4a0   :  { %1152 = vmatprep.subr.bf16.mxu0 %v2192_v36  ;;  %1193 = vmatprep.subr.bf16.mxu1 %v2194_v37 }
 0x4a3   :  { %1153 = vmatpush1.bf16.msra.mxu0 %v2200_v39  ;;  %1194 = vmatpush1.bf16.msra.mxu1 %v2202_v40 }
 0x4a4   :  { %1154 = vmatprep.subr.bf16.mxu0 %v2206_v41  ;;  %1195 = vmatprep.subr.bf16.mxu1 %v2208_v42 }
 0x4a7   :  { %1155 = vmatpush1.bf16.msra.mxu0 %v2214_v43  ;;  %1196 = vmatpush1.bf16.msra.mxu1 %v2216_v44 }
 0x4a8   :  { %1257 = vmatprep.subr.bf16.mxu0 %v2513_v14  ;;  %1298 = vmatprep.subr.bf16.mxu1 %v2516_v15 }
 0x55d   :  { %v1057_v16 = vpop.f32.mrb[32].mxu0  ;;  %v1098_v17 = vpop.f32.mrb[32].mxu1 }
 0x55e   :  { %v1105_v19 = vadd.f32 %v1057_v16, %v2759_v18  ;;  %v1107_v22 = vadd.f32 %v1098_v17, %v2760_v21  ;;  %v1059_v23 = vpop.f32.mrb[33].mxu0  ;;  %v1100_v24 = vpop.f32.mrb[33].mxu1  ;;  %v2594_v16 = vld [vmem:[#allocation11 + $0xcc] ss:$16 sps:$4 sm:$0xff]   ;;  %v2597_v17 = vld [vmem:[#allocation11 + $0xc0] ss:$16 sps:$4 sm:$0xff]  }
 0x55f   :  { %v1106_v26 = vadd.f32 %v1059_v23, %v2761_v25  ;;  %v1108_v28 = vadd.f32 %v1100_v24, %v2762_v27  ;;  %v1061_v30 = vpop.f32.mrb[34].mxu0  ;;  %v1102_v31 = vpop.f32.mrb[34].mxu1  ;;  %v2600_v18 = vld [vmem:[#allocation11 + $0xc8] ss:$16 sps:$4 sm:$0xff]   ;;  %v2606_v21 = vld [vmem:[#allocation11 + $0xec] ss:$16 sps:$4 sm:$0xff]  }
 0x560   :  { %v1109_v32 = vsub.f32 0.0, %v1105_v19  ;;  %v1062_v33 = vpop.f32.mrb[35].mxu0  ;;  %v1103_v34 = vpop.f32.mrb[35].mxu1  ;;  %v2603_v19 = vld [vmem:[#allocation11 + $0xe4] ss:$16 sps:$4 sm:$0xff]  }
 0x561   :  { %v1114_v35 = vsub.f32 0.0, %v1106_v26  ;;  %v1120_v39 = vsub.f32 0.0, %v1108_v28  ;;  %v2612_v23 = vld [vmem:[#allocation11 + $0xe8] ss:$16 sps:$4 sm:$0xff]   ;;  %v2763_v26 = vld [vmem:[#allocation32_spill] sm:$0xff]  ;;  %v2765_v33 = vld [vmem:[#allocation34_spill] sm:$0xff] }
 0x562   :  { %v1110_v36 = vmul.f32 1.442695, %v1109_v32  ;;  %v2764_v28 = vld [vmem:[#allocation33_spill] sm:$0xff] }
 0x563   :  { %v1115_v37 = vmul.f32 1.442695, %v1114_v35  ;;  %v1121_v40 = vmul.f32 1.442695, %v1120_v39  ;;  %v2766_v35 = vld [vmem:[#allocation35_spill] sm:$0xff] }
 0x564   :  { %1728 = vpow2.f32 %v1110_v36 }
 0x565   :  { %1730 = vpow2.f32 %v1115_v37 }
 0x566   :  { %1732 = vpow2.f32 %v1121_v40 }
 0x567   :  { %1734 = vtanh.f32 %v1107_v22  ;;  %v2609_v22 = vld [vmem:[#allocation11 + $0xe0] ss:$16 sps:$4 sm:$0xff]  }
 0x56e   :  { %v1729_v41 = vpop.eup %1728 }
 0x56f   :  { %v1731_v42 = vpop.eup %1730  ;;  %v1112_v43 = vadd.f32 1.0, %v1729_v41 }
 0x570   :  { %v1117_v44 = vadd.f32 1.0, %v1731_v42  ;;  %v1733_v54 = vpop.eup %1732 }
 0x571   :  { %1736 = vrcp.f32 %v1112_v43  ;;  %v1735_v47 = vpop.eup %1734  ;;  %v1123_v38 = vadd.f32 1.0, %v1733_v54 }
 0x572   :  { %1738 = vrcp.f32 %v1117_v44 }
 0x573   :  { %1740 = vrcp.f32 %v1123_v38 }
 0x57b   :  { %v1737_v51 = vpop.eup %1736 }
 0x57c   :  { %v1739_v4 = vpop.eup %1738  ;;  %v1126_v1 = vmul.f32 %v1737_v51, %v1735_v47 }
 0x57d   :  { %v1125_v3 = vmul.f32 %v1739_v4, %v2474_v57  ;;  %v1741_v5 = vpop.eup %1740  ;;  %v2579_v57 = vld [vmem:[#allocation11 + $0xa4] ss:$16 sps:$4 sm:$0xff]  }
 0x57f   :  { %v2524_v45 = vadd.f32 %v1126_v1, %v1125_v3 }
 0x581   :  { %1742 = vtanh.f32 %v2524_v45 }
 0x58b   :  { %v1743_v6 = vpop.eup %1742 }
 0x58c   :  { %v1129_v2 = vmul.f32 %v1743_v6, %v1741_v5 }
 0x58e   :  { %v1130_v10 = vpack.c.bf16 %v1129_v2, %v1129_v2 }
 0x590   :  { %1132 = vst [vmem:[#allocation13 + $0x10] sm:$0xf] %v1130_v10  ;;  %1173 = vmatmul.mubr.bf16.vlgmr.msra.gmra.mrb[36].mxu0 %v1130_v10  ;;  %1214 = vmatmul.mubr.bf16.vlgmr.msra.gmra.mrb[36].mxu1 %v1130_v10 }
 0x591   :  { %1258 = vmatpush1.bf16.msra.mxu0 %v2477_v61  ;;  %1299 = vmatpush1.bf16.msra.mxu1 %v2480_v49 }
 0x592   :  { %1259 = vmatprep.subr.bf16.mxu0 %v2529_v8  ;;  %1300 = vmatprep.subr.bf16.mxu1 %v2532_v62 }
 0x593   :  { %1289 = vmatprep.mubr.bf16.mxu0 %v2752_v46  ;;  %1330 = vmatprep.mubr.bf16.mxu1 %v2752_v46 }
 0x595   :  { %1260 = vmatpush1.bf16.msra.mxu0 %v2537_v11  ;;  %1301 = vmatpush1.bf16.msra.mxu1 %v2540_v29 }
 0x596   :  { %1261 = vmatprep.subr.bf16.mxu0 %v2543_v50  ;;  %1302 = vmatprep.subr.bf16.mxu1 %v2546_v7 }
 0x599   :  { %1262 = vmatpush1.bf16.msra.mxu0 %v2549_v53  ;;  %1303 = vmatpush1.bf16.msra.mxu1 %v2552_v48 }
 0x59a   :  { %1263 = vmatprep.subr.bf16.mxu0 %v2555_v63  ;;  %1304 = vmatprep.subr.bf16.mxu1 %v2558_v55 }
 0x59d   :  { %1264 = vmatpush1.bf16.msra.mxu0 %v2561_v58  ;;  %1305 = vmatpush1.bf16.msra.mxu1 %v2564_v9 }
 0x59e   :  { %1265 = vmatprep.subr.bf16.mxu0 %v2567_v20  ;;  %1306 = vmatprep.subr.bf16.mxu1 %v2570_v56 }
 0x5a1   :  { %1266 = vmatpush1.bf16.msra.mxu0 %v2573_v59  ;;  %1307 = vmatpush1.bf16.msra.mxu1 %v2576_v60 }
 0x5a2   :  { %1267 = vmatprep.subr.bf16.mxu0 %v2579_v57  ;;  %1308 = vmatprep.subr.bf16.mxu1 %v2582_v12 }
 0x5a5   :  { %1268 = vmatpush1.bf16.msra.mxu0 %v2585_v13  ;;  %1309 = vmatpush1.bf16.msra.mxu1 %v2588_v52 }
 0x5a6   :  { %1269 = vmatprep.subr.bf16.mxu0 %v2591_v0  ;;  %1310 = vmatprep.subr.bf16.mxu1 %v2594_v16 }
 0x5a9   :  { %1270 = vmatpush1.bf16.msra.mxu0 %v2597_v17  ;;  %1311 = vmatpush1.bf16.msra.mxu1 %v2600_v18 }
 0x5aa   :  { %1271 = vmatprep.subr.bf16.mxu0 %v2603_v19  ;;  %1312 = vmatprep.subr.bf16.mxu1 %v2606_v21 }
 0x5ad   :  { %1272 = vmatpush1.bf16.msra.mxu0 %v2609_v22  ;;  %1313 = vmatpush1.bf16.msra.mxu1 %v2612_v23 }
 0x5ae   :  { %1374 = vmatprep.subr.bf16.mxu0 %v2513_v14  ;;  %1415 = vmatprep.subr.bf16.mxu1 %v2516_v15 }
 0x663   :  { %v1174_v24 = vpop.f32.mrb[36].mxu0  ;;  %v1215_v25 = vpop.f32.mrb[36].mxu1 }
 0x664   :  { %v1222_v27 = vadd.f32 %v1174_v24, %v2763_v26  ;;  %v1224_v30 = vadd.f32 %v1215_v25, %v2764_v28  ;;  %v1176_v31 = vpop.f32.mrb[37].mxu0  ;;  %v1217_v32 = vpop.f32.mrb[37].mxu1 }
 0x665   :  { %v1223_v34 = vadd.f32 %v1176_v31, %v2765_v33  ;;  %v1225_v36 = vadd.f32 %v1217_v32, %v2766_v35  ;;  %v1178_v37 = vpop.f32.mrb[38].mxu0  ;;  %v1219_v39 = vpop.f32.mrb[38].mxu1 }
 0x666   :  { %v1226_v40 = vsub.f32 0.0, %v1222_v27  ;;  %v1179_v41 = vpop.f32.mrb[39].mxu0  ;;  %v1220_v42 = vpop.f32.mrb[39].mxu1 }
 0x667   :  { %v1231_v14 = vsub.f32 0.0, %v1223_v34  ;;  %v1237_v44 = vsub.f32 0.0, %v1225_v36  ;;  %v2772_v42 = vld [vmem:[#allocation41_spill] sm:$0xff] }
 0x668   :  { %v1227_v43 = vmul.f32 1.442695, %v1226_v40  ;;  %v2771_v40 = vld [vmem:[#allocation40_spill] sm:$0xff] }
 0x669   :  { %v1232_v15 = vmul.f32 1.442695, %v1231_v14  ;;  %v1238_v54 = vmul.f32 1.442695, %v1237_v44  ;;  %v2773_v44 = vld [vmem:[#allocation42_spill] sm:$0xff] }
 0x66a   :  { %1744 = vpow2.f32 %v1227_v43 }
 0x66b   :  { %1746 = vpow2.f32 %v1232_v15 }
 0x66c   :  { %1748 = vpow2.f32 %v1238_v54 }
 0x66d   :  { %1750 = vtanh.f32 %v1224_v30 }
 0x674   :  { %v1745_v47 = vpop.eup %1744 }
 0x675   :  { %v1747_v51 = vpop.eup %1746  ;;  %v1229_v4 = vadd.f32 1.0, %v1745_v47  ;;  %v2774_v47 = vld [vmem:[#allocation43_spill] sm:$0xff] }
 0x676   :  { %v1234_v1 = vadd.f32 1.0, %v1747_v51  ;;  %v1749_v38 = vpop.eup %1748 }
 0x677   :  { %1752 = vrcp.f32 %v1229_v4  ;;  %v1751_v3 = vpop.eup %1750  ;;  %v1240_v10 = vadd.f32 1.0, %v1749_v38 }
 0x678   :  { %1754 = vrcp.f32 %v1234_v1 }
 0x679   :  { %1756 = vrcp.f32 %v1240_v10 }
 0x681   :  { %v1753_v5 = vpop.eup %1752 }
 0x682   :  { %v1755_v6 = vpop.eup %1754  ;;  %v1243_v2 = vmul.f32 %v1753_v5, %v1751_v3 }
 0x683   :  { %v1242_v24 = vmul.f32 %v1755_v6, %v2524_v45  ;;  %v1757_v26 = vpop.eup %1756 }
 0x685   :  { %v2622_v25 = vadd.f32 %v1243_v2, %v1242_v24 }
 0x687   :  { %1758 = vtanh.f32 %v2622_v25 }
 0x691   :  { %v1759_v27 = vpop.eup %1758 }
 0x692   :  { %v1246_v28 = vmul.f32 %v1759_v27, %v1757_v26 }
 0x694   :  { %v1247_v30 = vpack.c.bf16 %v1246_v28, %v1246_v28 }
 0x696   :  { %1249 = vst [vmem:[#allocation13 + $0x14] sm:$0xf] %v1247_v30  ;;  %1290 = vmatmul.mubr.bf16.vlgmr.msra.gmra.mrb[40].mxu0 %v1247_v30  ;;  %1331 = vmatmul.mubr.bf16.vlgmr.msra.gmra.mrb[40].mxu1 %v1247_v30 }
 0x697   :  { %1375 = vmatpush1.bf16.msra.mxu0 %v2477_v61  ;;  %1416 = vmatpush1.bf16.msra.mxu1 %v2480_v49  ;;  %v2767_v49 = vld [vmem:[#allocation36_spill] sm:$0xff] }
 0x698   :  { %1376 = vmatprep.subr.bf16.mxu0 %v2529_v8  ;;  %1417 = vmatprep.subr.bf16.mxu1 %v2532_v62  ;;  %v2768_v8 = vld [vmem:[#allocation37_spill] sm:$0xff] }
 0x699   :  { %1406 = vmatprep.mubr.bf16.mxu0 %v2752_v46  ;;  %1447 = vmatprep.mubr.bf16.mxu1 %v2752_v46 }
 0x69b   :  { %1377 = vmatpush1.bf16.msra.mxu0 %v2537_v11  ;;  %1418 = vmatpush1.bf16.msra.mxu1 %v2540_v29 }
 0x69c   :  { %1378 = vmatprep.subr.bf16.mxu0 %v2543_v50  ;;  %1419 = vmatprep.subr.bf16.mxu1 %v2546_v7  ;;  %v2769_v50 = vld [vmem:[#allocation38_spill] sm:$0xff] }
 0x69f   :  { %1379 = vmatpush1.bf16.msra.mxu0 %v2549_v53  ;;  %1420 = vmatpush1.bf16.msra.mxu1 %v2552_v48  ;;  %v2770_v53 = vld [vmem:[#allocation39_spill] sm:$0xff] }
 0x6a0   :  { %1380 = vmatprep.subr.bf16.mxu0 %v2555_v63  ;;  %1421 = vmatprep.subr.bf16.mxu1 %v2558_v55 }
 0x6a3   :  { %1381 = vmatpush1.bf16.msra.mxu0 %v2561_v58  ;;  %1422 = vmatpush1.bf16.msra.mxu1 %v2564_v9 }
 0x6a4   :  { %1382 = vmatprep.subr.bf16.mxu0 %v2567_v20  ;;  %1423 = vmatprep.subr.bf16.mxu1 %v2570_v56 }
 0x6a7   :  { %1383 = vmatpush1.bf16.msra.mxu0 %v2573_v59  ;;  %1424 = vmatpush1.bf16.msra.mxu1 %v2576_v60 }
 0x6a8   :  { %1384 = vmatprep.subr.bf16.mxu0 %v2579_v57  ;;  %1425 = vmatprep.subr.bf16.mxu1 %v2582_v12 }
 0x6ab   :  { %1385 = vmatpush1.bf16.msra.mxu0 %v2585_v13  ;;  %1426 = vmatpush1.bf16.msra.mxu1 %v2588_v52 }
 0x6ac   :  { %1386 = vmatprep.subr.bf16.mxu0 %v2591_v0  ;;  %1427 = vmatprep.subr.bf16.mxu1 %v2594_v16 }
 0x6af   :  { %1387 = vmatpush1.bf16.msra.mxu0 %v2597_v17  ;;  %1428 = vmatpush1.bf16.msra.mxu1 %v2600_v18 }
 0x6b0   :  { %1388 = vmatprep.subr.bf16.mxu0 %v2603_v19  ;;  %1429 = vmatprep.subr.bf16.mxu1 %v2606_v21 }
 0x6b3   :  { %1389 = vmatpush1.bf16.msra.mxu0 %v2609_v22  ;;  %1430 = vmatpush1.bf16.msra.mxu1 %v2612_v23 }
 0x769   :  { %v1291_v46 = vpop.f32.mrb[40].mxu0  ;;  %v1332_v61 = vpop.f32.mrb[40].mxu1 }
 0x76a   :  { %v1339_v45 = vadd.f32 %v1291_v46, %v2767_v49  ;;  %v1341_v62 = vadd.f32 %v1332_v61, %v2768_v8  ;;  %v1293_v11 = vpop.f32.mrb[41].mxu0  ;;  %v1334_v29 = vpop.f32.mrb[41].mxu1 }
 0x76b   :  { %v1340_v7 = vadd.f32 %v1293_v11, %v2769_v50  ;;  %v1342_v48 = vadd.f32 %v1334_v29, %v2770_v53  ;;  %v1295_v63 = vpop.f32.mrb[42].mxu0  ;;  %v1336_v55 = vpop.f32.mrb[42].mxu1 }
 0x76c   :  { %v1343_v58 = vsub.f32 0.0, %v1339_v45  ;;  %v1296_v9 = vpop.f32.mrb[43].mxu0  ;;  %v1337_v20 = vpop.f32.mrb[43].mxu1 }
 0x76d   :  { %v1348_v56 = vsub.f32 0.0, %v1340_v7  ;;  %v1354_v57 = vsub.f32 0.0, %v1342_v48 }
 0x76e   :  { %v1344_v59 = vmul.f32 1.442695, %v1343_v58 }
 0x76f   :  { %v1349_v60 = vmul.f32 1.442695, %v1348_v56  ;;  %v1355_v12 = vmul.f32 1.442695, %v1354_v57 }
 0x770   :  { %1760 = vpow2.f32 %v1344_v59 }
 0x771   :  { %1762 = vpow2.f32 %v1349_v60 }
 0x772   :  { %1764 = vpow2.f32 %v1355_v12 }
 0x773   :  { %1766 = vtanh.f32 %v1341_v62 }
 0x77a   :  { %v1761_v13 = vpop.eup %1760 }
 0x77b   :  { %v1763_v52 = vpop.eup %1762  ;;  %v1346_v0 = vadd.f32 1.0, %v1761_v13 }
 0x77c   :  { %v1351_v16 = vadd.f32 1.0, %v1763_v52  ;;  %v1765_v17 = vpop.eup %1764 }
 0x77d   :  { %1768 = vrcp.f32 %v1346_v0  ;;  %v1767_v18 = vpop.eup %1766  ;;  %v1357_v23 = vadd.f32 1.0, %v1765_v17 }
 0x77e   :  { %1770 = vrcp.f32 %v1351_v16 }
 0x77f   :  { %1772 = vrcp.f32 %v1357_v23 }
 0x787   :  { %v1769_v19 = vpop.eup %1768 }
 0x788   :  { %v1771_v21 = vpop.eup %1770  ;;  %v1360_v22 = vmul.f32 %v1769_v19, %v1767_v18 }
 0x789   :  { %v1359_v31 = vmul.f32 %v1771_v21, %v2622_v25  ;;  %v1773_v33 = vpop.eup %1772 }
 0x78b   :  { %v1361_v32 = vadd.f32 %v1360_v22, %v1359_v31 }
 0x78d   :  { %1774 = vtanh.f32 %v1361_v32 }
 0x797   :  { %v1775_v34 = vpop.eup %1774 }
 0x798   :  { %v1363_v35 = vmul.f32 %v1775_v34, %v1773_v33 }
 0x79a   :  { %v1364_v36 = vpack.c.bf16 %v1363_v35, %v1363_v35 }
 0x79c   :  { %1366 = vst [vmem:[#allocation13 + $0x18] sm:$0xf] %v1364_v36  ;;  %1407 = vmatmul.mubr.bf16.vlgmr.msra.gmra.mrb[44].mxu0 %v1364_v36  ;;  %1448 = vmatmul.mubr.bf16.vlgmr.msra.gmra.mrb[44].mxu1 %v1364_v36 }
 0x86f   :  { %v1408_v37 = vpop.f32.mrb[44].mxu0  ;;  %v1449_v39 = vpop.f32.mrb[44].mxu1 }
 0x870   :  { %v1456_v41 = vadd.f32 %v1408_v37, %v2771_v40  ;;  %v1458_v14 = vadd.f32 %v1449_v39, %v2772_v42  ;;  %v1410_v43 = vpop.f32.mrb[45].mxu0  ;;  %v1451_v15 = vpop.f32.mrb[45].mxu1 }
 0x871   :  { %v1457_v54 = vadd.f32 %v1410_v43, %v2773_v44  ;;  %v1459_v51 = vadd.f32 %v1451_v15, %v2774_v47  ;;  %v1412_v4 = vpop.f32.mrb[46].mxu0  ;;  %v1453_v1 = vpop.f32.mrb[46].mxu1 }
 0x872   :  { %v1460_v38 = vsub.f32 0.0, %v1456_v41  ;;  %v1413_v3 = vpop.f32.mrb[47].mxu0  ;;  %v1454_v5 = vpop.f32.mrb[47].mxu1 }
 0x873   :  { %v1465_v6 = vsub.f32 0.0, %v1457_v54  ;;  %v1471_v24 = vsub.f32 0.0, %v1459_v51 }
 0x874   :  { %v1461_v2 = vmul.f32 1.442695, %v1460_v38 }
 0x875   :  { %v1466_v10 = vmul.f32 1.442695, %v1465_v6  ;;  %v1472_v25 = vmul.f32 1.442695, %v1471_v24 }
 0x876   :  { %1776 = vpow2.f32 %v1461_v2 }
 0x877   :  { %1778 = vpow2.f32 %v1466_v10 }
 0x878   :  { %1780 = vpow2.f32 %v1472_v25 }
 0x879   :  { %1782 = vtanh.f32 %v1458_v14 }
 0x880   :  { %v1777_v26 = vpop.eup %1776 }
 0x881   :  { %v1779_v27 = vpop.eup %1778  ;;  %v1463_v28 = vadd.f32 1.0, %v1777_v26 }
 0x882   :  { %v1468_v30 = vadd.f32 1.0, %v1779_v27  ;;  %v1781_v46 = vpop.eup %1780 }
 0x883   :  { %1784 = vrcp.f32 %v1463_v28  ;;  %v1783_v61 = vpop.eup %1782  ;;  %v1474_v62 = vadd.f32 1.0, %v1781_v46 }
 0x884   :  { %1786 = vrcp.f32 %v1468_v30 }
 0x885   :  { %1788 = vrcp.f32 %v1474_v62 }
 0x88d   :  { %v1785_v49 = vpop.eup %1784 }
 0x88e   :  { %v1787_v45 = vpop.eup %1786  ;;  %v1477_v8 = vmul.f32 %v1785_v49, %v1783_v61 }
 0x88f   :  { %v1476_v11 = vmul.f32 %v1787_v45, %v1361_v32  ;;  %v1789_v50 = vpop.eup %1788 }
 0x891   :  { %v1478_v29 = vadd.f32 %v1477_v8, %v1476_v11 }
 0x893   :  { %1790 = vtanh.f32 %v1478_v29  ;;  %1492 = vst [vmem:[#allocation16] sm:$0xff] %v1478_v29 }
 0x89d   :  { %v1791_v7 = vpop.eup %1790 }
 0x89e   :  { %v1480_v53 = vmul.f32 %v1791_v7, %v1789_v50 }
 0x8a0   :  { %v1481_v48 = vpack.c.bf16 %v1480_v53, %v1480_v53  ;;  %1490 = vst [vmem:[#allocation14] sm:$0xff] %v1480_v53 }
 0x8a1   :  { %1923 = shalt.err (!%p1920_p8)
}
 0x8a2   :  { %s1924_s20 = scalar_lea.hbm %s2726_s7, 128 }
 0x8a3   :  { %p1925_p9 = scmp.ne.s32.totalorder %s2726_s7, %s1924_s20  ;;  %p1928_p10 = scmp.lt.u32.totalorder %s1924_s20, %s2726_s7 }
 0x8a5   :  { %p1930_p11 = pnand %p1928_p10, %p1925_p9 }
 0x8a7   :  { %1933 = shalt.err (!%p1930_p11)
}
 0x8a8   :  { %1514 = dma.vmem_to_hbm [thread:$0]  %s1512_s14, 128, %s2726_s7, [#allocation15]   ;;  %1483 = vst [vmem:[#allocation13 + $0x1c] sm:$0xf] %v1481_v48 }
 0x8a9   :  { %s1934_s28 = scalar_lea.vmem %s2666_s16, 128  ;;  %p1939_p13 = scmp.lt.s32.totalorder %s2666_s16, %s2666_s16 }
 0x8aa   :  { %p1935_p12 = scmp.ne.s32.totalorder %s2666_s16, %s1934_s28  ;;  %p1940_p0 = scmp.lt.s32.totalorder %s1934_s28, %s1934_s28 }
 0x8ac   :  { %p1941_p1 = por %p1940_p0, %p1939_p13 }
 0x8ae   :  { %p1942_p2 = pnand %p1941_p1, %p1935_p12 }
 0x8b0   :  { %1945 = shalt.err (!%p1942_p2)
}
 0x8b1   :  { %s1946_s9 = scalar_lea.hbm %s2727_s8, 128 }
 0x8b2   :  { %p1947_p3 = scmp.ne.s32.totalorder %s2727_s8, %s1946_s9  ;;  %p1950_p4 = scmp.lt.u32.totalorder %s1946_s9, %s2727_s8 }
 0x8b4   :  { %p1952_p5 = pnand %p1950_p4, %p1947_p3 }
 0x8b6   :  { %1955 = shalt.err (!%p1952_p5)
}
 0x8b7   :  { %1524 = dma.vmem_to_hbm [thread:$0]  %s2666_s16, 128, %s2727_s8, [#allocation15]  }
 0x8b8   :  { %s1956_s13 = scalar_lea.vmem %s2668_s18, 512  ;;  %p1961_p7 = scmp.lt.s32.totalorder %s2668_s18, %s2668_s18 }
 0x8b9   :  { %p1957_p6 = scmp.ne.s32.totalorder %s2668_s18, %s1956_s13  ;;  %p1962_p8 = scmp.lt.s32.totalorder %s1956_s13, %s1956_s13 }
 0x8bb   :  { %p1963_p9 = por %p1962_p8, %p1961_p7 }
 0x8bd   :  { %p1964_p10 = pnand %p1963_p9, %p1957_p6 }
 0x8bf   :  { %1967 = shalt.err (!%p1964_p10)
}
 0x8c0   :  { %s1968_s15 = scalar_lea.hbm %s2725_s6, 512 }
 0x8c1   :  { %p1969_p11 = scmp.ne.s32.totalorder %s2725_s6, %s1968_s15  ;;  %p1972_p12 = scmp.lt.u32.totalorder %s1968_s15, %s2725_s6 }
 0x8c3   :  { %p1974_p13 = pnand %p1972_p12, %p1969_p11 }
 0x8c5   :  { %1977 = shalt.err (!%p1974_p13)
}
 0x8c6   :  { %1504 = dma.vmem_to_hbm [thread:$0]  %s2668_s18, 512, %s2725_s6, [#allocation7], %s1990_s1, %s1990_s1, %s1991_s27  }
 0x8c7   :  { %1984 = dma.done.wait [#allocation7], 512  }
 0x8c8   :  { %1985 = vsyncadd [#allocation7], 4294966784 }
 0x8c9   :  { %1986 = dma.done.wait [#allocation15], 256  }
 0x8ca   :  { %1987 = vsyncadd [#allocation15], 4294967040 }
 0x8cb   :  { %1534 = vsyncpa [#allocation6], 1 }
 0x8cc   :  { %1535 = vsyncpa [#allocation9], 1 }
 0x8cd   :  { %1536 = vsyncpa [#allocation12], 1 }
 0x8ce   :  { %1537 = vsyncpa [#allocation7], 1 }
 0x8cf   :  { %1538 = vsyncpa [#allocation15], 1 }

</bundles_post_ra>
